<compile_context>
chip_gen: v6e
topology: v6e:2x2x1
jax: 0.10.0
libtpu: 0.0.40
codegen_flags: <defaults>
</compile_context>

<pallas_src>
import functools

import jax
import jax.numpy as jnp
from jax.experimental import pallas as pl
from jax.experimental.pallas import tpu as pltpu


def _round_up(x, m):
    return (x + m - 1) // m * m


def _chip_kind():
    try:
        return jax.devices()[0].device_kind.lower()
    except Exception:  # pragma: no cover
        return "tpu"


def _target_rows(kind):
    # MXU M width: 128 on <=v5, 256 on v6e / v7x.
    return 128 if any(v in kind for v in ("v2", "v3", "v4", "v5")) else 256


def _prefer_multicore(kind):
    # v7x has 2 TensorCores per chip; keep the parallel grid extent >= 2 there.
    return ("v7" in kind) or ("tpu7" in kind) or ("7x" in kind)


# ----------------------------------------------------------------------------
# Input-projection kernel (M-tiled linear)
# ----------------------------------------------------------------------------

def _linear_kernel(x_ref, w_ref, b_ref, out_ref):
    # bf16 operands, f32 MXU accumulation (f32xf32 runs at a fraction of the
    # bf16 MXU rate on all TPU generations).
    out_ref[...] = (
        jnp.dot(x_ref[...].astype(jnp.bfloat16), w_ref[...],
                preferred_element_type=jnp.float32)
        + b_ref[...]
    )


def linear(x, w, b, *, block_m=256):
    """x: (M, K) f32, w: (K, N) f32, b: (1, N) f32 -> (M, N) f32, tiled over M."""
    M, K = x.shape
    N = w.shape[1]
    TM = min(block_m, _round_up(M, 8))
    Mp = _round_up(M, TM)
    xp = jnp.pad(x, ((0, Mp - M), (0, 0))) if Mp != M else x
    wb = w.astype(jnp.bfloat16)
    out = pl.pallas_call(
        _linear_kernel,
        out_shape=jax.ShapeDtypeStruct((Mp, N), jnp.float32),
        grid=(Mp // TM,),
        in_specs=[
            pl.BlockSpec((TM, K), lambda i: (i, 0)),
            # constant-index weight / bias: single-buffered (no pipelining gain)
            pl.BlockSpec((K, N), lambda i: (0, 0), pipeline_mode=pl.Buffered(1)),
            pl.BlockSpec((1, N), lambda i: (0, 0), pipeline_mode=pl.Buffered(1)),
        ],
        out_specs=pl.BlockSpec((TM, N), lambda i: (i, 0)),
        compiler_params=pltpu.CompilerParams(
            dimension_semantics=("parallel",),
            vmem_limit_bytes=64 * 1024 * 1024),
    )(xp, wb, b)
    return out[:M] if Mp != M else out


# ----------------------------------------------------------------------------
# Fused STT_Block kernel
# ----------------------------------------------------------------------------

def _layer_norm(x, g, b, eps=1e-5):
    mu = jnp.mean(x, axis=-1, keepdims=True)
    var = jnp.mean((x - mu) ** 2, axis=-1, keepdims=True)
    return (x - mu) * jax.lax.rsqrt(var + eps) * g + b


def _stt_block_kernel(
    tgt_ref, src_ref,
    wq_ref, bq_ref, wkv_ref, bkv_ref, wo_ref, bo_ref,
    ln1g_ref, ln1b_ref, w1_ref, b1_ref, w2_ref, b2_ref,
    ln2g_ref, ln2b_ref,
    out_ref,
    *, num_heads, head_dim, tgt_len, src_len,
):
    """Fused STT_Block on a (Bb*L, C) slab of Bb batch rows.

    tgt_ref: (Mt, C) = (Bb*L, C), src_ref: (Ms, C) = (Bb*S, C).
    Matmul weights arrive in bf16 (built in the wrapper); accumulation is f32,
    LayerNorm / softmax statistics stay f32.  The softmax scale is folded into
    wq / bq; K|V share one fused (C, 2C) projection.
    """
    H, D = num_heads, head_dim
    C = H * D
    L, S = tgt_len, src_len

    xt = tgt_ref[...]                                   # (Mt, C) f32
    xs = src_ref[...]                                   # (Ms, C) f32
    Mt = xt.shape[0]
    Ms = xs.shape[0]

    # Fused projections (scale already folded into wq / bq).
    q = jnp.dot(xt.astype(jnp.bfloat16), wq_ref[...],
                preferred_element_type=jnp.float32) + bq_ref[...]
    kv = jnp.dot(xs.astype(jnp.bfloat16), wkv_ref[...],
                 preferred_element_type=jnp.float32) + bkv_ref[...]
    qb = q.astype(jnp.bfloat16)                         # (Mt, C)
    kvb = kv.astype(jnp.bfloat16)                       # (Ms, 2C)

    # Head-major stacks -> all heads share two batched MXU einsums instead of
    # 2*H tiny K=D / N=D matmuls + an H-way output concat (review item 1).
    q_h = jnp.stack([qb[:, h * D:(h + 1) * D] for h in range(H)], axis=0)      # (H, Mt, D)
    k_h = jnp.stack([kvb[:, h * D:(h + 1) * D] for h in range(H)], axis=0)     # (H, Ms, D)
    v_h = jnp.stack([kvb[:, C + h * D:C + (h + 1) * D] for h in range(H)], axis=0)

    # Block-diagonal additive mask built in-kernel (no HBM input / DMA): row r
    # (batch row r // L) may only attend to keys of the same batch row (c // S).
    # floor((i + 0.5) / L) replaces vector integer division with cheap f32 VPU ops.
    ri = jax.lax.broadcasted_iota(jnp.int32, (Mt, Ms), 0).astype(jnp.float32)
    ci = jax.lax.broadcasted_iota(jnp.int32, (Mt, Ms), 1).astype(jnp.float32)
    rb = jnp.floor((ri + 0.5) * (1.0 / L))
    cb = jnp.floor((ci + 0.5) * (1.0 / S))
    bias = jnp.where(rb == cb, 0.0, -1e30).astype(jnp.float32)   # (Mt, Ms)

    # Attention: one batched score / PV einsum over all heads.
    s = jnp.einsum("hmd,hnd->hmn", q_h, k_h,
                   preferred_element_type=jnp.float32) + bias[None]   # (H, Mt, Ms)
    s = s - jnp.max(s, axis=-1, keepdims=True)
    p = jnp.exp(s)
    p = p * pl.reciprocal(jnp.sum(p, axis=-1, keepdims=True), approx=True)
    o = jnp.einsum("hmn,hnd->hmd", p.astype(jnp.bfloat16), v_h,
                   preferred_element_type=jnp.float32)                # (H, Mt, D)

    # Merge heads and apply the output projection (full-K (Mt, C) @ (C, C)).
    attn = jnp.concatenate([o[h] for h in range(H)], axis=-1)         # (Mt, C)
    attn = jnp.dot(attn.astype(jnp.bfloat16), wo_ref[...],
                   preferred_element_type=jnp.float32) + bo_ref[...]

    # residual + LayerNorm 1 (f32 stats)
    x = _layer_norm(attn + xt, ln1g_ref[...], ln1b_ref[...])

    # feed-forward (Linear -> ReLU -> Linear) + residual + LayerNorm 2
    h1 = jnp.dot(x.astype(jnp.bfloat16), w1_ref[...],
                 preferred_element_type=jnp.float32) + b1_ref[...]
    h1 = jnp.maximum(h1, 0.0)
    ff = jnp.dot(h1.astype(jnp.bfloat16), w2_ref[...],
                 preferred_element_type=jnp.float32) + b2_ref[...]
    out_ref[...] = _layer_norm(x + ff, ln2g_ref[...], ln2b_ref[...])


def _pick_block_rows(Bt, L, S, C, target_rows, prefer_multicore):
    """Batch rows folded into one grid step."""
    divs = [c for c in range(1, Bt + 1) if Bt % c == 0]
    # (8,128) rule: the flattened (c*L, C)/(c*S, C) blocks need sublane-aligned
    # row counts unless they span the full array.
    valid = [c for c in divs
             if c == Bt or (c * L % 8 == 0 and c * S % 8 == 0)]
    # Generation-aware MXU M target (128 on <=v5, 256 on v6e/v7x).
    fit = [c for c in valid if c * max(L, S) <= target_rows] or [min(valid)]
    # Bound the block-diagonal-mask waste: keep masked attention FLOPs
    # (~4*c^2*L*S*C) at or below projection+FFN FLOPs (~24*c*L*C^2) -> c*S <= 6C.
    fit = [c for c in fit if c * S <= 6 * C] or [min(fit)]
    best = max(fit)
    if prefer_multicore:
        multi = [c for c in fit if Bt // c >= 2]
        if multi:
            best = max(multi)
    return best


def stt_block(tgt, src, p, num_heads):
    """tgt: (Bt, L, C), src: (Bt, S, C) -> (Bt, L, C)."""
    Bt, L, C = tgt.shape
    S = src.shape[1]
    D = C // num_heads
    scale = float(D) ** -0.5

    # ---- trace-time weight prep (cheap XLA ops outside the kernel) ----
    wq = (p["wq"] * scale).astype(jnp.bfloat16)          # scale folded into Q proj
    bq = p["bq"] * scale
    wkv = jnp.concatenate([p["wk"], p["wv"]], axis=1).astype(jnp.bfloat16)
    bkv = jnp.concatenate([p["bk"], p["bv"]], axis=1)
    wo = p["wo"].astype(jnp.bfloat16)
    w1 = p["w1"].astype(jnp.bfloat16)
    w2 = p["w2"].astype(jnp.bfloat16)
    # TODO(synk): for C >= ~2048 tile w1/w2 over an inner K/N grid axis and
    # consider fp8 FFN weights on v7x (64 MiB VMEM).

    kind = _chip_kind()
    Bb = _pick_block_rows(Bt, L, S, C, _target_rows(kind), _prefer_multicore(kind))
    Mt, Ms = Bb * L, Bb * S

    tgt2 = tgt.reshape(Bt * L, C)
    src2 = src.reshape(Bt * S, C)

    kernel = functools.partial(
        _stt_block_kernel, num_heads=num_heads, head_dim=D, tgt_len=L, src_len=S)

    def wspec(r, c):
        # Constant-index (revisited) operand: single buffer -> half the weight VMEM.
        return pl.BlockSpec((r, c), lambda b: (0, 0), pipeline_mode=pl.Buffered(1))

    in_specs = [
        pl.BlockSpec((Mt, C), lambda b: (b, 0)),
        pl.BlockSpec((Ms, C), lambda b: (b, 0)),
        wspec(C, C), wspec(1, C),              # wq, bq (pre-scaled)
        wspec(C, 2 * C), wspec(1, 2 * C),      # wkv, bkv (fused K|V)
        wspec(C, C), wspec(1, C),              # wo, bo
        wspec(1, C), wspec(1, C),              # ln1 g, b
        wspec(C, 4 * C), wspec(1, 4 * C),      # w1, b1
        wspec(4 * C, C), wspec(1, C),          # w2, b2
        wspec(1, C), wspec(1, C),              # ln2 g, b
    ]

    out2 = pl.pallas_call(
        kernel,
        out_shape=jax.ShapeDtypeStruct((Bt * L, C), jnp.float32),
        grid=(Bt // Bb,),
        in_specs=in_specs,
        out_specs=pl.BlockSpec((Mt, C), lambda b: (b, 0)),
        compiler_params=pltpu.CompilerParams(
            dimension_semantics=("parallel",),
            vmem_limit_bytes=64 * 1024 * 1024),
    )(
        tgt2, src2,
        wq, bq, wkv, bkv, wo, p["bo"],
        p["ln1g"], p["ln1b"],
        w1, p["b1"], w2, p["b2"],
        p["ln2g"], p["ln2b"],
    )
    return out2.reshape(Bt, L, C)


# ----------------------------------------------------------------------------
# Model glue (reshapes / permutes mirror the PyTorch STT_Layer / STT exactly)
# ----------------------------------------------------------------------------

def stt_layer(x, lp, num_heads):
    """x: (B, N, T, C) -> (B, N, T, C)."""
    B, N, T, C = x.shape
    # x_temp  (seq-first (T, B*N, C))  ->  batch-first (B*N, T, C)
    xt = x.reshape(B * N, T, C)
    # x_spatio (seq-first (N, B*T, C)) ->  batch-first (B*T, N, C)
    xs = jnp.transpose(x, (0, 2, 1, 3)).reshape(B * T, N, C)

    xt = stt_block(xt, xt, lp["spatio_attention"], num_heads)
    xs = stt_block(xs, xs, lp["temporal_attention"], num_heads)

    # x_spatio_feat: re-layout spatial result into temporal batching
    xsf = jnp.transpose(xs.reshape(B, T, N, C), (0, 2, 1, 3)).reshape(B * N, T, C)
    xto = stt_block(xt, xsf, lp["temporal_cross_attention"], num_heads)

    # x_temp_feat: re-layout temporal result into spatial batching
    xtf = jnp.transpose(xt.reshape(B, N, T, C), (0, 2, 1, 3)).reshape(B * T, N, C)
    xso = stt_block(xs, xtf, lp["spatio_cross_attention"], num_heads)

    xso_out = jnp.transpose(xso.reshape(B, T, N, C), (0, 2, 1, 3))  # (B, N, T, C)
    xto_out = xto.reshape(B, N, T, C)                               # (B, N, T, C)
    return xto_out + xso_out


def stt_forward(x, params, num_heads):
    """x: (B, N, T, input_dim) -> (B, num_classes). multi_layer_sup=False path."""
    B, N, T, Din = x.shape
    C = params["input_projection"]["w"].shape[1]
    h = linear(x.reshape(-1, Din),
               params["input_projection"]["w"],
               params["input_projection"]["b"]).reshape(B, N, T, C)
    for lp in params["layers"]:
        h = stt_layer(h, lp, num_heads)
    pooled = jnp.mean(h, axis=(1, 2))  # (B, C): tiny, plain JAX
    # classifier: a (B, C) @ (C, num_classes) matmul is too small to justify a
    # Pallas launch; let XLA fuse it with the pooling.
    return pooled @ params["classifier"]["w"] + params["classifier"]["b"]


# ----------------------------------------------------------------------------
# Deterministic parameter init (same shapes as the PyTorch module; stored as
# (in, out) so the model computes x @ W — transpose when importing PyTorch weights)
# ----------------------------------------------------------------------------

def init_block_params(key, C):
    ks = jax.random.split(key, 6)
    s = 0.05
    return dict(
        wq=jax.random.normal(ks[0], (C, C), jnp.float32) * s,
        wk=jax.random.normal(ks[1], (C, C), jnp.float32) * s,
        wv=jax.random.normal(ks[2], (C, C), jnp.float32) * s,
        bq=jnp.zeros((1, C), jnp.float32),
        bk=jnp.zeros((1, C), jnp.float32),
        bv=jnp.zeros((1, C), jnp.float32),
        wo=jax.random.normal(ks[3], (C, C), jnp.float32) * s,
        bo=jnp.zeros((1, C), jnp.float32),
        ln1g=jnp.ones((1, C), jnp.float32),
        ln1b=jnp.zeros((1, C), jnp.float32),
        w1=jax.random.normal(ks[4], (C, 4 * C), jnp.float32) * s,
        b1=jnp.zeros((1, 4 * C), jnp.float32),
        w2=jax.random.normal(ks[5], (4 * C, C), jnp.float32) * s,
        b2=jnp.zeros((1, C), jnp.float32),
        ln2g=jnp.ones((1, C), jnp.float32),
        ln2b=jnp.zeros((1, C), jnp.float32),
    )


def init_params(key, input_dim, embed_dim, num_layers, num_classes):
    keys = jax.random.split(key, 2 + num_layers)
    layers = []
    for li in range(num_layers):
        bkeys = jax.random.split(keys[2 + li], 4)
        layers.append(dict(
            spatio_attention=init_block_params(bkeys[0], embed_dim),
            temporal_attention=init_block_params(bkeys[1], embed_dim),
            spatio_cross_attention=init_block_params(bkeys[2], embed_dim),
            temporal_cross_attention=init_block_params(bkeys[3], embed_dim),
        ))
    return dict(
        input_projection=dict(
            w=jax.random.normal(keys[0], (input_dim, embed_dim), jnp.float32) * 0.05,
            b=jnp.zeros((1, embed_dim), jnp.float32),
        ),
        classifier=dict(
            w=jax.random.normal(keys[1], (embed_dim, num_classes), jnp.float32) * 0.05,
            b=jnp.zeros((1, num_classes), jnp.float32),
        ),
        layers=layers,
    )


# ----------------------------------------------------------------------------

if __name__ == "__main__":
    # embed_dim picked lane-dense (multiple of 128) per the perf review.
    B, N, T = 2, 4, 8
    input_dim, embed_dim, num_heads, num_layers, num_classes = 16, 128, 4, 2, 5

    key = jax.random.PRNGKey(0)
    kx, kp = jax.random.split(key)
    x = jax.random.normal(kx, (B, N, T, input_dim), jnp.float32)
    params = init_params(kp, input_dim, embed_dim, num_layers, num_classes)

    fwd = jax.jit(functools.partial(stt_forward, num_heads=num_heads))
    out = jax.block_until_ready(fwd(x, params))
    assert out.shape == (B, num_classes), out.shape
    assert bool(jnp.all(jnp.isfinite(out)))
    print("KERNEL_OK")
</pallas_src>

<mosaic_0001>
module attributes {stable_mosaic.version = 11 : i64} {
  func.func @_linear_kernel(%arg0: i32, %arg1: memref<64x16xf32, #tpu.memory_space<vmem>>, %arg2: memref<16x128xbf16, #tpu.memory_space<vmem>>, %arg3: memref<1x128xf32, #tpu.memory_space<vmem>>, %arg4: memref<64x128xf32, #tpu.memory_space<vmem>>) attributes {dimension_semantics = [#tpu.dimension_semantics<parallel>], iteration_bounds = array<i64: 1>, scalar_prefetch = 0 : i64, scratch_operands = 0 : i64, tpu.core_type = #tpu.core_type<tc>, window_params = [{transform_indices = @transform_0, window_bounds = array<i64: 64, 16>}, {pipeline_mode = #tpu.pipeline_mode<synchronous>, transform_indices = @transform_1, window_bounds = array<i64: 16, 128>}, {pipeline_mode = #tpu.pipeline_mode<synchronous>, transform_indices = @transform_2, window_bounds = array<i64: 1, 128>}, {transform_indices = @transform_3, window_bounds = array<i64: 64, 128>}]} {
    %c0 = arith.constant 0 : index
    %c0_0 = arith.constant 0 : index
    %0 = vector.load %arg1[%c0, %c0_0] : memref<64x16xf32, #tpu.memory_space<vmem>>, vector<64x16xf32>
    %1 = arith.truncf %0 : vector<64x16xf32> to vector<64x16xbf16>
    %c0_1 = arith.constant 0 : index
    %c0_2 = arith.constant 0 : index
    %2 = vector.load %arg2[%c0_1, %c0_2] : memref<16x128xbf16, #tpu.memory_space<vmem>>, vector<16x128xbf16>
    %cst = arith.constant dense<0.000000e+00> : vector<64x128xf32>
    %3 = tpu.matmul %1, %2, %cst {dimension_numbers = #tpu.dot_dimension_numbers<[1], [0], [0], [1], [0, 0, 1, 1], [], []>} : vector<64x16xbf16>, vector<16x128xbf16>, vector<64x128xf32> -> vector<64x128xf32>
    %c0_3 = arith.constant 0 : index
    %c0_4 = arith.constant 0 : index
    %4 = vector.load %arg3[%c0_3, %c0_4] : memref<1x128xf32, #tpu.memory_space<vmem>>, vector<1x128xf32>
    %5 = vector.broadcast %4 : vector<1x128xf32> to vector<64x128xf32>
    %6 = arith.addf %3, %5 : vector<64x128xf32>
    %c0_5 = arith.constant 0 : index
    %c0_6 = arith.constant 0 : index
    %7 = vector.load %arg4[%c0_5, %c0_6] : memref<64x128xf32, #tpu.memory_space<vmem>>, vector<64x128xf32>
    tpu.vector_store %arg4[%c0_5, %c0_6], %6 {strides = array<i32>} : memref<64x128xf32, #tpu.memory_space<vmem>>, vector<64x128xf32>,
    return
  }
  func.func @transform_0(%arg0: i32) -> (i32, i32) {
    %c0_i32 = arith.constant 0 : i32
    %c0_i32_0 = arith.constant 0 : i32
    return %arg0, %c0_i32 : i32, i32
  }
  func.func @transform_1(%arg0: i32) -> (i32, i32) {
    %c0_i32 = arith.constant 0 : i32
    %c0_i32_0 = arith.constant 0 : i32
    %c0_i32_1 = arith.constant 0 : i32
    return %c0_i32, %c0_i32_0 : i32, i32
  }
  func.func @transform_2(%arg0: i32) -> (i32, i32) {
    %c0_i32 = arith.constant 0 : i32
    %c0_i32_0 = arith.constant 0 : i32
    %c0_i32_1 = arith.constant 0 : i32
    return %c0_i32, %c0_i32_0 : i32, i32
  }
  func.func @transform_3(%arg0: i32) -> (i32, i32) {
    %c0_i32 = arith.constant 0 : i32
    %c0_i32_0 = arith.constant 0 : i32
    return %arg0, %c0_i32 : i32, i32
  }
}

module attributes {stable_mosaic.version = 11 : i64} {
  func.func @_stt_block_kernel(%arg0: i32, %arg1: memref<64x128xf32, #tpu.memory_space<vmem>>, %arg2: memref<64x128xf32, #tpu.memory_space<vmem>>, %arg3: memref<128x128xbf16, #tpu.memory_space<vmem>>, %arg4: memref<1x128xf32, #tpu.memory_space<vmem>>, %arg5: memref<128x256xbf16, #tpu.memory_space<vmem>>, %arg6: memref<1x256xf32, #tpu.memory_space<vmem>>, %arg7: memref<128x128xbf16, #tpu.memory_space<vmem>>, %arg8: memref<1x128xf32, #tpu.memory_space<vmem>>, %arg9: memref<1x128xf32, #tpu.memory_space<vmem>>, %arg10: memref<1x128xf32, #tpu.memory_space<vmem>>, %arg11: memref<128x512xbf16, #tpu.memory_space<vmem>>, %arg12: memref<1x512xf32, #tpu.memory_space<vmem>>, %arg13: memref<512x128xbf16, #tpu.memory_space<vmem>>, %arg14: memref<1x128xf32, #tpu.memory_space<vmem>>, %arg15: memref<1x128xf32, #tpu.memory_space<vmem>>, %arg16: memref<1x128xf32, #tpu.memory_space<vmem>>, %arg17: memref<64x128xf32, #tpu.memory_space<vmem>>) attributes {dimension_semantics = [#tpu.dimension_semantics<parallel>], iteration_bounds = array<i64: 1>, scalar_prefetch = 0 : i64, scratch_operands = 0 : i64, tpu.core_type = #tpu.core_type<tc>, window_params = [{transform_indices = @transform_0, window_bounds = array<i64: 64, 128>}, {transform_indices = @transform_1, window_bounds = array<i64: 64, 128>}, {pipeline_mode = #tpu.pipeline_mode<synchronous>, transform_indices = @transform_2, window_bounds = array<i64: 128, 128>}, {pipeline_mode = #tpu.pipeline_mode<synchronous>, transform_indices = @transform_3, window_bounds = array<i64: 1, 128>}, {pipeline_mode = #tpu.pipeline_mode<synchronous>, transform_indices = @transform_4, window_bounds = array<i64: 128, 256>}, {pipeline_mode = #tpu.pipeline_mode<synchronous>, transform_indices = @transform_5, window_bounds = array<i64: 1, 256>}, {pipeline_mode = #tpu.pipeline_mode<synchronous>, transform_indices = @transform_6, window_bounds = array<i64: 128, 128>}, {pipeline_mode = #tpu.pipeline_mode<synchronous>, transform_indices = @transform_7, window_bounds = array<i64: 1, 128>}, {pipeline_mode = #tpu.pipeline_mode<synchronous>, transform_indices = @transform_8, window_bounds = array<i64: 1, 128>}, {pipeline_mode = #tpu.pipeline_mode<synchronous>, transform_indices = @transform_9, window_bounds = array<i64: 1, 128>}, {pipeline_mode = #tpu.pipeline_mode<synchronous>, transform_indices = @transform_10, window_bounds = array<i64: 128, 512>}, {pipeline_mode = #tpu.pipeline_mode<synchronous>, transform_indices = @transform_11, window_bounds = array<i64: 1, 512>}, {pipeline_mode = #tpu.pipeline_mode<synchronous>, transform_indices = @transform_12, window_bounds = array<i64: 512, 128>}, {pipeline_mode = #tpu.pipeline_mode<synchronous>, transform_indices = @transform_13, window_bounds = array<i64: 1, 128>}, {pipeline_mode = #tpu.pipeline_mode<synchronous>, transform_indices = @transform_14, window_bounds = array<i64: 1, 128>}, {pipeline_mode = #tpu.pipeline_mode<synchronous>, transform_indices = @transform_15, window_bounds = array<i64: 1, 128>}, {transform_indices = @transform_16, window_bounds = array<i64: 64, 128>}]} {
    %c0 = arith.constant 0 : index
    %c0_0 = arith.constant 0 : index
    %0 = vector.load %arg1[%c0, %c0_0] : memref<64x128xf32, #tpu.memory_space<vmem>>, vector<64x128xf32>
    %c0_1 = arith.constant 0 : index
    %c0_2 = arith.constant 0 : index
    %1 = vector.load %arg2[%c0_1, %c0_2] : memref<64x128xf32, #tpu.memory_space<vmem>>, vector<64x128xf32>
    %2 = arith.truncf %0 : vector<64x128xf32> to vector<64x128xbf16>
    %c0_3 = arith.constant 0 : index
    %c0_4 = arith.constant 0 : index
    %3 = vector.load %arg3[%c0_3, %c0_4] : memref<128x128xbf16, #tpu.memory_space<vmem>>, vector<128x128xbf16>
    %cst = arith.constant dense<0.000000e+00> : vector<64x128xf32>
    %4 = tpu.matmul %2, %3, %cst {dimension_numbers = #tpu.dot_dimension_numbers<[1], [0], [0], [1], [0, 0, 1, 1], [], []>} : vector<64x128xbf16>, vector<128x128xbf16>, vector<64x128xf32> -> vector<64x128xf32>
    %c0_5 = arith.constant 0 : index
    %c0_6 = arith.constant 0 : index
    %5 = vector.load %arg4[%c0_5, %c0_6] : memref<1x128xf32, #tpu.memory_space<vmem>>, vector<1x128xf32>
    %6 = vector.broadcast %5 : vector<1x128xf32> to vector<64x128xf32>
    %7 = arith.addf %4, %6 : vector<64x128xf32>
    %8 = arith.truncf %1 : vector<64x128xf32> to vector<64x128xbf16>
    %c0_7 = arith.constant 0 : index
    %c0_8 = arith.constant 0 : index
    %9 = vector.load %arg5[%c0_7, %c0_8] : memref<128x256xbf16, #tpu.memory_space<vmem>>, vector<128x256xbf16>
    %cst_9 = arith.constant dense<0.000000e+00> : vector<64x256xf32>
    %10 = tpu.matmul %8, %9, %cst_9 {dimension_numbers = #tpu.dot_dimension_numbers<[1], [0], [0], [1], [0, 0, 1, 1], [], []>} : vector<64x128xbf16>, vector<128x256xbf16>, vector<64x256xf32> -> vector<64x256xf32>
    %c0_10 = arith.constant 0 : index
    %c0_11 = arith.constant 0 : index
    %11 = vector.load %arg6[%c0_10, %c0_11] : memref<1x256xf32, #tpu.memory_space<vmem>>, vector<1x256xf32>
    %12 = vector.broadcast %11 : vector<1x256xf32> to vector<64x256xf32>
    %13 = arith.addf %10, %12 : vector<64x256xf32>
    %14 = arith.truncf %7 : vector<64x128xf32> to vector<64x128xbf16>
    %15 = arith.truncf %13 : vector<64x256xf32> to vector<64x256xbf16>
    %16 = vector.extract_strided_slice %14 {offsets = [0, 0], sizes = [64, 32], strides = [1, 1]} : vector<64x128xbf16> to vector<64x32xbf16>
    %17 = vector.extract_strided_slice %14 {offsets = [0, 32], sizes = [64, 32], strides = [1, 1]} : vector<64x128xbf16> to vector<64x32xbf16>
    %18 = vector.extract_strided_slice %14 {offsets = [0, 64], sizes = [64, 32], strides = [1, 1]} : vector<64x128xbf16> to vector<64x32xbf16>
    %19 = vector.extract_strided_slice %14 {offsets = [0, 96], sizes = [64, 32], strides = [1, 1]} : vector<64x128xbf16> to vector<64x32xbf16>
    %20 = vector.shape_cast %16 : vector<64x32xbf16> to vector<1x64x32xbf16>
    %21 = vector.shape_cast %17 : vector<64x32xbf16> to vector<1x64x32xbf16>
    %22 = vector.shape_cast %18 : vector<64x32xbf16> to vector<1x64x32xbf16>
    %23 = vector.shape_cast %19 : vector<64x32xbf16> to vector<1x64x32xbf16>
    %24 = tpu.concatenate %20, %21, %22, %23 in 0 : vector<1x64x32xbf16>, vector<1x64x32xbf16>, vector<1x64x32xbf16>, vector<1x64x32xbf16> -> vector<4x64x32xbf16>
    %25 = vector.extract_strided_slice %15 {offsets = [0, 0], sizes = [64, 32], strides = [1, 1]} : vector<64x256xbf16> to vector<64x32xbf16>
    %26 = vector.extract_strided_slice %15 {offsets = [0, 32], sizes = [64, 32], strides = [1, 1]} : vector<64x256xbf16> to vector<64x32xbf16>
    %27 = vector.extract_strided_slice %15 {offsets = [0, 64], sizes = [64, 32], strides = [1, 1]} : vector<64x256xbf16> to vector<64x32xbf16>
    %28 = vector.extract_strided_slice %15 {offsets = [0, 96], sizes = [64, 32], strides = [1, 1]} : vector<64x256xbf16> to vector<64x32xbf16>
    %29 = vector.shape_cast %25 : vector<64x32xbf16> to vector<1x64x32xbf16>
    %30 = vector.shape_cast %26 : vector<64x32xbf16> to vector<1x64x32xbf16>
    %31 = vector.shape_cast %27 : vector<64x32xbf16> to vector<1x64x32xbf16>
    %32 = vector.shape_cast %28 : vector<64x32xbf16> to vector<1x64x32xbf16>
    %33 = tpu.concatenate %29, %30, %31, %32 in 0 : vector<1x64x32xbf16>, vector<1x64x32xbf16>, vector<1x64x32xbf16>, vector<1x64x32xbf16> -> vector<4x64x32xbf16>
    %34 = vector.extract_strided_slice %15 {offsets = [0, 128], sizes = [64, 32], strides = [1, 1]} : vector<64x256xbf16> to vector<64x32xbf16>
    %35 = vector.extract_strided_slice %15 {offsets = [0, 160], sizes = [64, 32], strides = [1, 1]} : vector<64x256xbf16> to vector<64x32xbf16>
    %36 = vector.extract_strided_slice %15 {offsets = [0, 192], sizes = [64, 32], strides = [1, 1]} : vector<64x256xbf16> to vector<64x32xbf16>
    %37 = vector.extract_strided_slice %15 {offsets = [0, 224], sizes = [64, 32], strides = [1, 1]} : vector<64x256xbf16> to vector<64x32xbf16>
    %38 = vector.shape_cast %34 : vector<64x32xbf16> to vector<1x64x32xbf16>
    %39 = vector.shape_cast %35 : vector<64x32xbf16> to vector<1x64x32xbf16>
    %40 = vector.shape_cast %36 : vector<64x32xbf16> to vector<1x64x32xbf16>
    %41 = vector.shape_cast %37 : vector<64x32xbf16> to vector<1x64x32xbf16>
    %42 = tpu.concatenate %38, %39, %40, %41 in 0 : vector<1x64x32xbf16>, vector<1x64x32xbf16>, vector<1x64x32xbf16>, vector<1x64x32xbf16> -> vector<4x64x32xbf16>
    %43 = tpu.iota {dimensions = array<i32: 0>} : vector<64x64xi32>
    %44 = arith.sitofp %43 : vector<64x64xi32> to vector<64x64xf32>
    %45 = tpu.iota {dimensions = array<i32: 1>} : vector<64x64xi32>
    %46 = arith.sitofp %45 : vector<64x64xi32> to vector<64x64xf32>
    %cst_12 = arith.constant 5.000000e-01 : f32
    %47 = vector.broadcast %cst_12 : f32 to vector<64x64xf32>
    %48 = arith.addf %44, %47 : vector<64x64xf32>
    %cst_13 = arith.constant 1.250000e-01 : f32
    %49 = vector.broadcast %cst_13 : f32 to vector<64x64xf32>
    %50 = arith.mulf %48, %49 : vector<64x64xf32>
    %51 = math.floor %50 : vector<64x64xf32>
    %cst_14 = arith.constant 5.000000e-01 : f32
    %52 = vector.broadcast %cst_14 : f32 to vector<64x64xf32>
    %53 = arith.addf %46, %52 : vector<64x64xf32>
    %cst_15 = arith.constant 1.250000e-01 : f32
    %54 = vector.broadcast %cst_15 : f32 to vector<64x64xf32>
    %55 = arith.mulf %53, %54 : vector<64x64xf32>
    %56 = math.floor %55 : vector<64x64xf32>
    %57 = arith.cmpf oeq, %51, %56 : vector<64x64xf32>
    %cst_16 = arith.constant 0.000000e+00 : f32
    %cst_17 = arith.constant -1.000000e+30 : f32
    %58 = vector.broadcast %cst_16 : f32 to vector<64x64xf32>
    %59 = vector.broadcast %cst_17 : f32 to vector<64x64xf32>
    %60 = arith.select %57, %58, %59 : vector<64x64xi1>, vector<64x64xf32>
    "tpu.trace_start"() <{level = 10 : i32, message = "hmd,hnd->hmn"}> : () -> ()
    %cst_18 = arith.constant dense<0.000000e+00> : vector<4x64x64xf32>
    %61 = tpu.matmul %24, %33, %cst_18 {dimension_numbers = #tpu.dot_dimension_numbers<[2], [2], [1], [1], [0, 0, 0, 1, 1, 1], [0], [0]>} : vector<4x64x32xbf16>, vector<4x64x32xbf16>, vector<4x64x64xf32> -> vector<4x64x64xf32>
    "tpu.trace_stop"() : () -> ()
    %62 = vector.shape_cast %60 : vector<64x64xf32> to vector<1x64x64xf32>
    %63 = vector.broadcast %62 : vector<1x64x64xf32> to vector<4x64x64xf32>
    %64 = arith.addf %61, %63 : vector<4x64x64xf32>
    %cst_19 = arith.constant dense<0xFF800000> : vector<4x64xf32>
    %65 = vector.multi_reduction <maximumf>, %64, %cst_19 [2] : vector<4x64x64xf32> to vector<4x64xf32>
    %66 = vector.shape_cast %65 : vector<4x64xf32> to vector<4x64x1xf32>
    %67 = vector.broadcast %66 : vector<4x64x1xf32> to vector<4x64x64xf32>
    %68 = arith.subf %64, %67 : vector<4x64x64xf32>
    %69 = math.exp %68 : vector<4x64x64xf32>
    %cst_20 = arith.constant dense<0.000000e+00> : vector<4x64xf32>
    %70 = vector.multi_reduction <add>, %69, %cst_20 [2] : vector<4x64x64xf32> to vector<4x64xf32>
    %71 = vector.shape_cast %70 : vector<4x64xf32> to vector<4x64x1xf32>
    %72 = tpu.reciprocal %71 {approx = true} : vector<4x64x1xf32> -> vector<4x64x1xf32>
    %73 = vector.broadcast %72 : vector<4x64x1xf32> to vector<4x64x64xf32>
    %74 = arith.mulf %69, %73 : vector<4x64x64xf32>
    %75 = arith.truncf %74 : vector<4x64x64xf32> to vector<4x64x64xbf16>
    "tpu.trace_start"() <{level = 10 : i32, message = "hmn,hnd->hmd"}> : () -> ()
    %cst_21 = arith.constant dense<0.000000e+00> : vector<4x64x32xf32>
    %76 = tpu.matmul %75, %42, %cst_21 {dimension_numbers = #tpu.dot_dimension_numbers<[2], [1], [1], [2], [0, 0, 0, 1, 1, 2], [0], [0]>} : vector<4x64x64xbf16>, vector<4x64x32xbf16>, vector<4x64x32xf32> -> vector<4x64x32xf32>
    "tpu.trace_stop"() : () -> ()
    %77 = vector.extract_strided_slice %76 {offsets = [0, 0, 0], sizes = [1, 64, 32], strides = [1, 1, 1]} : vector<4x64x32xf32> to vector<1x64x32xf32>
    %78 = vector.shape_cast %77 : vector<1x64x32xf32> to vector<64x32xf32>
    %79 = vector.extract_strided_slice %76 {offsets = [1, 0, 0], sizes = [1, 64, 32], strides = [1, 1, 1]} : vector<4x64x32xf32> to vector<1x64x32xf32>
    %80 = vector.shape_cast %79 : vector<1x64x32xf32> to vector<64x32xf32>
    %81 = vector.extract_strided_slice %76 {offsets = [2, 0, 0], sizes = [1, 64, 32], strides = [1, 1, 1]} : vector<4x64x32xf32> to vector<1x64x32xf32>
    %82 = vector.shape_cast %81 : vector<1x64x32xf32> to vector<64x32xf32>
    %83 = vector.extract_strided_slice %76 {offsets = [3, 0, 0], sizes = [1, 64, 32], strides = [1, 1, 1]} : vector<4x64x32xf32> to vector<1x64x32xf32>
    %84 = vector.shape_cast %83 : vector<1x64x32xf32> to vector<64x32xf32>
    %85 = tpu.concatenate %78, %80, %82, %84 in 1 : vector<64x32xf32>, vector<64x32xf32>, vector<64x32xf32>, vector<64x32xf32> -> vector<64x128xf32>
    %86 = arith.truncf %85 : vector<64x128xf32> to vector<64x128xbf16>
    %c0_22 = arith.constant 0 : index
    %c0_23 = arith.constant 0 : index
    %87 = vector.load %arg7[%c0_22, %c0_23] : memref<128x128xbf16, #tpu.memory_space<vmem>>, vector<128x128xbf16>
    %cst_24 = arith.constant dense<0.000000e+00> : vector<64x128xf32>
    %88 = tpu.matmul %86, %87, %cst_24 {dimension_numbers = #tpu.dot_dimension_numbers<[1], [0], [0], [1], [0, 0, 1, 1], [], []>} : vector<64x128xbf16>, vector<128x128xbf16>, vector<64x128xf32> -> vector<64x128xf32>
    %c0_25 = arith.constant 0 : index
    %c0_26 = arith.constant 0 : index
    %89 = vector.load %arg8[%c0_25, %c0_26] : memref<1x128xf32, #tpu.memory_space<vmem>>, vector<1x128xf32>
    %90 = vector.broadcast %89 : vector<1x128xf32> to vector<64x128xf32>
    %91 = arith.addf %88, %90 : vector<64x128xf32>
    %92 = arith.addf %91, %0 : vector<64x128xf32>
    %c0_27 = arith.constant 0 : index
    %c0_28 = arith.constant 0 : index
    %93 = vector.load %arg9[%c0_27, %c0_28] : memref<1x128xf32, #tpu.memory_space<vmem>>, vector<1x128xf32>
    %c0_29 = arith.constant 0 : index
    %c0_30 = arith.constant 0 : index
    %94 = vector.load %arg10[%c0_29, %c0_30] : memref<1x128xf32, #tpu.memory_space<vmem>>, vector<1x128xf32>
    %cst_31 = arith.constant dense<0.000000e+00> : vector<64xf32>
    %95 = vector.multi_reduction <add>, %92, %cst_31 [1] : vector<64x128xf32> to vector<64xf32>
    %96 = vector.shape_cast %95 : vector<64xf32> to vector<64x1xf32>
    %cst_32 = arith.constant 1.280000e+02 : f32
    %97 = vector.broadcast %cst_32 : f32 to vector<64x1xf32>
    %98 = arith.divf %96, %97 : vector<64x1xf32>
    %99 = vector.broadcast %98 : vector<64x1xf32> to vector<64x128xf32>
    %100 = arith.subf %92, %99 : vector<64x128xf32>
    %101 = arith.mulf %100, %100 : vector<64x128xf32>
    %cst_33 = arith.constant dense<0.000000e+00> : vector<64xf32>
    %102 = vector.multi_reduction <add>, %101, %cst_33 [1] : vector<64x128xf32> to vector<64xf32>
    %103 = vector.shape_cast %102 : vector<64xf32> to vector<64x1xf32>
    %cst_34 = arith.constant 1.280000e+02 : f32
    %104 = vector.broadcast %cst_34 : f32 to vector<64x1xf32>
    %105 = arith.divf %103, %104 : vector<64x1xf32>
    %106 = vector.broadcast %98 : vector<64x1xf32> to vector<64x128xf32>
    %107 = arith.subf %92, %106 : vector<64x128xf32>
    %cst_35 = arith.constant 9.99999974E-6 : f32
    %108 = vector.broadcast %cst_35 : f32 to vector<64x1xf32>
    %109 = arith.addf %105, %108 : vector<64x1xf32>
    %110 = math.rsqrt %109 : vector<64x1xf32>
    %111 = vector.broadcast %110 : vector<64x1xf32> to vector<64x128xf32>
    %112 = arith.mulf %107, %111 : vector<64x128xf32>
    %113 = vector.broadcast %93 : vector<1x128xf32> to vector<64x128xf32>
    %114 = arith.mulf %112, %113 : vector<64x128xf32>
    %115 = vector.broadcast %94 : vector<1x128xf32> to vector<64x128xf32>
    %116 = arith.addf %114, %115 : vector<64x128xf32>
    %117 = arith.truncf %116 : vector<64x128xf32> to vector<64x128xbf16>
    %c0_36 = arith.constant 0 : index
    %c0_37 = arith.constant 0 : index
    %118 = vector.load %arg11[%c0_36, %c0_37] : memref<128x512xbf16, #tpu.memory_space<vmem>>, vector<128x512xbf16>
    %cst_38 = arith.constant dense<0.000000e+00> : vector<64x512xf32>
    %119 = tpu.matmul %117, %118, %cst_38 {dimension_numbers = #tpu.dot_dimension_numbers<[1], [0], [0], [1], [0, 0, 1, 1], [], []>} : vector<64x128xbf16>, vector<128x512xbf16>, vector<64x512xf32> -> vector<64x512xf32>
    %c0_39 = arith.constant 0 : index
    %c0_40 = arith.constant 0 : index
    %120 = vector.load %arg12[%c0_39, %c0_40] : memref<1x512xf32, #tpu.memory_space<vmem>>, vector<1x512xf32>
    %121 = vector.broadcast %120 : vector<1x512xf32> to vector<64x512xf32>
    %122 = arith.addf %119, %121 : vector<64x512xf32>
    %cst_41 = arith.constant 0.000000e+00 : f32
    %123 = vector.broadcast %cst_41 : f32 to vector<64x512xf32>
    %124 = arith.maximumf %122, %123 : vector<64x512xf32>
    %125 = arith.truncf %124 : vector<64x512xf32> to vector<64x512xbf16>
    %c0_42 = arith.constant 0 : index
    %c0_43 = arith.constant 0 : index
    %126 = vector.load %arg13[%c0_42, %c0_43] : memref<512x128xbf16, #tpu.memory_space<vmem>>, vector<512x128xbf16>
    %cst_44 = arith.constant dense<0.000000e+00> : vector<64x128xf32>
    %127 = tpu.matmul %125, %126, %cst_44 {dimension_numbers = #tpu.dot_dimension_numbers<[1], [0], [0], [1], [0, 0, 1, 1], [], []>} : vector<64x512xbf16>, vector<512x128xbf16>, vector<64x128xf32> -> vector<64x128xf32>
    %c0_45 = arith.constant 0 : index
    %c0_46 = arith.constant 0 : index
    %128 = vector.load %arg14[%c0_45, %c0_46] : memref<1x128xf32, #tpu.memory_space<vmem>>, vector<1x128xf32>
    %129 = vector.broadcast %128 : vector<1x128xf32> to vector<64x128xf32>
    %130 = arith.addf %127, %129 : vector<64x128xf32>
    %131 = arith.addf %116, %130 : vector<64x128xf32>
    %c0_47 = arith.constant 0 : index
    %c0_48 = arith.constant 0 : index
    %132 = vector.load %arg15[%c0_47, %c0_48] : memref<1x128xf32, #tpu.memory_space<vmem>>, vector<1x128xf32>
    %c0_49 = arith.constant 0 : index
    %c0_50 = arith.constant 0 : index
    %133 = vector.load %arg16[%c0_49, %c0_50] : memref<1x128xf32, #tpu.memory_space<vmem>>, vector<1x128xf32>
    %cst_51 = arith.constant dense<0.000000e+00> : vector<64xf32>
    %134 = vector.multi_reduction <add>, %131, %cst_51 [1] : vector<64x128xf32> to vector<64xf32>
    %135 = vector.shape_cast %134 : vector<64xf32> to vector<64x1xf32>
    %cst_52 = arith.constant 1.280000e+02 : f32
    %136 = vector.broadcast %cst_52 : f32 to vector<64x1xf32>
    %137 = arith.divf %135, %136 : vector<64x1xf32>
    %138 = vector.broadcast %137 : vector<64x1xf32> to vector<64x128xf32>
    %139 = arith.subf %131, %138 : vector<64x128xf32>
    %140 = arith.mulf %139, %139 : vector<64x128xf32>
    %cst_53 = arith.constant dense<0.000000e+00> : vector<64xf32>
    %141 = vector.multi_reduction <add>, %140, %cst_53 [1] : vector<64x128xf32> to vector<64xf32>
    %142 = vector.shape_cast %141 : vector<64xf32> to vector<64x1xf32>
    %cst_54 = arith.constant 1.280000e+02 : f32
    %143 = vector.broadcast %cst_54 : f32 to vector<64x1xf32>
    %144 = arith.divf %142, %143 : vector<64x1xf32>
    %145 = vector.broadcast %137 : vector<64x1xf32> to vector<64x128xf32>
    %146 = arith.subf %131, %145 : vector<64x128xf32>
    %cst_55 = arith.constant 9.99999974E-6 : f32
    %147 = vector.broadcast %cst_55 : f32 to vector<64x1xf32>
    %148 = arith.addf %144, %147 : vector<64x1xf32>
    %149 = math.rsqrt %148 : vector<64x1xf32>
    %150 = vector.broadcast %149 : vector<64x1xf32> to vector<64x128xf32>
    %151 = arith.mulf %146, %150 : vector<64x128xf32>
    %152 = vector.broadcast %132 : vector<1x128xf32> to vector<64x128xf32>
    %153 = arith.mulf %151, %152 : vector<64x128xf32>
    %154 = vector.broadcast %133 : vector<1x128xf32> to vector<64x128xf32>
    %155 = arith.addf %153, %154 : vector<64x128xf32>
    %c0_56 = arith.constant 0 : index
    %c0_57 = arith.constant 0 : index
    %156 = vector.load %arg17[%c0_56, %c0_57] : memref<64x128xf32, #tpu.memory_space<vmem>>, vector<64x128xf32>
    tpu.vector_store %arg17[%c0_56, %c0_57], %155 {strides = array<i32>} : memref<64x128xf32, #tpu.memory_space<vmem>>, vector<64x128xf32>,
    return
  }
  func.func @transform_0(%arg0: i32) -> (i32, i32) {
    %c0_i32 = arith.constant 0 : i32
    %c0_i32_0 = arith.constant 0 : i32
    return %arg0, %c0_i32 : i32, i32
  }
  func.func @transform_1(%arg0: i32) -> (i32, i32) {
    %c0_i32 = arith.constant 0 : i32
    %c0_i32_0 = arith.constant 0 : i32
    return %arg0, %c0_i32 : i32, i32
  }
  func.func @transform_2(%arg0: i32) -> (i32, i32) {
    %c0_i32 = arith.constant 0 : i32
    %c0_i32_0 = arith.constant 0 : i32
    %c0_i32_1 = arith.constant 0 : i32
    return %c0_i32, %c0_i32_0 : i32, i32
  }
  func.func @transform_3(%arg0: i32) -> (i32, i32) {
    %c0_i32 = arith.constant 0 : i32
    %c0_i32_0 = arith.constant 0 : i32
    %c0_i32_1 = arith.constant 0 : i32
    return %c0_i32, %c0_i32_0 : i32, i32
  }
  func.func @transform_4(%arg0: i32) -> (i32, i32) {
    %c0_i32 = arith.constant 0 : i32
    %c0_i32_0 = arith.constant 0 : i32
    %c0_i32_1 = arith.constant 0 : i32
    return %c0_i32, %c0_i32_0 : i32, i32
  }
  func.func @transform_5(%arg0: i32) -> (i32, i32) {
    %c0_i32 = arith.constant 0 : i32
    %c0_i32_0 = arith.constant 0 : i32
    %c0_i32_1 = arith.constant 0 : i32
    return %c0_i32, %c0_i32_0 : i32, i32
  }
  func.func @transform_6(%arg0: i32) -> (i32, i32) {
    %c0_i32 = arith.constant 0 : i32
    %c0_i32_0 = arith.constant 0 : i32
    %c0_i32_1 = arith.constant 0 : i32
    return %c0_i32, %c0_i32_0 : i32, i32
  }
  func.func @transform_7(%arg0: i32) -> (i32, i32) {
    %c0_i32 = arith.constant 0 : i32
    %c0_i32_0 = arith.constant 0 : i32
    %c0_i32_1 = arith.constant 0 : i32
    return %c0_i32, %c0_i32_0 : i32, i32
  }
  func.func @transform_8(%arg0: i32) -> (i32, i32) {
    %c0_i32 = arith.constant 0 : i32
    %c0_i32_0 = arith.constant 0 : i32
    %c0_i32_1 = arith.constant 0 : i32
    return %c0_i32, %c0_i32_0 : i32, i32
  }
  func.func @transform_9(%arg0: i32) -> (i32, i32) {
    %c0_i32 = arith.constant 0 : i32
    %c0_i32_0 = arith.constant 0 : i32
    %c0_i32_1 = arith.constant 0 : i32
    return %c0_i32, %c0_i32_0 : i32, i32
  }
  func.func @transform_10(%arg0: i32) -> (i32, i32) {
    %c0_i32 = arith.constant 0 : i32
    %c0_i32_0 = arith.constant 0 : i32
    %c0_i32_1 = arith.constant 0 : i32
    return %c0_i32, %c0_i32_0 : i32, i32
  }
  func.func @transform_11(%arg0: i32) -> (i32, i32) {
    %c0_i32 = arith.constant 0 : i32
    %c0_i32_0 = arith.constant 0 : i32
    %c0_i32_1 = arith.constant 0 : i32
    return %c0_i32, %c0_i32_0 : i32, i32
  }
  func.func @transform_12(%arg0: i32) -> (i32, i32) {
    %c0_i32 = arith.constant 0 : i32
    %c0_i32_0 = arith.constant 0 : i32
    %c0_i32_1 = arith.constant 0 : i32
    return %c0_i32, %c0_i32_0 : i32, i32
  }
  func.func @transform_13(%arg0: i32) -> (i32, i32) {
    %c0_i32 = arith.constant 0 : i32
    %c0_i32_0 = arith.constant 0 : i32
    %c0_i32_1 = arith.constant 0 : i32
    return %c0_i32, %c0_i32_0 : i32, i32
  }
  func.func @transform_14(%arg0: i32) -> (i32, i32) {
    %c0_i32 = arith.constant 0 : i32
    %c0_i32_0 = arith.constant 0 : i32
    %c0_i32_1 = arith.constant 0 : i32
    return %c0_i32, %c0_i32_0 : i32, i32
  }
  func.func @transform_15(%arg0: i32) -> (i32, i32) {
    %c0_i32 = arith.constant 0 : i32
    %c0_i32_0 = arith.constant 0 : i32
    %c0_i32_1 = arith.constant 0 : i32
    return %c0_i32, %c0_i32_0 : i32, i32
  }
  func.func @transform_16(%arg0: i32) -> (i32, i32) {
    %c0_i32 = arith.constant 0 : i32
    %c0_i32_0 = arith.constant 0 : i32
    return %arg0, %c0_i32 : i32, i32
  }
}

module attributes {stable_mosaic.version = 11 : i64} {
  func.func @_stt_block_kernel(%arg0: i32, %arg1: memref<64x128xf32, #tpu.memory_space<vmem>>, %arg2: memref<64x128xf32, #tpu.memory_space<vmem>>, %arg3: memref<128x128xbf16, #tpu.memory_space<vmem>>, %arg4: memref<1x128xf32, #tpu.memory_space<vmem>>, %arg5: memref<128x256xbf16, #tpu.memory_space<vmem>>, %arg6: memref<1x256xf32, #tpu.memory_space<vmem>>, %arg7: memref<128x128xbf16, #tpu.memory_space<vmem>>, %arg8: memref<1x128xf32, #tpu.memory_space<vmem>>, %arg9: memref<1x128xf32, #tpu.memory_space<vmem>>, %arg10: memref<1x128xf32, #tpu.memory_space<vmem>>, %arg11: memref<128x512xbf16, #tpu.memory_space<vmem>>, %arg12: memref<1x512xf32, #tpu.memory_space<vmem>>, %arg13: memref<512x128xbf16, #tpu.memory_space<vmem>>, %arg14: memref<1x128xf32, #tpu.memory_space<vmem>>, %arg15: memref<1x128xf32, #tpu.memory_space<vmem>>, %arg16: memref<1x128xf32, #tpu.memory_space<vmem>>, %arg17: memref<64x128xf32, #tpu.memory_space<vmem>>) attributes {dimension_semantics = [#tpu.dimension_semantics<parallel>], iteration_bounds = array<i64: 1>, scalar_prefetch = 0 : i64, scratch_operands = 0 : i64, tpu.core_type = #tpu.core_type<tc>, window_params = [{transform_indices = @transform_0, window_bounds = array<i64: 64, 128>}, {transform_indices = @transform_1, window_bounds = array<i64: 64, 128>}, {pipeline_mode = #tpu.pipeline_mode<synchronous>, transform_indices = @transform_2, window_bounds = array<i64: 128, 128>}, {pipeline_mode = #tpu.pipeline_mode<synchronous>, transform_indices = @transform_3, window_bounds = array<i64: 1, 128>}, {pipeline_mode = #tpu.pipeline_mode<synchronous>, transform_indices = @transform_4, window_bounds = array<i64: 128, 256>}, {pipeline_mode = #tpu.pipeline_mode<synchronous>, transform_indices = @transform_5, window_bounds = array<i64: 1, 256>}, {pipeline_mode = #tpu.pipeline_mode<synchronous>, transform_indices = @transform_6, window_bounds = array<i64: 128, 128>}, {pipeline_mode = #tpu.pipeline_mode<synchronous>, transform_indices = @transform_7, window_bounds = array<i64: 1, 128>}, {pipeline_mode = #tpu.pipeline_mode<synchronous>, transform_indices = @transform_8, window_bounds = array<i64: 1, 128>}, {pipeline_mode = #tpu.pipeline_mode<synchronous>, transform_indices = @transform_9, window_bounds = array<i64: 1, 128>}, {pipeline_mode = #tpu.pipeline_mode<synchronous>, transform_indices = @transform_10, window_bounds = array<i64: 128, 512>}, {pipeline_mode = #tpu.pipeline_mode<synchronous>, transform_indices = @transform_11, window_bounds = array<i64: 1, 512>}, {pipeline_mode = #tpu.pipeline_mode<synchronous>, transform_indices = @transform_12, window_bounds = array<i64: 512, 128>}, {pipeline_mode = #tpu.pipeline_mode<synchronous>, transform_indices = @transform_13, window_bounds = array<i64: 1, 128>}, {pipeline_mode = #tpu.pipeline_mode<synchronous>, transform_indices = @transform_14, window_bounds = array<i64: 1, 128>}, {pipeline_mode = #tpu.pipeline_mode<synchronous>, transform_indices = @transform_15, window_bounds = array<i64: 1, 128>}, {transform_indices = @transform_16, window_bounds = array<i64: 64, 128>}]} {
    %c0 = arith.constant 0 : index
    %c0_0 = arith.constant 0 : index
    %0 = vector.load %arg1[%c0, %c0_0] : memref<64x128xf32, #tpu.memory_space<vmem>>, vector<64x128xf32>
    %c0_1 = arith.constant 0 : index
    %c0_2 = arith.constant 0 : index
    %1 = vector.load %arg2[%c0_1, %c0_2] : memref<64x128xf32, #tpu.memory_space<vmem>>, vector<64x128xf32>
    %2 = arith.truncf %0 : vector<64x128xf32> to vector<64x128xbf16>
    %c0_3 = arith.constant 0 : index
    %c0_4 = arith.constant 0 : index
    %3 = vector.load %arg3[%c0_3, %c0_4] : memref<128x128xbf16, #tpu.memory_space<vmem>>, vector<128x128xbf16>
    %cst = arith.constant dense<0.000000e+00> : vector<64x128xf32>
    %4 = tpu.matmul %2, %3, %cst {dimension_numbers = #tpu.dot_dimension_numbers<[1], [0], [0], [1], [0, 0, 1, 1], [], []>} : vector<64x128xbf16>, vector<128x128xbf16>, vector<64x128xf32> -> vector<64x128xf32>
    %c0_5 = arith.constant 0 : index
    %c0_6 = arith.constant 0 : index
    %5 = vector.load %arg4[%c0_5, %c0_6] : memref<1x128xf32, #tpu.memory_space<vmem>>, vector<1x128xf32>
    %6 = vector.broadcast %5 : vector<1x128xf32> to vector<64x128xf32>
    %7 = arith.addf %4, %6 : vector<64x128xf32>
    %8 = arith.truncf %1 : vector<64x128xf32> to vector<64x128xbf16>
    %c0_7 = arith.constant 0 : index
    %c0_8 = arith.constant 0 : index
    %9 = vector.load %arg5[%c0_7, %c0_8] : memref<128x256xbf16, #tpu.memory_space<vmem>>, vector<128x256xbf16>
    %cst_9 = arith.constant dense<0.000000e+00> : vector<64x256xf32>
    %10 = tpu.matmul %8, %9, %cst_9 {dimension_numbers = #tpu.dot_dimension_numbers<[1], [0], [0], [1], [0, 0, 1, 1], [], []>} : vector<64x128xbf16>, vector<128x256xbf16>, vector<64x256xf32> -> vector<64x256xf32>
    %c0_10 = arith.constant 0 : index
    %c0_11 = arith.constant 0 : index
    %11 = vector.load %arg6[%c0_10, %c0_11] : memref<1x256xf32, #tpu.memory_space<vmem>>, vector<1x256xf32>
    %12 = vector.broadcast %11 : vector<1x256xf32> to vector<64x256xf32>
    %13 = arith.addf %10, %12 : vector<64x256xf32>
    %14 = arith.truncf %7 : vector<64x128xf32> to vector<64x128xbf16>
    %15 = arith.truncf %13 : vector<64x256xf32> to vector<64x256xbf16>
    %16 = vector.extract_strided_slice %14 {offsets = [0, 0], sizes = [64, 32], strides = [1, 1]} : vector<64x128xbf16> to vector<64x32xbf16>
    %17 = vector.extract_strided_slice %14 {offsets = [0, 32], sizes = [64, 32], strides = [1, 1]} : vector<64x128xbf16> to vector<64x32xbf16>
    %18 = vector.extract_strided_slice %14 {offsets = [0, 64], sizes = [64, 32], strides = [1, 1]} : vector<64x128xbf16> to vector<64x32xbf16>
    %19 = vector.extract_strided_slice %14 {offsets = [0, 96], sizes = [64, 32], strides = [1, 1]} : vector<64x128xbf16> to vector<64x32xbf16>
    %20 = vector.shape_cast %16 : vector<64x32xbf16> to vector<1x64x32xbf16>
    %21 = vector.shape_cast %17 : vector<64x32xbf16> to vector<1x64x32xbf16>
    %22 = vector.shape_cast %18 : vector<64x32xbf16> to vector<1x64x32xbf16>
    %23 = vector.shape_cast %19 : vector<64x32xbf16> to vector<1x64x32xbf16>
    %24 = tpu.concatenate %20, %21, %22, %23 in 0 : vector<1x64x32xbf16>, vector<1x64x32xbf16>, vector<1x64x32xbf16>, vector<1x64x32xbf16> -> vector<4x64x32xbf16>
    %25 = vector.extract_strided_slice %15 {offsets = [0, 0], sizes = [64, 32], strides = [1, 1]} : vector<64x256xbf16> to vector<64x32xbf16>
    %26 = vector.extract_strided_slice %15 {offsets = [0, 32], sizes = [64, 32], strides = [1, 1]} : vector<64x256xbf16> to vector<64x32xbf16>
    %27 = vector.extract_strided_slice %15 {offsets = [0, 64], sizes = [64, 32], strides = [1, 1]} : vector<64x256xbf16> to vector<64x32xbf16>
    %28 = vector.extract_strided_slice %15 {offsets = [0, 96], sizes = [64, 32], strides = [1, 1]} : vector<64x256xbf16> to vector<64x32xbf16>
    %29 = vector.shape_cast %25 : vector<64x32xbf16> to vector<1x64x32xbf16>
    %30 = vector.shape_cast %26 : vector<64x32xbf16> to vector<1x64x32xbf16>
    %31 = vector.shape_cast %27 : vector<64x32xbf16> to vector<1x64x32xbf16>
    %32 = vector.shape_cast %28 : vector<64x32xbf16> to vector<1x64x32xbf16>
    %33 = tpu.concatenate %29, %30, %31, %32 in 0 : vector<1x64x32xbf16>, vector<1x64x32xbf16>, vector<1x64x32xbf16>, vector<1x64x32xbf16> -> vector<4x64x32xbf16>
    %34 = vector.extract_strided_slice %15 {offsets = [0, 128], sizes = [64, 32], strides = [1, 1]} : vector<64x256xbf16> to vector<64x32xbf16>
    %35 = vector.extract_strided_slice %15 {offsets = [0, 160], sizes = [64, 32], strides = [1, 1]} : vector<64x256xbf16> to vector<64x32xbf16>
    %36 = vector.extract_strided_slice %15 {offsets = [0, 192], sizes = [64, 32], strides = [1, 1]} : vector<64x256xbf16> to vector<64x32xbf16>
    %37 = vector.extract_strided_slice %15 {offsets = [0, 224], sizes = [64, 32], strides = [1, 1]} : vector<64x256xbf16> to vector<64x32xbf16>
    %38 = vector.shape_cast %34 : vector<64x32xbf16> to vector<1x64x32xbf16>
    %39 = vector.shape_cast %35 : vector<64x32xbf16> to vector<1x64x32xbf16>
    %40 = vector.shape_cast %36 : vector<64x32xbf16> to vector<1x64x32xbf16>
    %41 = vector.shape_cast %37 : vector<64x32xbf16> to vector<1x64x32xbf16>
    %42 = tpu.concatenate %38, %39, %40, %41 in 0 : vector<1x64x32xbf16>, vector<1x64x32xbf16>, vector<1x64x32xbf16>, vector<1x64x32xbf16> -> vector<4x64x32xbf16>
    %43 = tpu.iota {dimensions = array<i32: 0>} : vector<64x64xi32>
    %44 = arith.sitofp %43 : vector<64x64xi32> to vector<64x64xf32>
    %45 = tpu.iota {dimensions = array<i32: 1>} : vector<64x64xi32>
    %46 = arith.sitofp %45 : vector<64x64xi32> to vector<64x64xf32>
    %cst_12 = arith.constant 5.000000e-01 : f32
    %47 = vector.broadcast %cst_12 : f32 to vector<64x64xf32>
    %48 = arith.addf %44, %47 : vector<64x64xf32>
    %cst_13 = arith.constant 2.500000e-01 : f32
    %49 = vector.broadcast %cst_13 : f32 to vector<64x64xf32>
    %50 = arith.mulf %48, %49 : vector<64x64xf32>
    %51 = math.floor %50 : vector<64x64xf32>
    %cst_14 = arith.constant 5.000000e-01 : f32
    %52 = vector.broadcast %cst_14 : f32 to vector<64x64xf32>
    %53 = arith.addf %46, %52 : vector<64x64xf32>
    %cst_15 = arith.constant 2.500000e-01 : f32
    %54 = vector.broadcast %cst_15 : f32 to vector<64x64xf32>
    %55 = arith.mulf %53, %54 : vector<64x64xf32>
    %56 = math.floor %55 : vector<64x64xf32>
    %57 = arith.cmpf oeq, %51, %56 : vector<64x64xf32>
    %cst_16 = arith.constant 0.000000e+00 : f32
    %cst_17 = arith.constant -1.000000e+30 : f32
    %58 = vector.broadcast %cst_16 : f32 to vector<64x64xf32>
    %59 = vector.broadcast %cst_17 : f32 to vector<64x64xf32>
    %60 = arith.select %57, %58, %59 : vector<64x64xi1>, vector<64x64xf32>
    "tpu.trace_start"() <{level = 10 : i32, message = "hmd,hnd->hmn"}> : () -> ()
    %cst_18 = arith.constant dense<0.000000e+00> : vector<4x64x64xf32>
    %61 = tpu.matmul %24, %33, %cst_18 {dimension_numbers = #tpu.dot_dimension_numbers<[2], [2], [1], [1], [0, 0, 0, 1, 1, 1], [0], [0]>} : vector<4x64x32xbf16>, vector<4x64x32xbf16>, vector<4x64x64xf32> -> vector<4x64x64xf32>
    "tpu.trace_stop"() : () -> ()
    %62 = vector.shape_cast %60 : vector<64x64xf32> to vector<1x64x64xf32>
    %63 = vector.broadcast %62 : vector<1x64x64xf32> to vector<4x64x64xf32>
    %64 = arith.addf %61, %63 : vector<4x64x64xf32>
    %cst_19 = arith.constant dense<0xFF800000> : vector<4x64xf32>
    %65 = vector.multi_reduction <maximumf>, %64, %cst_19 [2] : vector<4x64x64xf32> to vector<4x64xf32>
    %66 = vector.shape_cast %65 : vector<4x64xf32> to vector<4x64x1xf32>
    %67 = vector.broadcast %66 : vector<4x64x1xf32> to vector<4x64x64xf32>
    %68 = arith.subf %64, %67 : vector<4x64x64xf32>
    %69 = math.exp %68 : vector<4x64x64xf32>
    %cst_20 = arith.constant dense<0.000000e+00> : vector<4x64xf32>
    %70 = vector.multi_reduction <add>, %69, %cst_20 [2] : vector<4x64x64xf32> to vector<4x64xf32>
    %71 = vector.shape_cast %70 : vector<4x64xf32> to vector<4x64x1xf32>
    %72 = tpu.reciprocal %71 {approx = true} : vector<4x64x1xf32> -> vector<4x64x1xf32>
    %73 = vector.broadcast %72 : vector<4x64x1xf32> to vector<4x64x64xf32>
    %74 = arith.mulf %69, %73 : vector<4x64x64xf32>
    %75 = arith.truncf %74 : vector<4x64x64xf32> to vector<4x64x64xbf16>
    "tpu.trace_start"() <{level = 10 : i32, message = "hmn,hnd->hmd"}> : () -> ()
    %cst_21 = arith.constant dense<0.000000e+00> : vector<4x64x32xf32>
    %76 = tpu.matmul %75, %42, %cst_21 {dimension_numbers = #tpu.dot_dimension_numbers<[2], [1], [1], [2], [0, 0, 0, 1, 1, 2], [0], [0]>} : vector<4x64x64xbf16>, vector<4x64x32xbf16>, vector<4x64x32xf32> -> vector<4x64x32xf32>
    "tpu.trace_stop"() : () -> ()
    %77 = vector.extract_strided_slice %76 {offsets = [0, 0, 0], sizes = [1, 64, 32], strides = [1, 1, 1]} : vector<4x64x32xf32> to vector<1x64x32xf32>
    %78 = vector.shape_cast %77 : vector<1x64x32xf32> to vector<64x32xf32>
    %79 = vector.extract_strided_slice %76 {offsets = [1, 0, 0], sizes = [1, 64, 32], strides = [1, 1, 1]} : vector<4x64x32xf32> to vector<1x64x32xf32>
    %80 = vector.shape_cast %79 : vector<1x64x32xf32> to vector<64x32xf32>
    %81 = vector.extract_strided_slice %76 {offsets = [2, 0, 0], sizes = [1, 64, 32], strides = [1, 1, 1]} : vector<4x64x32xf32> to vector<1x64x32xf32>
    %82 = vector.shape_cast %81 : vector<1x64x32xf32> to vector<64x32xf32>
    %83 = vector.extract_strided_slice %76 {offsets = [3, 0, 0], sizes = [1, 64, 32], strides = [1, 1, 1]} : vector<4x64x32xf32> to vector<1x64x32xf32>
    %84 = vector.shape_cast %83 : vector<1x64x32xf32> to vector<64x32xf32>
    %85 = tpu.concatenate %78, %80, %82, %84 in 1 : vector<64x32xf32>, vector<64x32xf32>, vector<64x32xf32>, vector<64x32xf32> -> vector<64x128xf32>
    %86 = arith.truncf %85 : vector<64x128xf32> to vector<64x128xbf16>
    %c0_22 = arith.constant 0 : index
    %c0_23 = arith.constant 0 : index
    %87 = vector.load %arg7[%c0_22, %c0_23] : memref<128x128xbf16, #tpu.memory_space<vmem>>, vector<128x128xbf16>
    %cst_24 = arith.constant dense<0.000000e+00> : vector<64x128xf32>
    %88 = tpu.matmul %86, %87, %cst_24 {dimension_numbers = #tpu.dot_dimension_numbers<[1], [0], [0], [1], [0, 0, 1, 1], [], []>} : vector<64x128xbf16>, vector<128x128xbf16>, vector<64x128xf32> -> vector<64x128xf32>
    %c0_25 = arith.constant 0 : index
    %c0_26 = arith.constant 0 : index
    %89 = vector.load %arg8[%c0_25, %c0_26] : memref<1x128xf32, #tpu.memory_space<vmem>>, vector<1x128xf32>
    %90 = vector.broadcast %89 : vector<1x128xf32> to vector<64x128xf32>
    %91 = arith.addf %88, %90 : vector<64x128xf32>
    %92 = arith.addf %91, %0 : vector<64x128xf32>
    %c0_27 = arith.constant 0 : index
    %c0_28 = arith.constant 0 : index
    %93 = vector.load %arg9[%c0_27, %c0_28] : memref<1x128xf32, #tpu.memory_space<vmem>>, vector<1x128xf32>
    %c0_29 = arith.constant 0 : index
    %c0_30 = arith.constant 0 : index
    %94 = vector.load %arg10[%c0_29, %c0_30] : memref<1x128xf32, #tpu.memory_space<vmem>>, vector<1x128xf32>
    %cst_31 = arith.constant dense<0.000000e+00> : vector<64xf32>
    %95 = vector.multi_reduction <add>, %92, %cst_31 [1] : vector<64x128xf32> to vector<64xf32>
    %96 = vector.shape_cast %95 : vector<64xf32> to vector<64x1xf32>
    %cst_32 = arith.constant 1.280000e+02 : f32
    %97 = vector.broadcast %cst_32 : f32 to vector<64x1xf32>
    %98 = arith.divf %96, %97 : vector<64x1xf32>
    %99 = vector.broadcast %98 : vector<64x1xf32> to vector<64x128xf32>
    %100 = arith.subf %92, %99 : vector<64x128xf32>
    %101 = arith.mulf %100, %100 : vector<64x128xf32>
    %cst_33 = arith.constant dense<0.000000e+00> : vector<64xf32>
    %102 = vector.multi_reduction <add>, %101, %cst_33 [1] : vector<64x128xf32> to vector<64xf32>
    %103 = vector.shape_cast %102 : vector<64xf32> to vector<64x1xf32>
    %cst_34 = arith.constant 1.280000e+02 : f32
    %104 = vector.broadcast %cst_34 : f32 to vector<64x1xf32>
    %105 = arith.divf %103, %104 : vector<64x1xf32>
    %106 = vector.broadcast %98 : vector<64x1xf32> to vector<64x128xf32>
    %107 = arith.subf %92, %106 : vector<64x128xf32>
    %cst_35 = arith.constant 9.99999974E-6 : f32
    %108 = vector.broadcast %cst_35 : f32 to vector<64x1xf32>
    %109 = arith.addf %105, %108 : vector<64x1xf32>
    %110 = math.rsqrt %109 : vector<64x1xf32>
    %111 = vector.broadcast %110 : vector<64x1xf32> to vector<64x128xf32>
    %112 = arith.mulf %107, %111 : vector<64x128xf32>
    %113 = vector.broadcast %93 : vector<1x128xf32> to vector<64x128xf32>
    %114 = arith.mulf %112, %113 : vector<64x128xf32>
    %115 = vector.broadcast %94 : vector<1x128xf32> to vector<64x128xf32>
    %116 = arith.addf %114, %115 : vector<64x128xf32>
    %117 = arith.truncf %116 : vector<64x128xf32> to vector<64x128xbf16>
    %c0_36 = arith.constant 0 : index
    %c0_37 = arith.constant 0 : index
    %118 = vector.load %arg11[%c0_36, %c0_37] : memref<128x512xbf16, #tpu.memory_space<vmem>>, vector<128x512xbf16>
    %cst_38 = arith.constant dense<0.000000e+00> : vector<64x512xf32>
    %119 = tpu.matmul %117, %118, %cst_38 {dimension_numbers = #tpu.dot_dimension_numbers<[1], [0], [0], [1], [0, 0, 1, 1], [], []>} : vector<64x128xbf16>, vector<128x512xbf16>, vector<64x512xf32> -> vector<64x512xf32>
    %c0_39 = arith.constant 0 : index
    %c0_40 = arith.constant 0 : index
    %120 = vector.load %arg12[%c0_39, %c0_40] : memref<1x512xf32, #tpu.memory_space<vmem>>, vector<1x512xf32>
    %121 = vector.broadcast %120 : vector<1x512xf32> to vector<64x512xf32>
    %122 = arith.addf %119, %121 : vector<64x512xf32>
    %cst_41 = arith.constant 0.000000e+00 : f32
    %123 = vector.broadcast %cst_41 : f32 to vector<64x512xf32>
    %124 = arith.maximumf %122, %123 : vector<64x512xf32>
    %125 = arith.truncf %124 : vector<64x512xf32> to vector<64x512xbf16>
    %c0_42 = arith.constant 0 : index
    %c0_43 = arith.constant 0 : index
    %126 = vector.load %arg13[%c0_42, %c0_43] : memref<512x128xbf16, #tpu.memory_space<vmem>>, vector<512x128xbf16>
    %cst_44 = arith.constant dense<0.000000e+00> : vector<64x128xf32>
    %127 = tpu.matmul %125, %126, %cst_44 {dimension_numbers = #tpu.dot_dimension_numbers<[1], [0], [0], [1], [0, 0, 1, 1], [], []>} : vector<64x512xbf16>, vector<512x128xbf16>, vector<64x128xf32> -> vector<64x128xf32>
    %c0_45 = arith.constant 0 : index
    %c0_46 = arith.constant 0 : index
    %128 = vector.load %arg14[%c0_45, %c0_46] : memref<1x128xf32, #tpu.memory_space<vmem>>, vector<1x128xf32>
    %129 = vector.broadcast %128 : vector<1x128xf32> to vector<64x128xf32>
    %130 = arith.addf %127, %129 : vector<64x128xf32>
    %131 = arith.addf %116, %130 : vector<64x128xf32>
    %c0_47 = arith.constant 0 : index
    %c0_48 = arith.constant 0 : index
    %132 = vector.load %arg15[%c0_47, %c0_48] : memref<1x128xf32, #tpu.memory_space<vmem>>, vector<1x128xf32>
    %c0_49 = arith.constant 0 : index
    %c0_50 = arith.constant 0 : index
    %133 = vector.load %arg16[%c0_49, %c0_50] : memref<1x128xf32, #tpu.memory_space<vmem>>, vector<1x128xf32>
    %cst_51 = arith.constant dense<0.000000e+00> : vector<64xf32>
    %134 = vector.multi_reduction <add>, %131, %cst_51 [1] : vector<64x128xf32> to vector<64xf32>
    %135 = vector.shape_cast %134 : vector<64xf32> to vector<64x1xf32>
    %cst_52 = arith.constant 1.280000e+02 : f32
    %136 = vector.broadcast %cst_52 : f32 to vector<64x1xf32>
    %137 = arith.divf %135, %136 : vector<64x1xf32>
    %138 = vector.broadcast %137 : vector<64x1xf32> to vector<64x128xf32>
    %139 = arith.subf %131, %138 : vector<64x128xf32>
    %140 = arith.mulf %139, %139 : vector<64x128xf32>
    %cst_53 = arith.constant dense<0.000000e+00> : vector<64xf32>
    %141 = vector.multi_reduction <add>, %140, %cst_53 [1] : vector<64x128xf32> to vector<64xf32>
    %142 = vector.shape_cast %141 : vector<64xf32> to vector<64x1xf32>
    %cst_54 = arith.constant 1.280000e+02 : f32
    %143 = vector.broadcast %cst_54 : f32 to vector<64x1xf32>
    %144 = arith.divf %142, %143 : vector<64x1xf32>
    %145 = vector.broadcast %137 : vector<64x1xf32> to vector<64x128xf32>
    %146 = arith.subf %131, %145 : vector<64x128xf32>
    %cst_55 = arith.constant 9.99999974E-6 : f32
    %147 = vector.broadcast %cst_55 : f32 to vector<64x1xf32>
    %148 = arith.addf %144, %147 : vector<64x1xf32>
    %149 = math.rsqrt %148 : vector<64x1xf32>
    %150 = vector.broadcast %149 : vector<64x1xf32> to vector<64x128xf32>
    %151 = arith.mulf %146, %150 : vector<64x128xf32>
    %152 = vector.broadcast %132 : vector<1x128xf32> to vector<64x128xf32>
    %153 = arith.mulf %151, %152 : vector<64x128xf32>
    %154 = vector.broadcast %133 : vector<1x128xf32> to vector<64x128xf32>
    %155 = arith.addf %153, %154 : vector<64x128xf32>
    %c0_56 = arith.constant 0 : index
    %c0_57 = arith.constant 0 : index
    %156 = vector.load %arg17[%c0_56, %c0_57] : memref<64x128xf32, #tpu.memory_space<vmem>>, vector<64x128xf32>
    tpu.vector_store %arg17[%c0_56, %c0_57], %155 {strides = array<i32>} : memref<64x128xf32, #tpu.memory_space<vmem>>, vector<64x128xf32>,
    return
  }
  func.func @transform_0(%arg0: i32) -> (i32, i32) {
    %c0_i32 = arith.constant 0 : i32
    %c0_i32_0 = arith.constant 0 : i32
    return %arg0, %c0_i32 : i32, i32
  }
  func.func @transform_1(%arg0: i32) -> (i32, i32) {
    %c0_i32 = arith.constant 0 : i32
    %c0_i32_0 = arith.constant 0 : i32
    return %arg0, %c0_i32 : i32, i32
  }
  func.func @transform_2(%arg0: i32) -> (i32, i32) {
    %c0_i32 = arith.constant 0 : i32
    %c0_i32_0 = arith.constant 0 : i32
    %c0_i32_1 = arith.constant 0 : i32
    return %c0_i32, %c0_i32_0 : i32, i32
  }
  func.func @transform_3(%arg0: i32) -> (i32, i32) {
    %c0_i32 = arith.constant 0 : i32
    %c0_i32_0 = arith.constant 0 : i32
    %c0_i32_1 = arith.constant 0 : i32
    return %c0_i32, %c0_i32_0 : i32, i32
  }
  func.func @transform_4(%arg0: i32) -> (i32, i32) {
    %c0_i32 = arith.constant 0 : i32
    %c0_i32_0 = arith.constant 0 : i32
    %c0_i32_1 = arith.constant 0 : i32
    return %c0_i32, %c0_i32_0 : i32, i32
  }
  func.func @transform_5(%arg0: i32) -> (i32, i32) {
    %c0_i32 = arith.constant 0 : i32
    %c0_i32_0 = arith.constant 0 : i32
    %c0_i32_1 = arith.constant 0 : i32
    return %c0_i32, %c0_i32_0 : i32, i32
  }
  func.func @transform_6(%arg0: i32) -> (i32, i32) {
    %c0_i32 = arith.constant 0 : i32
    %c0_i32_0 = arith.constant 0 : i32
    %c0_i32_1 = arith.constant 0 : i32
    return %c0_i32, %c0_i32_0 : i32, i32
  }
  func.func @transform_7(%arg0: i32) -> (i32, i32) {
    %c0_i32 = arith.constant 0 : i32
    %c0_i32_0 = arith.constant 0 : i32
    %c0_i32_1 = arith.constant 0 : i32
    return %c0_i32, %c0_i32_0 : i32, i32
  }
  func.func @transform_8(%arg0: i32) -> (i32, i32) {
    %c0_i32 = arith.constant 0 : i32
    %c0_i32_0 = arith.constant 0 : i32
    %c0_i32_1 = arith.constant 0 : i32
    return %c0_i32, %c0_i32_0 : i32, i32
  }
  func.func @transform_9(%arg0: i32) -> (i32, i32) {
    %c0_i32 = arith.constant 0 : i32
    %c0_i32_0 = arith.constant 0 : i32
    %c0_i32_1 = arith.constant 0 : i32
    return %c0_i32, %c0_i32_0 : i32, i32
  }
  func.func @transform_10(%arg0: i32) -> (i32, i32) {
    %c0_i32 = arith.constant 0 : i32
    %c0_i32_0 = arith.constant 0 : i32
    %c0_i32_1 = arith.constant 0 : i32
    return %c0_i32, %c0_i32_0 : i32, i32
  }
  func.func @transform_11(%arg0: i32) -> (i32, i32) {
    %c0_i32 = arith.constant 0 : i32
    %c0_i32_0 = arith.constant 0 : i32
    %c0_i32_1 = arith.constant 0 : i32
    return %c0_i32, %c0_i32_0 : i32, i32
  }
  func.func @transform_12(%arg0: i32) -> (i32, i32) {
    %c0_i32 = arith.constant 0 : i32
    %c0_i32_0 = arith.constant 0 : i32
    %c0_i32_1 = arith.constant 0 : i32
    return %c0_i32, %c0_i32_0 : i32, i32
  }
  func.func @transform_13(%arg0: i32) -> (i32, i32) {
    %c0_i32 = arith.constant 0 : i32
    %c0_i32_0 = arith.constant 0 : i32
    %c0_i32_1 = arith.constant 0 : i32
    return %c0_i32, %c0_i32_0 : i32, i32
  }
  func.func @transform_14(%arg0: i32) -> (i32, i32) {
    %c0_i32 = arith.constant 0 : i32
    %c0_i32_0 = arith.constant 0 : i32
    %c0_i32_1 = arith.constant 0 : i32
    return %c0_i32, %c0_i32_0 : i32, i32
  }
  func.func @transform_15(%arg0: i32) -> (i32, i32) {
    %c0_i32 = arith.constant 0 : i32
    %c0_i32_0 = arith.constant 0 : i32
    %c0_i32_1 = arith.constant 0 : i32
    return %c0_i32, %c0_i32_0 : i32, i32
  }
  func.func @transform_16(%arg0: i32) -> (i32, i32) {
    %c0_i32 = arith.constant 0 : i32
    %c0_i32_0 = arith.constant 0 : i32
    return %arg0, %c0_i32 : i32, i32
  }
}

</mosaic_0001>

<bundles_post_ra>
// kernel: stt_forward.9
= control target key start
LH: loop header
LB: loop body
LE: loop exit
PB: predicated region body
PF: predicated region fallthrough
CT: control target
= control target key end

     0   :  { %vm42_vm0 = vcmask 130048   ;;  %s234_s1 = inlined_call_operand.vmem [shape: bf16[16,128], index: 1, kind: input, shape index: {}]   ;;  %s235_s0 = inlined_call_operand.vmem [shape: f32[64,16], index: 0, kind: input, shape index: {}]   ;;  %s236_s2 = inlined_call_operand.vmem [shape: f32[1,128], index: 2, kind: input, shape index: {}]   ;;  %s237_s3 = inlined_call_operand.vmem [shape: f32[64,128], index: 3, kind: output, shape index: {}]  }
   0x1   :  { %v155_v0 = vld [vmem:[%s234_s1] sm:$0xff]   ;;  %v16_v2 = vld [vmem:[%s235_s0 + $0x8] sm:$0xff]  ;;  %v17_v6 = vld [vmem:[%s235_s0 + $0x10] sm:$0xff] }
   0x2   :  { %v15_v1 = vld [vmem:[%s235_s0] sm:$0xff]  ;;  %143 = vmatprep.subr.bf16.mxu0 %v155_v0  ;;  %153 = vmatprep.subr.bf16.mxu1 %v155_v0  ;;  %v20_v5 = vld [vmem:[%s235_s0 + $0x28] sm:$0xff]  ;;  %v18_v7 = vld [vmem:[%s235_s0 + $0x18] sm:$0xff] }
   0x3   :  { %v19_v3 = vld [vmem:[%s235_s0 + $0x20] sm:$0xff]  ;;  %v23_v4 = vpack.c.bf16 %v16_v2, %v15_v1  ;;  %144 = vmatpush3.bf16.msra.mxu0 %v155_v0  ;;  %154 = vmatpush3.bf16.msra.mxu1 %v155_v0  ;;  %v24_v9 = vpack.c.bf16 %v18_v7, %v17_v6  ;;  %v21_v10 = vld [vmem:[%s235_s0 + $0x30] sm:$0xff]  ;;  %v22_v11 = vld [vmem:[%s235_s0 + $0x38] sm:$0xff] }
   0x4   :  { %v25_v8 = vpack.c.bf16 %v20_v5, %v19_v3  ;;  %v26_v12 = vpack.c.bf16 %v22_v11, %v21_v10  ;;  %v132_v13 = vld [vmem:[%s236_s2] ss:$0 sm:$0xff] }
   0x5   :  { %145 = vmatprep.mubr.msk.bf16.mxu0 %vm42_vm0, %v23_v4 }
   0x6   :  { %149 = vmatprep.mubr.msk.bf16.mxu1 %vm42_vm0, %v25_v8  ;;  %146 = vmatmul.mubr.msk.bf16.vlgmr.msra.gmra.mxu0 %vm42_vm0, %v24_v9 }
   0x7   :  { %150 = vmatmul.mubr.msk.bf16.vlgmr.msra.gmra.mxu1 %vm42_vm0, %v26_v12 }
  0xc6   :  { %v147_v14 = vpop.f32.mrf.mxu0 }
  0xc7   :  { %v151_v15 = vpop.f32.mrf.mxu1  ;;  %v98_v16 = vadd.f32 %v147_v14, %v132_v13 }
  0xc8   :  { %v114_v17 = vadd.f32 %v151_v15, %v132_v13  ;;  %v89_v18 = vpop.f32.mrf.mxu0 }
  0xc9   :  { %v105_v19 = vpop.f32.mrf.mxu1  ;;  %122 = vst [vmem:[%s237_s3 + $0x10] sm:$0xff] %v98_v16  ;;  %v90_v20 = vadd.f32 %v132_v13, %v89_v18 }
  0xca   :  { %126 = vst [vmem:[%s237_s3 + $0x30] sm:$0xff] %v114_v17  ;;  %v106_v21 = vadd.f32 %v132_v13, %v105_v19  ;;  %v148_v22 = vpop.f32.mrf.mxu0 }
  0xcb   :  { %v152_v23 = vpop.f32.mrf.mxu1  ;;  %120 = vst [vmem:[%s237_s3] sm:$0xff] %v90_v20  ;;  %v101_v24 = vadd.f32 %v148_v22, %v132_v13 }
  0xcc   :  { %124 = vst [vmem:[%s237_s3 + $0x20] sm:$0xff] %v106_v21  ;;  %v117_v25 = vadd.f32 %v152_v23, %v132_v13  ;;  %v92_v26 = vpop.f32.mrf.mxu0 }
  0xcd   :  { %v108_v27 = vpop.f32.mrf.mxu1  ;;  %123 = vst [vmem:[%s237_s3 + $0x18] sm:$0xff] %v101_v24  ;;  %v93_v28 = vadd.f32 %v132_v13, %v92_v26 }
  0xce   :  { %127 = vst [vmem:[%s237_s3 + $0x38] sm:$0xff] %v117_v25  ;;  %v109_v29 = vadd.f32 %v132_v13, %v108_v27 }
  0xcf   :  { %121 = vst [vmem:[%s237_s3 + $0x8] sm:$0xff] %v93_v28 }
  0xd0   :  { %125 = vst [vmem:[%s237_s3 + $0x28] sm:$0xff] %v109_v29 }

// kernel: stt_forward.10
= control target key start
LH: loop header
LB: loop body
LE: loop exit
PB: predicated region body
PF: predicated region fallthrough
CT: control target
= control target key end

     0   :  { %v3779_v1 = vmov 0   ;;  %v232_v49 = vlaneseq  ;;  %vm566_vm0 = vcmask 261120   ;;  %vm923_vm3 = vcmask 523264   ;;  %s5131_s4 = inlined_call_operand.vmem [shape: bf16[128,256], index: 4, kind: input, shape index: {}]   ;;  %s5132_s2 = inlined_call_operand.vmem [shape: bf16[128,128], index: 2, kind: input, shape index: {}]   ;;  %s5133_s0 = inlined_call_operand.vmem [shape: f32[64,128], index: 0, kind: input, shape index: {}, may-alias: {0,1}]   ;;  %s5134_s1 = inlined_call_operand.vmem [shape: f32[64,128], index: 1, kind: input, shape index: {}, may-alias: {0,1}]   ;;  %s5135_s5 = inlined_call_operand.vmem [shape: f32[1,256], index: 5, kind: input, shape index: {}]   ;;  %s5136_s3 = inlined_call_operand.vmem [shape: f32[1,128], index: 3, kind: input, shape index: {}]   ;;  %s5137_s6 = inlined_call_operand.vmem [shape: bf16[128,128], index: 6, kind: input, shape index: {}]   ;;  %s5138_s7 = inlined_call_operand.vmem [shape: f32[1,128], index: 7, kind: input, shape index: {}]   ;;  %s5139_s10 = inlined_call_operand.vmem [shape: bf16[128,512], index: 10, kind: input, shape index: {}]   ;;  %s5140_s12 = inlined_call_operand.vmem [shape: bf16[512,128], index: 12, kind: input, shape index: {}]   ;;  %s5141_s8 = inlined_call_operand.vmem [shape: f32[1,128], index: 8, kind: input, shape index: {}]   ;;  %s5142_s9 = inlined_call_operand.vmem [shape: f32[1,128], index: 9, kind: input, shape index: {}]   ;;  %s5143_s11 = inlined_call_operand.vmem [shape: f32[1,512], index: 11, kind: input, shape index: {}]   ;;  %s5144_s13 = inlined_call_operand.vmem [shape: f32[1,128], index: 13, kind: input, shape index: {}]   ;;  %s5145_s14 = inlined_call_operand.vmem [shape: f32[1,128], index: 14, kind: input, shape index: {}]   ;;  %s5146_s15 = inlined_call_operand.vmem [shape: f32[1,128], index: 15, kind: input, shape index: {}]   ;;  %s5147_s16 = inlined_call_operand.vmem [shape: f32[64,128], index: 16, kind: output, shape index: {}]  }
   0x1   :  { %5149 = sst [smem:[#allocation2_spill]] %s5131_s4  ;;  %354 = vmatprep.mubr.bf16.mxu1 %v3779_v1  ;;  %v3503_v6 = vld [vmem:[%s5132_s2 + $0x38] sm:$0xff]   ;;  %v3507_v9 = vld [vmem:[%s5132_s2 + $0x30] sm:$0xff]   ;;  %v3511_v10 = vld [vmem:[%s5132_s2 + $0x28] sm:$0xff]   ;;  %s3782_s4 = smov 64   ;;  %vm1712_vm10 = vcmask 785408  }
   0x2   :  { %s5150_s23 = sld [smem:[#allocation2_spill]]  ;;  %3234 = vmatprep.subr.bf16.mxu0 %v3503_v6  ;;  %v3515_v13 = vld [vmem:[%s5132_s2 + $0x20] sm:$0xff]   ;;  %v3519_v16 = vld [vmem:[%s5132_s2 + $0x18] sm:$0xff]   ;;  %v55_v20 = vld [vmem:[%s5133_s0 + $0x8] sm:$0xff]  ;;  %v3996_v52 = vshrl.u32 %v232_v49, 7 }
   0x3   :  { %3235 = vmatpush3.bf16.msra.mxu0 %v3503_v6  ;;  %v54_v19 = vld [vmem:[%s5133_s0] sm:$0xff]  ;;  %v3520_v22 = vld [vmem:[%s5132_s2 + $0x10] sm:$0xff]   ;;  %v3521_v25 = vld [vmem:[%s5132_s2 + $0x8] sm:$0xff]  }
   0x4   :  { %3236 = vmatprep.subr.bf16.mxu0 %v3507_v9  ;;  %v70_v21 = vpack.c.bf16 %v55_v20, %v54_v19  ;;  %v62_v27 = vld [vmem:[%s5134_s1] sm:$0xff]  ;;  %v63_v28 = vld [vmem:[%s5134_s1 + $0x8] sm:$0xff]  ;;  %v56_v31 = vld [vmem:[%s5133_s0 + $0x10] sm:$0xff]  ;;  %v234_v56 = vsub.s32 0, %v3996_v52  ;;  %v238_v61 = vsub.s32 1, %v3996_v52 }
   0x5   :  { %v210_v29 = vpack.c.bf16 %v63_v28, %v62_v27  ;;  %v3522_v30 = vld [vmem:[%s5132_s2] sm:$0xff]   ;;  %v57_v32 = vld [vmem:[%s5133_s0 + $0x18] sm:$0xff]  ;;  %v59_v34 = vld [vmem:[%s5133_s0 + $0x28] sm:$0xff] }
   0x6   :  { %3250 = vmatprep.mubr.bf16.mxu0 %v70_v21  ;;  %v58_v33 = vld [vmem:[%s5133_s0 + $0x20] sm:$0xff]  ;;  %v64_v35 = vld [vmem:[%s5134_s1 + $0x10] sm:$0xff]  ;;  %v65_v36 = vld [vmem:[%s5134_s1 + $0x18] sm:$0xff]  ;;  %v71_v37 = vpack.c.bf16 %v57_v32, %v56_v31 }
   0x7   :  { %3237 = vmatpush3.bf16.msra.mxu0 %v3507_v9  ;;  %v72_v38 = vpack.c.bf16 %v59_v34, %v58_v33  ;;  %v211_v39 = vpack.c.bf16 %v65_v36, %v64_v35  ;;  %v60_v40 = vld [vmem:[%s5133_s0 + $0x30] sm:$0xff]  ;;  %v61_v41 = vld [vmem:[%s5133_s0 + $0x38] sm:$0xff]  ;;  %v66_v42 = vld [vmem:[%s5134_s1 + $0x20] sm:$0xff] }
   0x8   :  { %v3491_v0 = vld [vmem:[%s5150_s23 + $0x74] ss:$8 sps:$4 sm:$0xff]   ;;  %v3493_v2 = vld [vmem:[%s5150_s23 + $0x70] ss:$8 sps:$4 sm:$0xff]   ;;  %v3494_v3 = vld [vmem:[%s5150_s23 + $0x64] ss:$8 sps:$4 sm:$0xff]   ;;  %3238 = vmatprep.subr.bf16.mxu0 %v3511_v10  ;;  %v73_v44 = vpack.c.bf16 %v61_v41, %v60_v40 }
   0x9   :  { %322 = vmatprep.subr.bf16.mxu1 %v3491_v0  ;;  %v3496_v4 = vld [vmem:[%s5150_s23 + $0x60] ss:$8 sps:$4 sm:$0xff]   ;;  %v3497_v5 = vld [vmem:[%s5150_s23 + $0x54] ss:$8 sps:$4 sm:$0xff]   ;;  %v3499_v7 = vld [vmem:[%s5150_s23 + $0x50] ss:$8 sps:$4 sm:$0xff]  }
   0xa   :  { %323 = vmatpush1.bf16.msra.mxu1 %v3493_v2  ;;  %v3500_v8 = vld [vmem:[%s5150_s23 + $0x44] ss:$8 sps:$4 sm:$0xff]   ;;  %v3502_v11 = vld [vmem:[%s5150_s23 + $0x40] ss:$8 sps:$4 sm:$0xff]   ;;  %v3504_v12 = vld [vmem:[%s5150_s23 + $0x34] ss:$8 sps:$4 sm:$0xff]  }
   0xb   :  { %324 = vmatprep.subr.bf16.mxu1 %v3494_v3  ;;  %v3506_v14 = vld [vmem:[%s5150_s23 + $0x30] ss:$8 sps:$4 sm:$0xff]   ;;  %v3508_v15 = vld [vmem:[%s5150_s23 + $0x24] ss:$8 sps:$4 sm:$0xff]   ;;  %3239 = vmatpush3.bf16.msra.mxu0 %v3511_v10  ;;  %v3510_v17 = vld [vmem:[%s5150_s23 + $0x20] ss:$8 sps:$4 sm:$0xff]  }
   0xc   :  { %3240 = vmatprep.subr.bf16.mxu0 %v3515_v13  ;;  %v3512_v18 = vld [vmem:[%s5150_s23 + $0x14] ss:$8 sps:$4 sm:$0xff]   ;;  %v3514_v23 = vld [vmem:[%s5150_s23 + $0x10] ss:$8 sps:$4 sm:$0xff]   ;;  %v3516_v24 = vld [vmem:[%s5150_s23 + $0x4] ss:$8 sps:$4 sm:$0xff]  }
   0xd   :  { %v3518_v26 = vld [vmem:[%s5150_s23] ss:$8 sps:$4 sm:$0xff]   ;;  %v68_v46 = vld [vmem:[%s5134_s1 + $0x30] sm:$0xff]  ;;  %v69_v47 = vld [vmem:[%s5134_s1 + $0x38] sm:$0xff] }
   0xe   :  { %325 = vmatpush1.bf16.msra.mxu1 %v3496_v4  ;;  %v67_v43 = vld [vmem:[%s5134_s1 + $0x28] sm:$0xff]  ;;  %v213_v48 = vpack.c.bf16 %v69_v47, %v68_v46  ;;  %v230_v57 = vld [vmem:[%s5135_s5] sm:$0x3]  ;;  %s3781_s5 = smov 32  }
   0xf   :  { %326 = vmatprep.subr.bf16.mxu1 %v3497_v5  ;;  %3241 = vmatpush3.bf16.msra.mxu0 %v3515_v13  ;;  %v212_v45 = vpack.c.bf16 %v67_v43, %v66_v42  ;;  %v4007_v59 = vld [vmem:[%s5136_s3] ss:$0 sm:$0xff]  ;;  %v235_v0 = vrot.slane %v230_v57, %v234_v56  ;;  %v4015_v5 = vrot.slane %v230_v57, %v238_v61  ;;  %s3780_s3 = smov 96  }
  0x10   :  { %3242 = vmatprep.subr.bf16.mxu0 %v3519_v16 }
  0x12   :  { %327 = vmatpush1.bf16.msra.mxu1 %v3499_v7 }
  0x13   :  { %328 = vmatprep.subr.bf16.mxu1 %v3500_v8  ;;  %3243 = vmatpush3.bf16.msra.mxu0 %v3519_v16 }
  0x14   :  { %3244 = vmatprep.subr.bf16.mxu0 %v3520_v22 }
  0x16   :  { %329 = vmatpush1.bf16.msra.mxu1 %v3502_v11 }
  0x17   :  { %330 = vmatprep.subr.bf16.mxu1 %v3504_v12  ;;  %3245 = vmatpush3.bf16.msra.mxu0 %v3520_v22 }
  0x18   :  { %3246 = vmatprep.subr.bf16.mxu0 %v3521_v25 }
  0x1a   :  { %331 = vmatpush1.bf16.msra.mxu1 %v3506_v14 }
  0x1b   :  { %332 = vmatprep.subr.bf16.mxu1 %v3508_v15  ;;  %3247 = vmatpush3.bf16.msra.mxu0 %v3521_v25 }
  0x1c   :  { %3248 = vmatprep.subr.bf16.mxu0 %v3522_v30 }
  0x1e   :  { %333 = vmatpush1.bf16.msra.mxu1 %v3510_v17 }
  0x1f   :  { %334 = vmatprep.subr.bf16.mxu1 %v3512_v18  ;;  %3249 = vmatpush3.bf16.msra.mxu0 %v3522_v30 }
  0x22   :  { %335 = vmatpush1.bf16.msra.mxu1 %v3514_v23  ;;  %3251 = vmatmul.mubr.bf16.vlgmr.msra.gmra.mxu0 %v71_v37 }
  0x23   :  { %336 = vmatprep.subr.bf16.mxu1 %v3516_v24  ;;  %3254 = vmatprep.mubr.bf16.mxu0 %v72_v38 }
  0x26   :  { %337 = vmatpush1.bf16.msra.mxu1 %v3518_v26 }
  0x29   :  { %355 = vmatmul.mubr.bf16.vlgmr.msra.gmra.mxu1 %v210_v29 }
  0x2a   :  { %364 = vmatprep.mubr.bf16.mxu1 %v3779_v1  ;;  %3255 = vmatmul.mubr.bf16.gmra.mxu0 %v73_v44 }
  0x31   :  { %365 = vmatmul.mubr.bf16.gmra.mxu1 %v211_v39 }
  0x32   :  { %374 = vmatprep.mubr.bf16.mxu1 %v3779_v1 }
  0x39   :  { %375 = vmatmul.mubr.bf16.gmra.mxu1 %v212_v45 }
  0x3a   :  { %384 = vmatprep.mubr.bf16.mxu1 %v3779_v1 }
  0x41   :  { %385 = vmatmul.mubr.bf16.gmra.mxu1 %v213_v48 }
  0xe2   :  { %v3252_v55 = vpop.f32.mrf.mxu0 }
  0xe3   :  { %v188_v21 = vadd.f32 %v3252_v55, %v4007_v59 }
  0xe4   :  { %v179_v60 = vpop.f32.mrf.mxu0 }
  0xe5   :  { %v180_v2 = vadd.f32 %v4007_v59, %v179_v60 }
  0xe6   :  { %v3253_v63 = vpop.f32.mrf.mxu0 }
  0xe7   :  { %v191_v22 = vadd.f32 %v3253_v63, %v4007_v59 }
  0xe8   :  { %v182_v4 = vpop.f32.mrf.mxu0 }
  0xe9   :  { %v356_v50 = vpop.f32.mrf.mxu1  ;;  %v183_v8 = vadd.f32 %v4007_v59, %v182_v4  ;;  %v396_v25 = vpack.c.bf16 %v191_v22, %v188_v21 }
  0xea   :  { %v357_v16 = vadd.f32 %v356_v50, %v235_v0  ;;  %v3256_v35 = vpop.f32.mrf.mxu0 }
  0xeb   :  { %v3993_v51 = vpop.f32.mrf.mxu1  ;;  %v4020_v14 = vpack.c.bf16 %v183_v8, %v180_v2  ;;  %v204_v43 = vadd.f32 %v3256_v35, %v4007_v59 }
  0xec   :  { %v195_v36 = vpop.f32.mrf.mxu0  ;;  %v359_v50 = vadd.f32 %v3993_v51, %v4015_v5 }
  0xed   :  { %v360_v53 = vpop.f32.mrf.mxu1  ;;  %3266 = vmatprep.mubr.msk.bf16.mxu0 %vm566_vm0, %v4020_v14  ;;  %v196_v40 = vadd.f32 %v4007_v59, %v195_v36 }
  0xee   :  { %v361_v9 = vadd.f32 %v360_v53, %v235_v0  ;;  %v3257_v38 = vpop.f32.mrf.mxu0 }
  0xef   :  { %v3998_v54 = vpop.f32.mrf.mxu1  ;;  %v207_v44 = vadd.f32 %v3257_v38, %v4007_v59 }
  0xf0   :  { %v399_v19 = vpack.c.bf16 %v361_v9, %v357_v16  ;;  %v198_v39 = vpop.f32.mrf.mxu0  ;;  %v363_v48 = vadd.f32 %v3998_v54, %v4015_v5 }
  0xf1   :  { %v366_v58 = vpop.f32.mrf.mxu1  ;;  %v199_v42 = vadd.f32 %v4007_v59, %v198_v39  ;;  %v398_v46 = vpack.c.bf16 %v207_v44, %v204_v43  ;;  %v506_v43 = vadd.s32 16, %v3996_v52  ;;  %v521_v44 = vand.u32 127, %v232_v49 }
  0xf2   :  { %v367_v6 = vadd.f32 %v366_v58, %v235_v0  ;;  %v580_v47 = vsel %vm566_vm0, %v399_v19, 0  ;;  %v4067_v53 = vpack.c.bf16 %v363_v48, %v359_v50  ;;  %v507_v48 = vadd.s32 24, %v3996_v52 }
  0xf3   :  { %v368_v62 = vpop.f32.mrf.mxu1  ;;  %v397_v45 = vpack.c.bf16 %v199_v42, %v196_v40  ;;  %v505_v50 = vadd.s32 8, %v3996_v52 }
  0xf4   :  { %v369_v11 = vadd.f32 %v368_v62, %v4015_v5 }
  0xf5   :  { %v370_v3 = vpop.f32.mrf.mxu1 }
  0xf6   :  { %v371_v7 = vadd.f32 %v370_v3, %v235_v0 }
  0xf7   :  { %v372_v10 = vpop.f32.mrf.mxu1 }
  0xf8   :  { %v401_v12 = vpack.c.bf16 %v371_v7, %v367_v6  ;;  %v373_v13 = vadd.f32 %v372_v10, %v4015_v5 }
  0xf9   :  { %v376_v15 = vpop.f32.mrf.mxu1 }
  0xfa   :  { %v4022_v17 = vpack.c.bf16 %v373_v13, %v369_v11  ;;  %441 = vrot.lane.b32.xlu1 %v401_v12, %s3780_s3  ;;  %v377_v31 = vadd.f32 %v376_v15, %v235_v0  ;;  %v583_v41 = vsel %vm566_vm0, %v401_v12, 0 }
  0xfb   :  { %v4027_v18 = vpop.f32.mrf.mxu1 }
  0xfc   :  { %v379_v54 = vadd.f32 %v4027_v18, %v4015_v5 }
  0xfd   :  { %v380_v20 = vpop.f32.mrf.mxu1 }
  0xfe   :  { %439 = vrot.lane.b32.xlu1 %v399_v19, %s3780_s3  ;;  %v381_v27 = vadd.f32 %v380_v20, %v235_v0 }
  0xff   :  { %v382_v23 = vpop.f32.mrf.mxu1 }
 0x100   :  { %v403_v33 = vpack.c.bf16 %v381_v27, %v377_v31  ;;  %v383_v55 = vadd.f32 %v382_v23, %v4015_v5 }
 0x101   :  { %v386_v24 = vpop.f32.mrf.mxu1 }
 0x102   :  { %411 = vrot.lane.b32.xlu1 %v4020_v14, %s3780_s3  ;;  %v387_v29 = vadd.f32 %v386_v24, %v235_v0  ;;  %v586_v37 = vsel %vm566_vm0, %v403_v33, 0  ;;  %v4078_v51 = vpack.c.bf16 %v383_v55, %v379_v54  ;;  %v510_v54 = vadd.s32 48, %v3996_v52 }
 0x103   :  { %v388_v26 = vpop.f32.mrf.mxu1 }
 0x104   :  { %v389_v59 = vadd.f32 %v388_v26, %v4015_v5  ;;  %v518_v49 = vcvt.s32.f32 %v510_v54 }
 0x105   :  { %v390_v28 = vpop.f32.mrf.mxu1 }
 0x106   :  { %v391_v30 = vadd.f32 %v390_v28, %v235_v0  ;;  %413 = vrot.lane.b32.xlu1 %v396_v25, %s3780_s3 }
 0x107   :  { %v392_v57 = vpop.f32.mrf.mxu1 }
 0x108   :  { %v405_v32 = vpack.c.bf16 %v391_v30, %v387_v29  ;;  %v393_v58 = vadd.f32 %v392_v57, %v4015_v5 }
 0x10a   :  { %445 = vrot.lane.b32.xlu0 %v405_v32, %s3780_s3  ;;  %3410 = vmatprep.subr.msk.bf16.mxu0 %vm566_vm0, %v405_v32  ;;  %v589_v34 = vsel %vm566_vm0, %v405_v32, 0  ;;  %v4086_v60 = vpack.c.bf16 %v393_v58, %v389_v59  ;;  %v515_v58 = vcvt.s32.f32 %v507_v48  ;;  %v513_v59 = vcvt.s32.f32 %v505_v50 }
 0x10b   :  { %459 = vrot.lane.b32.xlu1 %v403_v33, %s3781_s5  ;;  %3259 = vmatpush3.bf16.xpose.msra.mxu0 %v589_v34 }
 0x10c   :  { %3411 = vmatprep.subr.msk.bf16.mxu0 %vm566_vm0, %v403_v33 }
 0x10e   :  { %443 = vrot.lane.b32.xlu0 %v403_v33, %s3780_s3 }
 0x10f   :  { %457 = vrot.lane.b32.xlu1 %v401_v12, %s3781_s5 }
 0x112   :  { %453 = vrot.lane.b32.xlu0 %v405_v32, %s3782_s4 }
 0x113   :  { %447 = vrot.lane.b32.xlu1 %v399_v19, %s3782_s4  ;;  %3261 = vmatpush3.bf16.xpose.msra.mxu0 %v586_v37 }
 0x114   :  { %3412 = vmatprep.subr.msk.bf16.mxu0 %vm566_vm0, %v401_v12 }
 0x116   :  { %461 = vrot.lane.b32.xlu0 %v405_v32, %s3781_s5 }
 0x117   :  { %455 = vrot.lane.b32.xlu1 %v399_v19, %s3781_s5 }
 0x11a   :  { %451 = vrot.lane.b32.xlu0 %v403_v33, %s3782_s4 }
 0x11b   :  { %421 = vrot.lane.b32.xlu1 %v396_v25, %s3782_s4  ;;  %3263 = vmatpush3.bf16.xpose.msra.mxu0 %v583_v41 }
 0x11c   :  { %3413 = vmatprep.subr.msk.bf16.mxu0 %vm566_vm0, %v399_v19 }
 0x11e   :  { %449 = vrot.lane.b32.xlu0 %v401_v12, %s3782_s4 }
 0x11f   :  { %429 = vrot.lane.b32.xlu1 %v396_v25, %s3781_s5 }
 0x122   :  { %415 = vrot.lane.b32.xlu0 %v397_v45, %s3780_s3 }
 0x123   :  { %425 = vrot.lane.b32.xlu1 %v398_v46, %s3782_s4  ;;  %3265 = vmatpush3.bf16.xpose.msra.mxu0 %v580_v47  ;;  %v512_v47 = vcvt.s32.f32 %v3996_v52 }
 0x126   :  { %417 = vrot.lane.b32.xlu0 %v398_v46, %s3780_s3 }
 0x127   :  { %433 = vrot.lane.b32.xlu1 %v398_v46, %s3781_s5 }
 0x12a   :  { %419 = vrot.lane.b32.xlu0 %v4020_v14, %s3782_s4  ;;  %3267 = vmatmul.mubr.msk.bf16.vlgmr.msra.gmra.mxu0 %vm566_vm0, %v396_v25 }
 0x12b   :  { %467 = vrot.lane.b32.xlu1 %v4067_v53, %s3780_s3  ;;  %3270 = vmatprep.mubr.msk.bf16.mxu0 %vm566_vm0, %v397_v45 }
 0x12e   :  { %427 = vrot.lane.b32.xlu0 %v4020_v14, %s3781_s5 }
 0x12f   :  { %495 = vrot.lane.b32.xlu1 %v4078_v51, %s3781_s5 }
 0x132   :  { %423 = vrot.lane.b32.xlu0 %v397_v45, %s3782_s4  ;;  %3271 = vmatmul.mubr.msk.bf16.gmra.mxu0 %vm566_vm0, %v398_v46  ;;  %v522_v46 = vcvt.s32.f32 %v521_v44 }
 0x133   :  { %473 = vrot.lane.b32.xlu1 %v4086_v60, %s3780_s3 }
 0x134   :  { %v547_v57 = vadd.f32 0.5, %v522_v46 }
 0x136   :  { %431 = vrot.lane.b32.xlu0 %v397_v45, %s3781_s5  ;;  %v514_v45 = vcvt.s32.f32 %v506_v43 }
 0x138   :  { %v525_v55 = vadd.f32 0.5, %v514_v45 }
 0x13a   :  { %471 = vrot.lane.b32.xlu0 %v4078_v51, %s3780_s3 }
 0x13e   :  { %469 = vrot.lane.b32.xlu0 %v4022_v17, %s3780_s3 }
 0x142   :  { %483 = vrot.lane.b32.xlu0 %v4078_v51, %s3782_s4 }
 0x146   :  { %485 = vrot.lane.b32.xlu0 %v4086_v60, %s3782_s4 }
 0x14a   :  { %497 = vrot.lane.b32.xlu0 %v4086_v60, %s3781_s5 }
 0x16c   :  { %v442_v62 = vpop.permute.xlu1 %441 }
 0x16d   :  { %v672_v12 = vsel %vm566_vm0, %v442_v62, 0 }
 0x170   :  { %v440_v63 = vpop.permute.xlu1 %439 }
 0x171   :  { %v669_v19 = vsel %vm566_vm0, %v440_v63, 0 }
 0x174   :  { %v412_v0 = vpop.permute.xlu1 %411 }
 0x175   :  { %3282 = vmatprep.mubr.msk.bf16.mxu1 %vm566_vm0, %v412_v0  ;;  %v511_v0 = vadd.s32 56, %v3996_v52 }
 0x178   :  { %v414_v5 = vpop.permute.xlu1 %413 }
 0x17c   :  { %v446_v2 = vpop.permute.xlu0 %445 }
 0x17d   :  { %3414 = vmatprep.subr.msk.bf16.mxu1 %vm566_vm0, %v446_v2  ;;  %v678_v3 = vsel %vm566_vm0, %v446_v2, 0  ;;  %v460_v9 = vpop.permute.xlu1 %459 }
 0x17e   :  { %3275 = vmatpush3.bf16.xpose.msra.mxu1 %v678_v3  ;;  %v853_v30 = vsel %vm566_vm0, %v460_v9, 0  ;;  %v526_v3 = vadd.f32 0.5, %v515_v58 }
 0x180   :  { %v444_v4 = vpop.permute.xlu0 %443 }
 0x181   :  { %3415 = vmatprep.subr.msk.bf16.mxu1 %vm566_vm0, %v444_v4  ;;  %v675_v7 = vsel %vm566_vm0, %v444_v4, 0  ;;  %v458_v14 = vpop.permute.xlu1 %457  ;;  %v524_v4 = vadd.f32 0.5, %v513_v59 }
 0x182   :  { %v850_v34 = vsel %vm566_vm0, %v458_v14, 0 }
 0x184   :  { %v454_v6 = vpop.permute.xlu0 %453 }
 0x185   :  { %3418 = vmatprep.subr.msk.bf16.mxu0 %vm566_vm0, %v454_v6  ;;  %v767_v8 = vsel %vm566_vm0, %v454_v6, 0  ;;  %v448_v16 = vpop.permute.xlu1 %447 }
 0x186   :  { %3277 = vmatpush3.bf16.xpose.msra.mxu1 %v675_v7  ;;  %3291 = vmatpush3.bf16.xpose.msra.mxu0 %v767_v8  ;;  %v758_v24 = vsel %vm566_vm0, %v448_v16, 0 }
 0x187   :  { %3416 = vmatprep.subr.msk.bf16.mxu1 %vm566_vm0, %v442_v62  ;;  %v533_v62 = vmul.f32 0.125, %v525_v55 }
 0x188   :  { %v462_v10 = vpop.permute.xlu0 %461 }
 0x189   :  { %v456_v22 = vpop.permute.xlu1 %455  ;;  %v856_v25 = vsel %vm566_vm0, %v462_v10, 0  ;;  %v541_v7 = vfloor.f32 %v533_v62 }
 0x18a   :  { %v847_v37 = vsel %vm566_vm0, %v456_v22, 0 }
 0x18c   :  { %v452_v11 = vpop.permute.xlu0 %451 }
 0x18d   :  { %3419 = vmatprep.subr.msk.bf16.mxu0 %vm566_vm0, %v452_v11  ;;  %v764_v13 = vsel %vm566_vm0, %v452_v11, 0  ;;  %v422_v26 = vpop.permute.xlu1 %421 }
 0x18e   :  { %3279 = vmatpush3.bf16.xpose.msra.mxu1 %v672_v12  ;;  %3293 = vmatpush3.bf16.xpose.msra.mxu0 %v764_v13  ;;  %v534_v12 = vmul.f32 0.125, %v526_v3  ;;  %v532_v13 = vmul.f32 0.125, %v524_v4 }
 0x18f   :  { %3417 = vmatprep.subr.msk.bf16.mxu1 %vm566_vm0, %v440_v63  ;;  %v548_v63 = vmul.f32 0.125, %v547_v57 }
 0x190   :  { %v450_v15 = vpop.permute.xlu0 %449 }
 0x191   :  { %3420 = vmatprep.subr.msk.bf16.mxu0 %vm566_vm0, %v450_v15  ;;  %v761_v20 = vsel %vm566_vm0, %v450_v15, 0  ;;  %v430_v29 = vpop.permute.xlu1 %429  ;;  %v549_v8 = vfloor.f32 %v548_v63 }
 0x193   :  { %vm552_vm1 = vcmp.eq.f32.partialorder %v541_v7, %v549_v8 }
 0x194   :  { %v416_v18 = vpop.permute.xlu0 %415 }
 0x195   :  { %v426_v32 = vpop.permute.xlu1 %425 }
 0x196   :  { %3281 = vmatpush3.bf16.xpose.msra.mxu1 %v669_v19  ;;  %3295 = vmatpush3.bf16.xpose.msra.mxu0 %v761_v20  ;;  %v542_v19 = vfloor.f32 %v534_v12  ;;  %v540_v20 = vfloor.f32 %v532_v13 }
 0x197   :  { %3421 = vmatprep.subr.msk.bf16.mxu0 %vm566_vm0, %v448_v16  ;;  %3422 = vmatprep.subr.msk.bf16.mxu1 %vm566_vm0, %v462_v10  ;;  %v519_v10 = vcvt.s32.f32 %v511_v0 }
 0x198   :  { %v418_v21 = vpop.permute.xlu0 %417  ;;  %vm553_vm4 = vcmp.eq.f32.partialorder %v542_v19, %v549_v8  ;;  %vm551_vm5 = vcmp.eq.f32.partialorder %v540_v20, %v549_v8 }
 0x199   :  { %v434_v39 = vpop.permute.xlu1 %433 }
 0x19c   :  { %v420_v23 = vpop.permute.xlu0 %419 }
 0x19d   :  { %3283 = vmatmul.mubr.msk.bf16.vlgmr.msra.gmra.mxu1 %vm566_vm0, %v414_v5  ;;  %3298 = vmatprep.mubr.msk.bf16.mxu0 %vm566_vm0, %v420_v23  ;;  %v4142_v40 = vpop.permute.xlu1 %467  ;;  %v509_v5 = vadd.s32 40, %v3996_v52 }
 0x19e   :  { %3286 = vmatprep.mubr.msk.bf16.mxu1 %vm566_vm0, %v416_v18  ;;  %3297 = vmatpush3.bf16.xpose.msra.mxu0 %v758_v24  ;;  %v530_v18 = vadd.f32 0.5, %v519_v10 }
 0x19f   :  { %3307 = vmatpush3.bf16.xpose.msra.mxu1 %v856_v25 }
 0x1a0   :  { %3423 = vmatprep.subr.msk.bf16.mxu1 %vm566_vm0, %v460_v9  ;;  %v428_v27 = vpop.permute.xlu0 %427  ;;  %v529_v9 = vadd.f32 0.5, %v518_v49 }
 0x1a1   :  { %v4149_v41 = vpop.permute.xlu1 %495 }
 0x1a2   :  { %v537_v16 = vmul.f32 0.125, %v529_v9 }
 0x1a4   :  { %v424_v28 = vpop.permute.xlu0 %423  ;;  %v545_v25 = vfloor.f32 %v537_v16 }
 0x1a5   :  { %3287 = vmatmul.mubr.msk.bf16.gmra.mxu1 %vm566_vm0, %v418_v21  ;;  %3299 = vmatmul.mubr.msk.bf16.vlgmr.msra.gmra.mxu0 %vm566_vm0, %v422_v26  ;;  %v4154_v42 = vpop.permute.xlu1 %473  ;;  %v538_v26 = vmul.f32 0.125, %v530_v18 }
 0x1a6   :  { %3302 = vmatprep.mubr.msk.bf16.mxu0 %vm566_vm0, %v424_v28  ;;  %3314 = vmatprep.mubr.msk.bf16.mxu1 %vm566_vm0, %v428_v27  ;;  %vm556_vm6 = vcmp.eq.f32.partialorder %v545_v25, %v549_v8 }
 0x1a7   :  { %3309 = vmatpush3.bf16.xpose.msra.mxu1 %v853_v30 }
 0x1a8   :  { %3424 = vmatprep.subr.msk.bf16.mxu1 %vm566_vm0, %v458_v14  ;;  %v432_v31 = vpop.permute.xlu0 %431  ;;  %v517_v14 = vcvt.s32.f32 %v509_v5 }
 0x1aa   :  { %v528_v21 = vadd.f32 0.5, %v517_v14 }
 0x1ac   :  { %v4132_v33 = vpop.permute.xlu0 %471  ;;  %v536_v30 = vmul.f32 0.125, %v528_v21 }
 0x1ad   :  { %3303 = vmatmul.mubr.msk.bf16.gmra.mxu0 %vm566_vm0, %v426_v32 }
 0x1ae   :  { %v544_v44 = vfloor.f32 %v536_v30 }
 0x1af   :  { %3311 = vmatpush3.bf16.xpose.msra.mxu1 %v850_v34 }
 0x1b0   :  { %3425 = vmatprep.subr.msk.bf16.mxu1 %vm566_vm0, %v456_v22  ;;  %v4137_v35 = vpop.permute.xlu0 %469  ;;  %v3783_v22 = vmov -1e+30   ;;  %vm555_vm9 = vcmp.eq.f32.partialorder %v544_v44, %v549_v8 }
 0x1b1   :  { %v4167_v23 = vsel %vm552_vm1, 0.0, %v3783_v22  ;;  %v4181_v43 = vsel %vm551_vm5, 0.0, %v3783_v22  ;;  %v4183_v46 = vsel %vm556_vm6, 0.0, %v3783_v22  ;;  %v4204_v63 = vsel %vm555_vm9, 0.0, %v3783_v22 }
 0x1b4   :  { %v484_v36 = vpop.permute.xlu0 %483 }
 0x1b7   :  { %3313 = vmatpush3.bf16.xpose.msra.mxu1 %v847_v37  ;;  %v546_v37 = vfloor.f32 %v538_v26 }
 0x1b8   :  { %3322 = vmatprep.subr.bf16.mxu1 %v4086_v60  ;;  %v486_v38 = vpop.permute.xlu0 %485 }
 0x1b9   :  { %3354 = vmatprep.subr.bf16.mxu0 %v486_v38  ;;  %vm557_vm8 = vcmp.eq.f32.partialorder %v546_v37, %v549_v8 }
 0x1ba   :  { %3355 = vmatpush3.bf16.msra.mxu0 %v486_v38  ;;  %v4179_v38 = vsel %vm553_vm4, 0.0, %v3783_v22  ;;  %v4200_v59 = vsel %vm557_vm8, 0.0, %v3783_v22 }
 0x1bb   :  { %3356 = vmatprep.subr.bf16.mxu0 %v484_v36 }
 0x1be   :  { %3315 = vmatmul.mubr.msk.bf16.vlgmr.msra.gmra.mxu1 %vm566_vm0, %v430_v29  ;;  %3357 = vmatpush3.bf16.msra.mxu0 %v484_v36 }
 0x1bf   :  { %3318 = vmatprep.mubr.msk.bf16.mxu1 %vm566_vm0, %v432_v31  ;;  %3323 = vmatpush3.bf16.msra.mxu1 %v4086_v60  ;;  %v508_v60 = vadd.s32 32, %v3996_v52 }
 0x1c0   :  { %3324 = vmatprep.subr.bf16.mxu1 %v4078_v51 }
 0x1c1   :  { %v516_v6 = vcvt.s32.f32 %v508_v60 }
 0x1c3   :  { %3325 = vmatpush3.bf16.msra.mxu1 %v4078_v51  ;;  %v523_v51 = vadd.f32 0.5, %v512_v47  ;;  %v527_v15 = vadd.f32 0.5, %v516_v6 }
 0x1c4   :  { %3326 = vmatprep.subr.bf16.mxu1 %v4022_v17 }
 0x1c5   :  { %v531_v2 = vmul.f32 0.125, %v523_v51  ;;  %v535_v24 = vmul.f32 0.125, %v527_v15 }
 0x1c6   :  { %3319 = vmatmul.mubr.msk.bf16.gmra.mxu1 %vm566_vm0, %v434_v39 }
 0x1c7   :  { %3327 = vmatpush3.bf16.msra.mxu1 %v4022_v17  ;;  %v539_v11 = vfloor.f32 %v531_v2  ;;  %v543_v32 = vfloor.f32 %v535_v24 }
 0x1c8   :  { %3328 = vmatprep.subr.bf16.mxu1 %v4067_v53 }
 0x1c9   :  { %vm550_vm2 = vcmp.eq.f32.partialorder %v539_v11, %v549_v8  ;;  %vm554_vm7 = vcmp.eq.f32.partialorder %v543_v32, %v549_v8 }
 0x1ca   :  { %v4169_v28 = vsel %vm550_vm2, 0.0, %v3783_v22  ;;  %v4198_v51 = vsel %vm554_vm7, 0.0, %v3783_v22 }
 0x1cb   :  { %3329 = vmatpush3.bf16.msra.mxu1 %v4067_v53 }
 0x1cc   :  { %3338 = vmatprep.subr.bf16.mxu1 %v4154_v42 }
 0x1ea   :  { %v3268_v27 = vpop.f32.mrf.mxu0 }
 0x1eb   :  { %v4172_v29 = vadd.f32 %v3268_v27, %v4167_v23 }
 0x1ec   :  { %v625_v31 = vpop.f32.mrf.mxu0 }
 0x1ed   :  { %v4175_v34 = vadd.f32 %v625_v31, %v4169_v28  ;;  %v930_v36 = vsel %vm923_vm3, %v4172_v29, -inf }
 0x1ee   :  { %931 = vmax.xlane.f32.xlu0 %v930_v36  ;;  %v3269_v39 = vpop.f32.mrf.mxu0 }
 0x1ef   :  { %v4186_v47 = vadd.f32 %v3269_v39, %v4179_v38  ;;  %v924_v50 = vsel %vm923_vm3, %v4175_v34, -inf }
 0x1f0   :  { %v628_v45 = vpop.f32.mrf.mxu0 }
 0x1f1   :  { %v4189_v48 = vadd.f32 %v628_v45, %v4181_v43  ;;  %v933_v60 = vsel %vm923_vm3, %v4186_v47, -inf }
 0x1f2   :  { %v3272_v55 = vpop.f32.mrf.mxu0  ;;  %925 = vmax.xlane.f32.xlu0 %v924_v50 }
 0x1f3   :  { %v4194_v57 = vadd.f32 %v3272_v55, %v4183_v46  ;;  %v927_v54 = vsel %vm923_vm3, %v4189_v48, -inf }
 0x1f4   :  { %v641_v58 = vpop.f32.mrf.mxu0  ;;  %928 = vmax.xlane.f32.xlu1 %v927_v54 }
 0x1f5   :  { %v4207_v49 = vadd.f32 %v641_v58, %v4198_v51  ;;  %v942_v2 = vsel %vm923_vm3, %v4194_v57, -inf }
 0x1f6   :  { %v3273_v62 = vpop.f32.mrf.mxu0  ;;  %934 = vmax.xlane.f32.xlu0 %v933_v60 }
 0x1f7   :  { %v4210_v0 = vadd.f32 %v3273_v62, %v4200_v59  ;;  %v936_v6 = vsel %vm923_vm3, %v4207_v49, -inf }
 0x1f8   :  { %v644_v3 = vpop.f32.mrf.mxu0  ;;  %943 = vmax.xlane.f32.xlu1 %v942_v2 }
 0x1f9   :  { %v4215_v4 = vadd.f32 %v644_v3, %v4204_v63  ;;  %v945_v5 = vsel %vm923_vm3, %v4210_v0, -inf }
 0x1fa   :  { %946 = vmax.xlane.f32.xlu0 %v945_v5 }
 0x1fb   :  { %v939_v7 = vsel %vm923_vm3, %v4215_v4, -inf }
 0x1fc   :  { %937 = vmax.xlane.f32.xlu1 %v936_v6 }
 0x1fe   :  { %940 = vmax.xlane.f32.xlu0 %v939_v7 }
 0x25d   :  { %v3284_v8 = vpop.f32.mrf.mxu1 }
 0x25e   :  { %v4224_v9 = vadd.f32 %v3284_v8, %v4167_v23 }
 0x25f   :  { %v714_v10 = vpop.f32.mrf.mxu1 }
 0x260   :  { %v954_v11 = vsel %vm923_vm3, %v4224_v9, -inf  ;;  %v4237_v20 = vadd.f32 %v714_v10, %v4169_v28 }
 0x261   :  { %v3285_v12 = vpop.f32.mrf.mxu1  ;;  %955 = vmax.xlane.f32.xlu1 %v954_v11 }
 0x262   :  { %v4229_v13 = vadd.f32 %v3285_v12, %v4179_v38  ;;  %v948_v31 = vsel %vm923_vm3, %v4237_v20, -inf }
 0x263   :  { %v717_v15 = vpop.f32.mrf.mxu1 }
 0x264   :  { %v957_v14 = vsel %vm923_vm3, %v4229_v13, -inf  ;;  %v4245_v27 = vadd.f32 %v717_v15, %v4181_v43 }
 0x265   :  { %v3300_v16 = vpop.f32.mrf.mxu0  ;;  %958 = vmax.xlane.f32.xlu0 %v957_v14  ;;  %v3288_v22 = vpop.f32.mrf.mxu1 }
 0x266   :  { %v4234_v18 = vadd.f32 %v3300_v16, %v4167_v23  ;;  %v4255_v39 = vadd.f32 %v3288_v22, %v4183_v46  ;;  %v951_v50 = vsel %vm923_vm3, %v4245_v27, -inf }
 0x267   :  { %v803_v19 = vpop.f32.mrf.mxu0  ;;  %v730_v36 = vpop.f32.mrf.mxu1 }
 0x268   :  { %v978_v21 = vsel %vm923_vm3, %v4234_v18, -inf  ;;  %v4248_v30 = vadd.f32 %v803_v19, %v4169_v28  ;;  %v966_v62 = vsel %vm923_vm3, %v4255_v39, -inf  ;;  %v4275_v5 = vadd.f32 %v730_v36, %v4198_v51 }
 0x269   :  { %v3301_v24 = vpop.f32.mrf.mxu0  ;;  %979 = vmax.xlane.f32.xlu1 %v978_v21  ;;  %v3289_v55 = vpop.f32.mrf.mxu1 }
 0x26a   :  { %v4242_v25 = vadd.f32 %v3301_v24, %v4179_v38  ;;  %v972_v45 = vsel %vm923_vm3, %v4248_v30, -inf  ;;  %v4265_v58 = vadd.f32 %v3289_v55, %v4200_v59  ;;  %v960_v14 = vsel %vm923_vm3, %v4275_v5, -inf }
 0x26b   :  { %v806_v26 = vpop.f32.mrf.mxu0  ;;  %v733_v10 = vpop.f32.mrf.mxu1 }
 0x26c   :  { %v981_v32 = vsel %vm923_vm3, %v4242_v25, -inf  ;;  %v4258_v44 = vadd.f32 %v806_v26, %v4181_v43  ;;  %v969_v8 = vsel %vm923_vm3, %v4265_v58, -inf  ;;  %v4285_v11 = vadd.f32 %v733_v10, %v4204_v63 }
 0x26d   :  { %v3304_v37 = vpop.f32.mrf.mxu0  ;;  %949 = vmax.xlane.f32.xlu1 %v948_v31  ;;  %982 = vmax.xlane.f32.xlu0 %v981_v32 }
 0x26e   :  { %v4268_v60 = vadd.f32 %v3304_v37, %v4183_v46  ;;  %v975_v2 = vsel %vm923_vm3, %v4258_v44, -inf  ;;  %v963_v31 = vsel %vm923_vm3, %v4285_v11, -inf }
 0x26f   :  { %v819_v54 = vpop.f32.mrf.mxu0 }
 0x270   :  { %v990_v7 = vsel %vm923_vm3, %v4268_v60, -inf  ;;  %v4288_v12 = vadd.f32 %v819_v54, %v4198_v51 }
 0x271   :  { %973 = vmax.xlane.f32.xlu1 %v972_v45  ;;  %952 = vmax.xlane.f32.xlu0 %v951_v50  ;;  %v3305_v3 = vpop.f32.mrf.mxu0 }
 0x272   :  { %v4278_v6 = vadd.f32 %v3305_v3, %v4200_v59  ;;  %v984_v26 = vsel %vm923_vm3, %v4288_v12, -inf }
 0x273   :  { %v822_v16 = vpop.f32.mrf.mxu0 }
 0x274   :  { %v993_v15 = vsel %vm923_vm3, %v4278_v6, -inf  ;;  %v4295_v21 = vadd.f32 %v822_v16, %v4204_v63 }
 0x275   :  { %967 = vmax.xlane.f32.xlu1 %v966_v62  ;;  %976 = vmax.xlane.f32.xlu0 %v975_v2 }
 0x276   :  { %v987_v50 = vsel %vm923_vm3, %v4295_v21, -inf }
 0x279   :  { %991 = vmax.xlane.f32.xlu1 %v990_v7  ;;  %970 = vmax.xlane.f32.xlu0 %v969_v8  ;;  %v4333_v8 = vpop.permute.xlu0 %497 }
 0x27d   :  { %961 = vmax.xlane.f32.xlu1 %v960_v14  ;;  %994 = vmax.xlane.f32.xlu0 %v993_v15  ;;  %v932_v10 = vpop.xlane.xlu0 %931  ;;  %v929_v14 = vpop.xlane.xlu1 %928 }
 0x27e   :  { %v3316_v19 = vpop.f32.mrf.mxu1  ;;  %v1022_v15 = vsub.f32 %v4172_v29, %v932_v10 }
 0x27f   :  { %v4298_v22 = vadd.f32 %v3316_v19, %v4167_v23 }
 0x280   :  { %v892_v24 = vpop.f32.mrf.mxu1 }
 0x281   :  { %985 = vmax.xlane.f32.xlu1 %v984_v26  ;;  %964 = vmax.xlane.f32.xlu0 %v963_v31  ;;  %v4305_v36 = vadd.f32 %v892_v24, %v4169_v28  ;;  %v1002_v23 = vsel %vm923_vm3, %v4298_v22, -inf  ;;  %v944_v24 = vpop.xlane.xlu1 %943  ;;  %v1056_v26 = vmul.f32 1.442695, %v1022_v15 }
 0x282   :  { %v3317_v32 = vpop.f32.mrf.mxu1 }
 0x283   :  { %v4308_v37 = vadd.f32 %v3317_v32, %v4179_v38  ;;  %v996_v28 = vsel %vm923_vm3, %v4305_v36, -inf  ;;  %3611 = vpow2.f32 %v1056_v26 }
 0x284   :  { %v895_v45 = vpop.f32.mrf.mxu1 }
 0x285   :  { %1003 = vmax.xlane.f32.xlu1 %v1002_v23  ;;  %988 = vmax.xlane.f32.xlu0 %v987_v50  ;;  %v4315_v54 = vadd.f32 %v895_v45, %v4181_v43  ;;  %v1005_v38 = vsel %vm923_vm3, %v4308_v37, -inf  ;;  %v1021_v45 = vsub.f32 %v4189_v48, %v929_v14 }
 0x286   :  { %v3320_v55 = vpop.f32.mrf.mxu1 }
 0x287   :  { %v4318_v62 = vadd.f32 %v3320_v55, %v4183_v46  ;;  %v999_v43 = vsel %vm923_vm3, %v4315_v54, -inf  ;;  %v1026_v55 = vsub.f32 %v4194_v57, %v944_v24 }
 0x288   :  { %v908_v2 = vpop.f32.mrf.mxu1 }
 0x289   :  { %997 = vmax.xlane.f32.xlu1 %v996_v28  ;;  %1006 = vmax.xlane.f32.xlu0 %v1005_v38  ;;  %v4325_v3 = vadd.f32 %v908_v2, %v4198_v51  ;;  %v1014_v7 = vsel %vm923_vm3, %v4318_v62, -inf  ;;  %v926_v51 = vpop.xlane.xlu0 %925  ;;  %v1054_v28 = vmul.f32 1.442695, %v1021_v45  ;;  %v1064_v38 = vmul.f32 1.442695, %v1026_v55 }
 0x28a   :  { %v1020_v19 = vsub.f32 %v4175_v34, %v926_v51 }
 0x28b   :  { %v1008_v46 = vsel %vm923_vm3, %v4325_v3, -inf }
 0x28c   :  { %v1052_v32 = vmul.f32 1.442695, %v1020_v19 }
 0x28d   :  { %1015 = vmax.xlane.f32.xlu1 %v1014_v7  ;;  %1000 = vmax.xlane.f32.xlu0 %v999_v43  ;;  %v935_v16 = vpop.xlane.xlu0 %934  ;;  %v3321_v7 = vpop.f32.mrf.mxu1 }
 0x28e   :  { %v1023_v31 = vsub.f32 %v4186_v47, %v935_v16  ;;  %3613 = vpow2.f32 %v1052_v32 }
 0x28f   :  { %v911_v57 = vpop.f32.mrf.mxu1 }
 0x290   :  { %v1058_v50 = vmul.f32 1.442695, %v1023_v31  ;;  %v4355_v51 = vpop.eup %3611 }
 0x291   :  { %1009 = vmax.xlane.f32.xlu1 %v1008_v46  ;;  %v947_v23 = vpop.xlane.xlu0 %946  ;;  %v4348_v46 = vadd.f32 %v3321_v7, %v4200_v59  ;;  %v1122_v59 = vsel %vm923_vm3, %v4355_v51, 0.0 }
 0x292   :  { %v1027_v29 = vsub.f32 %v4210_v0, %v947_v23  ;;  %3615 = vpow2.f32 %v1058_v50  ;;  %v4351_v0 = vadd.f32 %v911_v57, %v4204_v63 }
 0x293   :  { %3617 = vpow2.f32 %v1054_v28 }
 0x294   :  { %v1066_v47 = vmul.f32 1.442695, %v1027_v29  ;;  %3619 = vpow2.f32 %v1064_v38 }
 0x295   :  { %v941_v2 = vpop.xlane.xlu0 %940 }
 0x296   :  { %v1025_v43 = vsub.f32 %v4215_v4, %v941_v2  ;;  %3621 = vpow2.f32 %v1066_v47  ;;  %v1011_v4 = vsel %vm923_vm3, %v4351_v0, -inf }
 0x298   :  { %v1062_v10 = vmul.f32 1.442695, %v1025_v43 }
 0x29b   :  { %v4357_v14 = vpop.eup %3613 }
 0x29c   :  { %v1116_v16 = vsel %vm923_vm3, %v4357_v14, 0.0 }
 0x29f   :  { %v4363_v15 = vpop.eup %3615 }
 0x2a0   :  { %v4365_v63 = vpop.eup %3617  ;;  %v1125_v19 = vsel %vm923_vm3, %v4363_v15, 0.0 }
 0x2a1   :  { %v4371_v24 = vpop.eup %3619  ;;  %v1119_v32 = vsel %vm923_vm3, %v4365_v63, 0.0 }
 0x2a2   :  { %481 = vrot.lane.b32.xlu1 %v4022_v17, %s3782_s4  ;;  %v1134_v31 = vsel %vm923_vm3, %v4371_v24, 0.0 }
 0x2a3   :  { %493 = vrot.lane.b32.xlu0 %v4022_v17, %s3781_s5  ;;  %v938_v17 = vpop.xlane.xlu1 %937  ;;  %v4373_v26 = vpop.eup %3621 }
 0x2a4   :  { %v1024_v34 = vsub.f32 %v4207_v49, %v938_v17  ;;  %v1017_v49 = vsel %vm923_vm3, %v4348_v46, -inf  ;;  %v1137_v50 = vsel %vm923_vm3, %v4373_v26, 0.0 }
 0x2a6   :  { %v1060_v48 = vmul.f32 1.442695, %v1024_v34 }
 0x2a8   :  { %3623 = vpow2.f32 %v1060_v48 }
 0x2a9   :  { %3625 = vpow2.f32 %v1062_v10 }
 0x2b5   :  { %v4379_v45 = vpop.eup %3623 }
 0x2b6   :  { %v1128_v23 = vsel %vm923_vm3, %v4379_v45, 0.0  ;;  %v4385_v55 = vpop.eup %3625 }
 0x2b7   :  { %v1131_v17 = vsel %vm923_vm3, %v4385_v55, 0.0 }
 0x2c2   :  { %1018 = vmax.xlane.f32.xlu0 %v1017_v49 }
 0x2c6   :  { %1123 = vadd.xlane.f32.xlu1 %v1122_v59  ;;  %1012 = vmax.xlane.f32.xlu0 %v1011_v4 }
 0x2ca   :  { %1117 = vadd.xlane.f32.xlu1 %v1116_v16  ;;  %1126 = vadd.xlane.f32.xlu0 %v1125_v19 }
 0x2ce   :  { %1135 = vadd.xlane.f32.xlu1 %v1134_v31  ;;  %1120 = vadd.xlane.f32.xlu0 %v1119_v32 }
 0x2d2   :  { %1129 = vadd.xlane.f32.xlu1 %v1128_v23  ;;  %1138 = vadd.xlane.f32.xlu0 %v1137_v50 }
 0x2d6   :  { %1132 = vadd.xlane.f32.xlu0 %v1131_v17 }
 0x2ea   :  { %v956_v28 = vpop.xlane.xlu1 %955 }
 0x2eb   :  { %v1030_v29 = vsub.f32 %v4224_v9, %v956_v28 }
 0x2ed   :  { %v1072_v38 = vmul.f32 1.442695, %v1030_v29 }
 0x2ee   :  { %v959_v34 = vpop.xlane.xlu0 %958 }
 0x2ef   :  { %3627 = vpow2.f32 %v1072_v38  ;;  %v1031_v10 = vsub.f32 %v4229_v13, %v959_v34 }
 0x2f1   :  { %v1074_v19 = vmul.f32 1.442695, %v1031_v10 }
 0x2f2   :  { %v980_v2 = vpop.xlane.xlu1 %979 }
 0x2f3   :  { %v1038_v7 = vsub.f32 %v4234_v18, %v980_v2 }
 0x2f5   :  { %v1088_v47 = vmul.f32 1.442695, %v1038_v7 }
 0x2f6   :  { %v950_v48 = vpop.xlane.xlu1 %949  ;;  %v983_v43 = vpop.xlane.xlu0 %982 }
 0x2f7   :  { %3629 = vpow2.f32 %v1088_v47  ;;  %v1028_v57 = vsub.f32 %v4237_v20, %v950_v48  ;;  %v1039_v31 = vsub.f32 %v4242_v25, %v983_v43 }
 0x2f9   :  { %v1068_v49 = vmul.f32 1.442695, %v1028_v57  ;;  %v1090_v17 = vmul.f32 1.442695, %v1039_v31 }
 0x2fa   :  { %v974_v59 = vpop.xlane.xlu1 %973  ;;  %v953_v4 = vpop.xlane.xlu0 %952 }
 0x2fb   :  { %3631 = vpow2.f32 %v1068_v49  ;;  %v1036_v9 = vsub.f32 %v4248_v30, %v974_v59  ;;  %v1029_v50 = vsub.f32 %v4245_v27, %v953_v4 }
 0x2fc   :  { %v4394_v16 = vpop.eup %3627 }
 0x2fd   :  { %v1084_v18 = vmul.f32 1.442695, %v1036_v9  ;;  %v1146_v32 = vsel %vm923_vm3, %v4394_v16, 0.0  ;;  %v1070_v25 = vmul.f32 1.442695, %v1029_v50 }
 0x2fe   :  { %v968_v23 = vpop.xlane.xlu1 %967  ;;  %1147 = vadd.xlane.f32.xlu1 %v1146_v32  ;;  %v977_v20 = vpop.xlane.xlu0 %976 }
 0x2ff   :  { %3633 = vpow2.f32 %v1084_v18  ;;  %v1034_v13 = vsub.f32 %v4255_v39, %v968_v23  ;;  %v1037_v34 = vsub.f32 %v4258_v44, %v977_v20 }
 0x300   :  { %3635 = vpow2.f32 %v1074_v19 }
 0x301   :  { %v1080_v30 = vmul.f32 1.442695, %v1034_v13  ;;  %v1086_v48 = vmul.f32 1.442695, %v1037_v34 }
 0x302   :  { %v992_v28 = vpop.xlane.xlu1 %991  ;;  %v971_v29 = vpop.xlane.xlu0 %970 }
 0x303   :  { %3637 = vpow2.f32 %v1080_v30  ;;  %v1042_v43 = vsub.f32 %v4268_v60, %v992_v28  ;;  %v1035_v23 = vsub.f32 %v4265_v58, %v971_v29 }
 0x304   :  { %v4401_v38 = vpop.eup %3629  ;;  %3639 = vpow2.f32 %v1090_v17 }
 0x305   :  { %v1170_v2 = vsel %vm923_vm3, %v4401_v38, 0.0  ;;  %3641 = vpow2.f32 %v1070_v25  ;;  %v1082_v28 = vmul.f32 1.442695, %v1035_v23 }
 0x306   :  { %v962_v7 = vpop.xlane.xlu1 %961  ;;  %1171 = vadd.xlane.f32.xlu0 %v1170_v2  ;;  %v995_v39 = vpop.xlane.xlu0 %994 }
 0x307   :  { %v1032_v47 = vsub.f32 %v4275_v5, %v962_v7  ;;  %v1096_v5 = vmul.f32 1.442695, %v1042_v43  ;;  %v1043_v58 = vsub.f32 %v4278_v6, %v995_v39 }
 0x308   :  { %v4407_v27 = vpop.eup %3631 }
 0x309   :  { %v1076_v57 = vmul.f32 1.442695, %v1032_v47  ;;  %v1140_v10 = vsel %vm923_vm3, %v4407_v27, 0.0  ;;  %v1098_v47 = vmul.f32 1.442695, %v1043_v58 }
 0x30a   :  { %v986_v49 = vpop.xlane.xlu1 %985  ;;  %1141 = vadd.xlane.f32.xlu1 %v1140_v10  ;;  %v965_v44 = vpop.xlane.xlu0 %964 }
 0x30b   :  { %3643 = vpow2.f32 %v1076_v57  ;;  %v1040_v9 = vsub.f32 %v4288_v12, %v986_v49 }
 0x30c   :  { %v4412_v59 = vpop.eup %3633  ;;  %3645 = vpow2.f32 %v1086_v48 }
 0x30d   :  { %v4414_v4 = vpop.eup %3635  ;;  %v1164_v19 = vsel %vm923_vm3, %v4412_v59, 0.0  ;;  %3647 = vpow2.f32 %v1096_v5  ;;  %v1092_v13 = vmul.f32 1.442695, %v1040_v9 }
 0x30e   :  { %v1004_v60 = vpop.xlane.xlu1 %1003  ;;  %1165 = vadd.xlane.f32.xlu0 %v1164_v19  ;;  %v989_v31 = vpop.xlane.xlu0 %988  ;;  %v1149_v20 = vsel %vm923_vm3, %v4414_v4, 0.0 }
 0x30f   :  { %v1041_v18 = vsub.f32 %v4295_v21, %v989_v31  ;;  %v1046_v57 = vsub.f32 %v4298_v22, %v1004_v60 }
 0x310   :  { %v4420_v32 = vpop.eup %3637 }
 0x311   :  { %v1094_v50 = vmul.f32 1.442695, %v1041_v18  ;;  %v1158_v12 = vsel %vm923_vm3, %v4420_v32, 0.0  ;;  %v4427_v17 = vpop.eup %3639  ;;  %v1104_v9 = vmul.f32 1.442695, %v1046_v57 }
 0x312   :  { %v998_v30 = vpop.xlane.xlu1 %997  ;;  %1159 = vadd.xlane.f32.xlu1 %v1158_v12  ;;  %1150 = vadd.xlane.f32.xlu0 %v1149_v20  ;;  %v4430_v25 = vpop.eup %3641  ;;  %v1173_v34 = vsel %vm923_vm3, %v4427_v17, 0.0 }
 0x313   :  { %v1044_v21 = vsub.f32 %v4305_v36, %v998_v30  ;;  %3649 = vpow2.f32 %v1094_v50  ;;  %v1033_v36 = vsub.f32 %v4285_v11, %v965_v44  ;;  %v1143_v6 = vsel %vm923_vm3, %v4430_v25, 0.0  ;;  %v1007_v10 = vpop.xlane.xlu0 %1006 }
 0x314   :  { %3651 = vpow2.f32 %v1092_v13  ;;  %v1047_v31 = vsub.f32 %v4308_v37, %v1007_v10 }
 0x315   :  { %v1100_v29 = vmul.f32 1.442695, %v1044_v21  ;;  %v1078_v49 = vmul.f32 1.442695, %v1033_v36 }
 0x316   :  { %v1016_v2 = vpop.xlane.xlu1 %1015  ;;  %1174 = vadd.xlane.f32.xlu0 %v1173_v34  ;;  %v1106_v50 = vmul.f32 1.442695, %v1047_v31 }
 0x317   :  { %3653 = vpow2.f32 %v1100_v29  ;;  %v1001_v18 = vpop.xlane.xlu0 %1000  ;;  %v1050_v21 = vsub.f32 %v4318_v62, %v1016_v2 }
 0x318   :  { %v4435_v7 = vpop.eup %3643  ;;  %3655 = vpow2.f32 %v1082_v28  ;;  %v1045_v12 = vsub.f32 %v4315_v54, %v1001_v18 }
 0x319   :  { %v1152_v48 = vsel %vm923_vm3, %v4435_v7, 0.0  ;;  %v4442_v39 = vpop.eup %3645  ;;  %3657 = vpow2.f32 %v1098_v47  ;;  %v1112_v34 = vmul.f32 1.442695, %v1050_v21 }
 0x31a   :  { %v1010_v43 = vpop.xlane.xlu1 %1009  ;;  %1153 = vadd.xlane.f32.xlu1 %v1152_v48  ;;  %1144 = vadd.xlane.f32.xlu0 %v1143_v6  ;;  %v1167_v5 = vsel %vm923_vm3, %v4442_v39, 0.0  ;;  %v4447_v11 = vpop.eup %3647  ;;  %3659 = vpow2.f32 %v1078_v49  ;;  %v1102_v28 = vmul.f32 1.442695, %v1045_v12 }
 0x31b   :  { %v1182_v22 = vsel %vm923_vm3, %v4447_v11, 0.0  ;;  %3661 = vpow2.f32 %v1104_v9  ;;  %v1048_v54 = vsub.f32 %v4325_v3, %v1010_v43  ;;  %v4499_v31 = vpop.permute.xlu0 %493 }
 0x31c   :  { %3663 = vpow2.f32 %v1106_v50 }
 0x31d   :  { %3665 = vpow2.f32 %v1102_v28  ;;  %v1108_v62 = vmul.f32 1.442695, %v1048_v54 }
 0x31e   :  { %v482_v44 = vpop.permute.xlu1 %481  ;;  %1168 = vadd.xlane.f32.xlu0 %v1167_v5  ;;  %3667 = vpow2.f32 %v1112_v34 }
 0x31f   :  { %3358 = vmatprep.subr.bf16.mxu0 %v482_v44  ;;  %3669 = vpow2.f32 %v1108_v62 }
 0x320   :  { %3359 = vmatpush3.bf16.msra.mxu0 %v482_v44  ;;  %v4449_v19 = vpop.eup %3649 }
 0x321   :  { %v4454_v60 = vpop.eup %3651  ;;  %v1179_v23 = vsel %vm923_vm3, %v4449_v19, 0.0 }
 0x322   :  { %1183 = vadd.xlane.f32.xlu0 %v1182_v22  ;;  %1180 = vadd.xlane.f32.xlu1 %v1179_v23  ;;  %v1176_v37 = vsel %vm923_vm3, %v4454_v60, 0.0 }
 0x324   :  { %v4458_v20 = vpop.eup %3653 }
 0x325   :  { %v4460_v13 = vpop.eup %3655  ;;  %v1188_v30 = vsel %vm923_vm3, %v4458_v20, 0.0 }
 0x326   :  { %1177 = vadd.xlane.f32.xlu0 %v1176_v37  ;;  %1189 = vadd.xlane.f32.xlu1 %v1188_v30  ;;  %v1161_v58 = vsel %vm923_vm3, %v4460_v13, 0.0  ;;  %v4470_v29 = vpop.eup %3657 }
 0x327   :  { %v1185_v47 = vsel %vm923_vm3, %v4470_v29, 0.0  ;;  %v4475_v36 = vpop.eup %3659 }
 0x328   :  { %v4477_v48 = vpop.eup %3661  ;;  %v1155_v2 = vsel %vm923_vm3, %v4475_v36, 0.0 }
 0x329   :  { %v1194_v6 = vsel %vm923_vm3, %v4477_v48, 0.0  ;;  %v4483_v57 = vpop.eup %3663 }
 0x32a   :  { %1162 = vadd.xlane.f32.xlu0 %v1161_v58  ;;  %v1197_v3 = vsel %vm923_vm3, %v4483_v57, 0.0  ;;  %v4487_v43 = vpop.eup %3665 }
 0x32b   :  { %v1191_v10 = vsel %vm923_vm3, %v4487_v43, 0.0  ;;  %v4491_v49 = vpop.eup %3667 }
 0x32c   :  { %v1206_v5 = vsel %vm923_vm3, %v4491_v49, 0.0  ;;  %v4495_v44 = vpop.eup %3669 }
 0x32d   :  { %v1200_v9 = vsel %vm923_vm3, %v4495_v44, 0.0 }
 0x32e   :  { %1186 = vadd.xlane.f32.xlu0 %v1185_v47 }
 0x332   :  { %1156 = vadd.xlane.f32.xlu0 %v1155_v2 }
 0x336   :  { %1195 = vadd.xlane.f32.xlu0 %v1194_v6 }
 0x33a   :  { %1198 = vadd.xlane.f32.xlu0 %v1197_v3 }
 0x33e   :  { %1192 = vadd.xlane.f32.xlu0 %v1191_v10 }
 0x342   :  { %1207 = vadd.xlane.f32.xlu0 %v1206_v5 }
 0x346   :  { %1201 = vadd.xlane.f32.xlu0 %v1200_v9 }
 0x34b   :  { %v1019_v22 = vpop.xlane.xlu0 %1018 }
 0x34c   :  { %v1051_v18 = vsub.f32 %v4348_v46, %v1019_v22 }
 0x34e   :  { %v1114_v23 = vmul.f32 1.442695, %v1051_v18 }
 0x34f   :  { %v1124_v50 = vpop.xlane.xlu1 %1123  ;;  %v1013_v12 = vpop.xlane.xlu0 %1012 }
 0x350   :  { %3671 = vpow2.f32 %v1114_v23  ;;  %v1049_v37 = vsub.f32 %v4351_v0, %v1013_v12 }
 0x352   :  { %v1110_v30 = vmul.f32 1.442695, %v1049_v37 }
 0x353   :  { %v1118_v21 = vpop.xlane.xlu1 %1117  ;;  %v1127_v28 = vpop.xlane.xlu0 %1126 }
 0x354   :  { %3673 = vpow2.f32 %v1110_v30 }
 0x355   :  { %3675 = vrcp.f32 %v1127_v28 }
 0x356   :  { %3677 = vrcp.f32 %v1118_v21 }
 0x357   :  { %v1136_v58 = vpop.xlane.xlu1 %1135  ;;  %v1121_v34 = vpop.xlane.xlu0 %1120  ;;  %3679 = vrcp.f32 %v1124_v50 }
 0x358   :  { %3681 = vrcp.f32 %v1121_v34 }
 0x35b   :  { %v1130_v54 = vpop.xlane.xlu1 %1129  ;;  %v1139_v47 = vpop.xlane.xlu0 %1138 }
 0x35c   :  { %491 = vrot.lane.b32.xlu0 %v4067_v53, %s3781_s5  ;;  %3683 = vrcp.f32 %v1130_v54 }
 0x35d   :  { %v4505_v46 = vpop.eup %3671  ;;  %3685 = vrcp.f32 %v1139_v47 }
 0x35e   :  { %v1209_v0 = vsel %vm923_vm3, %v4505_v46, 0.0  ;;  %3687 = vrcp.f32 %v1136_v58 }
 0x35f   :  { %1210 = vadd.xlane.f32.xlu1 %v1209_v0  ;;  %v1133_v62 = vpop.xlane.xlu0 %1132 }
 0x360   :  { %3689 = vrcp.f32 %v1133_v62 }
 0x361   :  { %v4509_v2 = vpop.eup %3673 }
 0x362   :  { %v1203_v6 = vsel %vm923_vm3, %v4509_v2, 0.0  ;;  %v3676_v3 = vpop.eup %3675 }
 0x363   :  { %1204 = vadd.xlane.f32.xlu1 %v1203_v6  ;;  %v3678_v10 = vpop.eup %3677  ;;  %v1247_v22 = vmul.f32 %v3676_v3, %v4363_v15 }
 0x364   :  { %v3680_v5 = vpop.eup %3679  ;;  %v1244_v18 = vmul.f32 %v3678_v10, %v4357_v14 }
 0x365   :  { %v3682_v9 = vpop.eup %3681  ;;  %v1246_v50 = vmul.f32 %v3680_v5, %v4355_v51 }
 0x366   :  { %v1245_v23 = vmul.f32 %v3682_v9, %v4365_v63 }
 0x367   :  { %v1277_v30 = vpack.c.bf16 %v1247_v22, %v1246_v50 }
 0x368   :  { %v1276_v12 = vpack.c.bf16 %v1245_v23, %v1244_v18 }
 0x369   :  { %v3684_v37 = vpop.eup %3683 }
 0x36a   :  { %v3686_v21 = vpop.eup %3685  ;;  %3330 = vmatprep.mubr.msk.bf16.mxu1 %vm923_vm3, %v1276_v12  ;;  %v1248_v14 = vmul.f32 %v3684_v37, %v4379_v45 }
 0x36b   :  { %v3688_v28 = vpop.eup %3687  ;;  %3331 = vmatmul.mubr.msk.bf16.vlgmr.msra.gmra.mxu1 %vm923_vm3, %v1277_v30  ;;  %v1251_v51 = vmul.f32 %v3686_v21, %v4373_v26 }
 0x36c   :  { %3339 = vmatpush3.bf16.msra.mxu1 %v4154_v42  ;;  %v1250_v34 = vmul.f32 %v3688_v28, %v4371_v24 }
 0x36d   :  { %v3690_v58 = vpop.eup %3689  ;;  %3340 = vmatprep.subr.bf16.mxu1 %v4132_v33 }
 0x36e   :  { %v1249_v15 = vmul.f32 %v3690_v58, %v4385_v55  ;;  %v1279_v54 = vpack.c.bf16 %v1251_v51, %v1250_v34 }
 0x370   :  { %v1278_v63 = vpack.c.bf16 %v1249_v15, %v1248_v14  ;;  %3341 = vmatpush3.bf16.msra.mxu1 %v4132_v33 }
 0x371   :  { %3342 = vmatprep.subr.bf16.mxu1 %v4137_v35 }
 0x372   :  { %3334 = vmatprep.mubr.msk.bf16.mxu1 %vm923_vm3, %v1278_v63 }
 0x373   :  { %3335 = vmatmul.mubr.msk.bf16.gmra.mxu1 %vm923_vm3, %v1279_v54 }
 0x374   :  { %479 = vrot.lane.b32.xlu1 %v4067_v53, %s3782_s4  ;;  %3343 = vmatpush3.bf16.msra.mxu1 %v4137_v35 }
 0x375   :  { %3344 = vmatprep.subr.bf16.mxu1 %v4142_v40 }
 0x378   :  { %3345 = vmatpush3.bf16.msra.mxu1 %v4142_v40 }
 0x379   :  { %3370 = vmatprep.subr.bf16.mxu1 %v4333_v8 }
 0x387   :  { %v1148_v26 = vpop.xlane.xlu1 %1147 }
 0x38f   :  { %v1172_v42 = vpop.xlane.xlu0 %1171 }
 0x390   :  { %3691 = vrcp.f32 %v1172_v42 }
 0x393   :  { %v1142_v55 = vpop.xlane.xlu1 %1141 }
 0x397   :  { %v1166_v33 = vpop.xlane.xlu0 %1165 }
 0x39b   :  { %v1151_v24 = vpop.xlane.xlu0 %1150  ;;  %v1160_v12 = vpop.xlane.xlu1 %1159 }
 0x39d   :  { %v3692_v35 = vpop.eup %3691 }
 0x39e   :  { %v4538_v62 = vmul.f32 %v3692_v35, %v4401_v38 }
 0x39f   :  { %v1175_v45 = vpop.xlane.xlu0 %1174 }
 0x3a0   :  { %3693 = vrcp.f32 %v1175_v45 }
 0x3a1   :  { %3695 = vrcp.f32 %v1151_v24 }
 0x3a2   :  { %3697 = vrcp.f32 %v1142_v55 }
 0x3a3   :  { %v1145_v47 = vpop.xlane.xlu0 %1144  ;;  %3699 = vrcp.f32 %v1148_v26  ;;  %v1154_v51 = vpop.xlane.xlu1 %1153 }
 0x3a4   :  { %3701 = vrcp.f32 %v1145_v47 }
 0x3a5   :  { %3703 = vrcp.f32 %v1166_v33 }
 0x3a7   :  { %v1169_v53 = vpop.xlane.xlu0 %1168 }
 0x3a8   :  { %3705 = vrcp.f32 %v1169_v53 }
 0x3ab   :  { %v4535_v40 = vpop.xlane.xlu0 %1183 }
 0x3ad   :  { %v3694_v0 = vpop.eup %3693 }
 0x3ae   :  { %v4541_v6 = vmul.f32 %v3694_v0, %v4427_v17  ;;  %v3696_v3 = vpop.eup %3695 }
 0x3af   :  { %v4543_v10 = vpop.xlane.xlu0 %1177  ;;  %v3698_v5 = vpop.eup %3697  ;;  %v1255_v23 = vmul.f32 %v3696_v3, %v4414_v4 }
 0x3b0   :  { %v1285_v9 = vpack.c.bf16 %v4541_v6, %v4538_v62  ;;  %v3700_v22 = vpop.eup %3699  ;;  %v1252_v38 = vmul.f32 %v3698_v5, %v4407_v27  ;;  %v1181_v27 = vpop.xlane.xlu1 %1180 }
 0x3b1   :  { %v3702_v18 = vpop.eup %3701  ;;  %v1254_v17 = vmul.f32 %v3700_v22, %v4394_v16 }
 0x3b2   :  { %v3704_v50 = vpop.eup %3703  ;;  %v1253_v30 = vmul.f32 %v3702_v18, %v4430_v25 }
 0x3b3   :  { %v1163_v37 = vpop.xlane.xlu0 %1162  ;;  %v1281_v58 = vpack.c.bf16 %v1255_v23, %v1254_v17  ;;  %v1260_v14 = vmul.f32 %v3704_v50, %v4412_v59 }
 0x3b4   :  { %v1280_v28 = vpack.c.bf16 %v1253_v30, %v1252_v38  ;;  %3707 = vrcp.f32 %v1163_v37  ;;  %v1190_v25 = vpop.xlane.xlu1 %1189 }
 0x3b5   :  { %v3706_v21 = vpop.eup %3705  ;;  %3709 = vrcp.f32 %v1154_v51 }
 0x3b6   :  { %v1261_v15 = vmul.f32 %v3706_v21, %v4442_v39  ;;  %3346 = vmatprep.mubr.msk.bf16.mxu1 %vm923_vm3, %v1280_v28  ;;  %3711 = vrcp.f32 %v1160_v12 }
 0x3b7   :  { %v1187_v4 = vpop.xlane.xlu0 %1186  ;;  %3347 = vmatmul.mubr.msk.bf16.vlgmr.msra.gmra.mxu1 %vm923_vm3, %v1281_v58 }
 0x3b8   :  { %v1284_v63 = vpack.c.bf16 %v1261_v15, %v1260_v14  ;;  %3371 = vmatpush3.bf16.msra.mxu1 %v4333_v8 }
 0x3b9   :  { %3372 = vmatprep.subr.bf16.mxu1 %v4149_v41 }
 0x3ba   :  { %3362 = vmatprep.mubr.msk.bf16.mxu0 %vm923_vm3, %v1284_v63 }
 0x3bb   :  { %v1157_v16 = vpop.xlane.xlu0 %1156 }
 0x3bc   :  { %3713 = vrcp.f32 %v1157_v16  ;;  %3373 = vmatpush3.bf16.msra.mxu1 %v4149_v41  ;;  %v3523_v16 = vld [vmem:[%s5137_s6 + $0x38] sm:$0xff]  }
 0x3bd   :  { %3374 = vmatprep.subr.bf16.mxu1 %v4499_v31 }
 0x3bf   :  { %v1196_v59 = vpop.xlane.xlu0 %1195 }
 0x3c0   :  { %3375 = vmatpush3.bf16.msra.mxu1 %v4499_v31 }
 0x3c1   :  { %v3708_v8 = vpop.eup %3707 }
 0x3c2   :  { %v3710_v34 = vpop.eup %3709  ;;  %v1259_v24 = vmul.f32 %v3708_v8, %v4460_v13 }
 0x3c3   :  { %v1199_v39 = vpop.xlane.xlu0 %1198  ;;  %v3712_v42 = vpop.eup %3711  ;;  %v1256_v41 = vmul.f32 %v3710_v34, %v4435_v7 }
 0x3c4   :  { %3715 = vrcp.f32 %v1199_v39  ;;  %v1258_v31 = vmul.f32 %v3712_v42, %v4420_v32  ;;  %v3525_v39 = vld [vmem:[%s5137_s6 + $0x28] sm:$0xff]  }
 0x3c5   :  { %3717 = vrcp.f32 %v1190_v25 }
 0x3c6   :  { %3719 = vrcp.f32 %v1196_v59  ;;  %v1283_v47 = vpack.c.bf16 %v1259_v24, %v1258_v31  ;;  %v3524_v59 = vld [vmem:[%s5137_s6 + $0x30] sm:$0xff]   ;;  %v3527_v24 = vld [vmem:[%s5137_s6 + $0x18] sm:$0xff]  }
 0x3c7   :  { %v1193_v54 = vpop.xlane.xlu0 %1192 }
 0x3c8   :  { %3721 = vrcp.f32 %v1193_v54 }
 0x3c9   :  { %v3714_v33 = vpop.eup %3713  ;;  %3723 = vrcp.f32 %v4543_v10 }
 0x3ca   :  { %v1257_v26 = vmul.f32 %v3714_v33, %v4475_v36  ;;  %3725 = vrcp.f32 %v1181_v27  ;;  %v3526_v33 = vld [vmem:[%s5137_s6 + $0x20] sm:$0xff]  }
 0x3cb   :  { %v1208_v45 = vpop.xlane.xlu0 %1207  ;;  %3727 = vrcp.f32 %v1187_v4 }
 0x3cc   :  { %v1282_v55 = vpack.c.bf16 %v1257_v26, %v1256_v41  ;;  %3729 = vrcp.f32 %v4535_v40 }
 0x3ce   :  { %3350 = vmatprep.mubr.msk.bf16.mxu1 %vm923_vm3, %v1282_v55  ;;  %v3528_v55 = vld [vmem:[%s5137_s6 + $0x10] sm:$0xff]  }
 0x3cf   :  { %3351 = vmatmul.mubr.msk.bf16.gmra.mxu1 %vm923_vm3, %v1283_v47  ;;  %v1202_v53 = vpop.xlane.xlu0 %1201 }
 0x3d1   :  { %v3716_v35 = vpop.eup %3715 }
 0x3d2   :  { %v3718_v0 = vpop.eup %3717  ;;  %v1271_v7 = vmul.f32 %v3716_v35, %v4483_v57 }
 0x3d3   :  { %v492_v3 = vpop.permute.xlu0 %491  ;;  %v3720_v5 = vpop.eup %3719  ;;  %v1268_v36 = vmul.f32 %v3718_v0, %v4458_v20 }
 0x3d4   :  { %3376 = vmatprep.subr.bf16.mxu1 %v492_v3  ;;  %v1270_v22 = vmul.f32 %v3720_v5, %v4477_v48  ;;  %v3530_v5 = vld [vmem:[%s5137_s6] sm:$0xff]  }
 0x3d5   :  { %v3722_v13 = vpop.eup %3721  ;;  %3377 = vmatpush3.bf16.msra.mxu1 %v492_v3 }
 0x3d6   :  { %v1269_v32 = vmul.f32 %v3722_v13, %v4487_v43  ;;  %v1289_v23 = vpack.c.bf16 %v1271_v7, %v1270_v22  ;;  %v3724_v57 = vpop.eup %3723 }
 0x3d7   :  { %v3726_v48 = vpop.eup %3725  ;;  %v1264_v12 = vmul.f32 %v3724_v57, %v4454_v60 }
 0x3d8   :  { %v1288_v18 = vpack.c.bf16 %v1269_v32, %v1268_v36  ;;  %v1265_v37 = vmul.f32 %v3726_v48, %v4449_v19  ;;  %v3728_v10 = vpop.eup %3727 }
 0x3d9   :  { %v3730_v40 = vpop.eup %3729  ;;  %v1267_v17 = vmul.f32 %v3728_v10, %v4470_v29 }
 0x3da   :  { %3378 = vmatprep.mubr.msk.bf16.mxu1 %vm923_vm3, %v1288_v18  ;;  %v1286_v38 = vpack.c.bf16 %v1265_v37, %v1264_v12  ;;  %v1266_v60 = vmul.f32 %v3730_v40, %v4447_v11 }
 0x3db   :  { %3379 = vmatmul.mubr.msk.bf16.vlgmr.msra.gmra.mxu1 %vm923_vm3, %v1289_v23 }
 0x3dc   :  { %v1287_v14 = vpack.c.bf16 %v1267_v17, %v1266_v60 }
 0x3e8   :  { %v1211_v50 = vpop.xlane.xlu1 %1210 }
 0x3e9   :  { %3731 = vrcp.f32 %v1211_v50 }
 0x3ea   :  { %3733 = vrcp.f32 %v1202_v53  ;;  %v3529_v53 = vld [vmem:[%s5137_s6 + $0x8] sm:$0xff]  }
 0x3eb   :  { %3735 = vrcp.f32 %v1208_v45 }
 0x3ec   :  { %v1205_v20 = vpop.xlane.xlu1 %1204 }
 0x3ed   :  { %3737 = vrcp.f32 %v1205_v20 }
 0x3f0   :  { %v480_v43 = vpop.permute.xlu1 %479 }
 0x3f1   :  { %3360 = vmatprep.subr.bf16.mxu0 %v480_v43 }
 0x3f2   :  { %3361 = vmatpush3.bf16.msra.mxu0 %v480_v43 }
 0x3f3   :  { %3386 = vmatprep.subr.bf16.mxu0 %v3523_v16 }
 0x3f5   :  { %3363 = vmatmul.mubr.msk.bf16.vlgmr.msra.gmra.mxu0 %vm923_vm3, %v1285_v9 }
 0x3f6   :  { %3366 = vmatprep.mubr.msk.bf16.mxu0 %vm923_vm3, %v1286_v38  ;;  %v3732_v30 = vpop.eup %3731  ;;  %3387 = vmatpush3.bf16.msra.mxu0 %v3523_v16 }
 0x3f7   :  { %v3734_v21 = vpop.eup %3733  ;;  %v1275_v19 = vmul.f32 %v3732_v30, %v4505_v46  ;;  %3388 = vmatprep.subr.bf16.mxu0 %v3524_v59 }
 0x3f8   :  { %v3736_v28 = vpop.eup %3735  ;;  %v1272_v15 = vmul.f32 %v3734_v21, %v4495_v44 }
 0x3f9   :  { %v1274_v6 = vmul.f32 %v3736_v28, %v4491_v49 }
 0x3fa   :  { %v3738_v58 = vpop.eup %3737  ;;  %3389 = vmatpush3.bf16.msra.mxu0 %v3524_v59 }
 0x3fb   :  { %v1273_v62 = vmul.f32 %v3738_v58, %v4509_v2  ;;  %v1291_v51 = vpack.c.bf16 %v1275_v19, %v1274_v6  ;;  %3390 = vmatprep.subr.bf16.mxu0 %v3525_v39 }
 0x3fd   :  { %3367 = vmatmul.mubr.msk.bf16.gmra.mxu0 %vm923_vm3, %v1287_v14  ;;  %v1290_v9 = vpack.c.bf16 %v1273_v62, %v1272_v15 }
 0x3fe   :  { %3391 = vmatpush3.bf16.msra.mxu0 %v3525_v39 }
 0x3ff   :  { %3382 = vmatprep.mubr.msk.bf16.mxu1 %vm923_vm3, %v1290_v9  ;;  %3392 = vmatprep.subr.bf16.mxu0 %v3526_v33 }
 0x400   :  { %3383 = vmatmul.mubr.msk.bf16.gmra.mxu1 %vm923_vm3, %v1291_v51 }
 0x401   :  { %2238 = vmatprep.mubr.bf16.mxu1 %v3779_v1 }
 0x402   :  { %3393 = vmatpush3.bf16.msra.mxu0 %v3526_v33 }
 0x403   :  { %3394 = vmatprep.subr.bf16.mxu0 %v3527_v24 }
 0x406   :  { %3395 = vmatpush3.bf16.msra.mxu0 %v3527_v24 }
 0x407   :  { %3396 = vmatprep.subr.bf16.mxu0 %v3528_v55 }
 0x40a   :  { %3397 = vmatpush3.bf16.msra.mxu0 %v3528_v55 }
 0x40b   :  { %3398 = vmatprep.subr.bf16.mxu0 %v3529_v53 }
 0x40e   :  { %3399 = vmatpush3.bf16.msra.mxu0 %v3529_v53 }
 0x40f   :  { %3400 = vmatprep.subr.bf16.mxu0 %v3530_v5 }
 0x412   :  { %3401 = vmatpush3.bf16.msra.mxu0 %v3530_v5 }
 0x42b   :  { %v4592_v11 = vpop.f32.mrf.mxu1 }
 0x42d   :  { %v4594_v29 = vpop.f32.mrf.mxu1 }
 0x42f   :  { %v4596_v46 = vpop.f32.mrf.mxu1 }
 0x431   :  { %v4598_v44 = vpop.f32.mrf.mxu1 }
 0x433   :  { %v4600_v2 = vpop.f32.mrf.mxu1 }
 0x435   :  { %v4602_v49 = vpop.f32.mrf.mxu1 }
 0x437   :  { %v4604_v4 = vpop.f32.mrf.mxu1 }
 0x439   :  { %v4606_v63 = vpop.f32.mrf.mxu1 }
 0x477   :  { %v3348_v27 = vpop.f32.mrf.mxu1 }
 0x479   :  { %v1415_v25 = vpop.f32.mrf.mxu1 }
 0x47b   :  { %v3349_v8 = vpop.f32.mrf.mxu1 }
 0x47c   :  { %v3431_v34 = vpack.i.bf16 %v3349_v8, %v3348_v27 }
 0x47d   :  { %v1418_v54 = vpop.f32.mrf.mxu1 }
 0x47e   :  { %v3441_v42 = vpack.i.bf16 %v1418_v54, %v1415_v25  ;;  %3432 = vrot.lane.b32.xlu0 %v3431_v34, %s3781_s5 }
 0x480   :  { %3442 = vrot.lane.b32.xlu1 %v3441_v42, %s3781_s5 }
 0x48f   :  { %v3352_v41 = vpop.f32.mrf.mxu1 }
 0x491   :  { %v1431_v26 = vpop.f32.mrf.mxu1 }
 0x493   :  { %v3353_v45 = vpop.f32.mrf.mxu1 }
 0x494   :  { %v3466_v12 = vpack.i.bf16 %v3353_v45, %v3352_v41 }
 0x495   :  { %v1434_v31 = vpop.f32.mrf.mxu1 }
 0x496   :  { %v3461_v10 = vpack.i.bf16 %v1434_v31, %v1431_v26 }
 0x49b   :  { %v3380_v47 = vpop.f32.mrf.mxu1 }
 0x49d   :  { %v1569_v35 = vpop.f32.mrf.mxu1 }
 0x49f   :  { %v3381_v13 = vpop.f32.mrf.mxu1 }
 0x4a0   :  { %v3456_v50 = vpack.i.bf16 %v3381_v13, %v3380_v47 }
 0x4a1   :  { %v1572_v18 = vpop.f32.mrf.mxu1 }
 0x4a2   :  { %v3451_v57 = vpack.i.bf16 %v1572_v18, %v1569_v35 }
 0x4b5   :  { %v3364_v0 = vpop.f32.mrf.mxu0 }
 0x4b7   :  { %v1492_v3 = vpop.f32.mrf.mxu0 }
 0x4b9   :  { %v3365_v7 = vpop.f32.mrf.mxu0 }
 0x4ba   :  { %v3436_v36 = vpack.i.bf16 %v3365_v7, %v3364_v0 }
 0x4bb   :  { %v1495_v32 = vpop.f32.mrf.mxu0 }
 0x4bc   :  { %v3446_v22 = vpack.i.bf16 %v1495_v32, %v1492_v3  ;;  %3437 = vrot.lane.b32.xlu0 %v3436_v36, %s3782_s4 }
 0x4bd   :  { %v3368_v23 = vpop.f32.mrf.mxu0 }
 0x4be   :  { %3447 = vrot.lane.b32.xlu1 %v3446_v22, %s3782_s4 }
 0x4bf   :  { %v1508_v20 = vpop.f32.mrf.mxu0 }
 0x4c0   :  { %3457 = vrot.lane.b32.xlu0 %v3456_v50, %s3780_s3  ;;  %v3384_v48 = vpop.f32.mrf.mxu1 }
 0x4c1   :  { %v3369_v43 = vpop.f32.mrf.mxu0 }
 0x4c2   :  { %3452 = vrot.lane.b32.xlu1 %v3451_v57, %s3780_s3  ;;  %v1585_v37 = vpop.f32.mrf.mxu1  ;;  %v3476_v30 = vpack.i.bf16 %v3369_v43, %v3368_v23 }
 0x4c3   :  { %v1511_v38 = vpop.f32.mrf.mxu0 }
 0x4c4   :  { %3467 = vrot.lane.b32.xlu0 %v3466_v12, %s3781_s5  ;;  %v3385_v40 = vpop.f32.mrf.mxu1  ;;  %v3471_v17 = vpack.i.bf16 %v1511_v38, %v1508_v20 }
 0x4c5   :  { %v3486_v28 = vpack.i.bf16 %v3385_v40, %v3384_v48 }
 0x4c6   :  { %3462 = vrot.lane.b32.xlu1 %v3461_v10, %s3781_s5  ;;  %v1588_v21 = vpop.f32.mrf.mxu1 }
 0x4c7   :  { %v3481_v60 = vpack.i.bf16 %v1588_v21, %v1585_v37 }
 0x4c8   :  { %3477 = vrot.lane.b32.xlu0 %v3476_v30, %s3782_s4 }
 0x4ca   :  { %3472 = vrot.lane.b32.xlu1 %v3471_v17, %s3782_s4 }
 0x4cc   :  { %3487 = vrot.lane.b32.xlu0 %v3486_v28, %s3780_s3 }
 0x4ce   :  { %3482 = vrot.lane.b32.xlu1 %v3481_v60, %s3780_s3 }
 0x4f0   :  { %v3433_v58 = vpop.permute.xlu0 %3432 }
 0x4f1   :  { %v3435_v15 = vunpack.i.h.bf16 %v3433_v58  ;;  %v3434_v62 = vunpack.i.l.bf16 %v3433_v58 }
 0x4f2   :  { %v3443_v19 = vpop.permute.xlu1 %3442 }
 0x4f3   :  { %v3445_v6 = vunpack.i.h.bf16 %v3443_v19  ;;  %v3444_v9 = vunpack.i.l.bf16 %v3443_v19  ;;  %v1699_v54 = vsel %vm566_vm0, %v4596_v46, %v3435_v15  ;;  %v1698_v42 = vsel %vm566_vm0, %v4592_v11, %v3434_v62 }
 0x4f5   :  { %v1697_v33 = vsel %vm566_vm0, %v4598_v44, %v3445_v6  ;;  %v1696_v24 = vsel %vm566_vm0, %v4594_v29, %v3444_v9  ;;  %v2988_v6 = vld [vmem:[%s5138_s7] ss:$0 sm:$0xff] }
 0x52e   :  { %v3438_v14 = vpop.permute.xlu0 %3437 }
 0x52f   :  { %v3440_v16 = vunpack.i.h.bf16 %v3438_v14  ;;  %v3439_v27 = vunpack.i.l.bf16 %v3438_v14 }
 0x530   :  { %v3448_v51 = vpop.permute.xlu1 %3447 }
 0x531   :  { %v3450_v59 = vunpack.i.h.bf16 %v3448_v51  ;;  %v3449_v25 = vunpack.i.l.bf16 %v3448_v51  ;;  %v1706_v26 = vsel %vm923_vm3, %v1698_v42, %v3439_v27  ;;  %v1707_v45 = vsel %vm923_vm3, %v1699_v54, %v3440_v16  ;;  %v3771_v27 = vld [vmem:[%s5133_s0] sm:$0xff]  ;;  %v3772_v54 = vld [vmem:[%s5133_s0 + $0x18] sm:$0xff] }
 0x532   :  { %v3458_v39 = vpop.permute.xlu0 %3457 }
 0x533   :  { %v3460_v8 = vunpack.i.h.bf16 %v3458_v39  ;;  %v3459_v34 = vunpack.i.l.bf16 %v3458_v39  ;;  %v1705_v47 = vsel %vm923_vm3, %v1697_v33, %v3450_v59  ;;  %v1704_v46 = vsel %vm923_vm3, %v1696_v24, %v3449_v25  ;;  %v3773_v33 = vld [vmem:[%s5133_s0 + $0x8] sm:$0xff] }
 0x534   :  { %v3453_v41 = vpop.permute.xlu1 %3452 }
 0x535   :  { %v3455_v31 = vunpack.i.h.bf16 %v3453_v41  ;;  %v3454_v55 = vunpack.i.l.bf16 %v3453_v41  ;;  %v1715_v53 = vsel %vm1712_vm10, %v1706_v26, %v3459_v34  ;;  %v1716_v11 = vsel %vm1712_vm10, %v1707_v45, %v3460_v8  ;;  %v3774_v26 = vld [vmem:[%s5133_s0 + $0x10] sm:$0xff] }
 0x536   :  { %v3468_v35 = vpop.permute.xlu0 %3467  ;;  %v1722_v5 = vpack.c.bf16 %v1716_v11, %v1715_v53  ;;  %v3775_v53 = vld [vmem:[%s5133_s0 + $0x20] sm:$0xff] }
 0x537   :  { %v1713_v44 = vsel %vm1712_vm10, %v1704_v46, %v3454_v55  ;;  %v1714_v29 = vsel %vm1712_vm10, %v1705_v47, %v3455_v31  ;;  %v3470_v7 = vunpack.i.h.bf16 %v3468_v35  ;;  %v3469_v36 = vunpack.i.l.bf16 %v3468_v35 }
 0x538   :  { %v3463_v0 = vpop.permute.xlu1 %3462  ;;  %v1721_v3 = vpack.c.bf16 %v1714_v29, %v1713_v44  ;;  %v3776_v29 = vld [vmem:[%s5133_s0 + $0x30] sm:$0xff] }
 0x539   :  { %v3465_v32 = vunpack.i.h.bf16 %v3463_v0  ;;  %v3464_v22 = vunpack.i.l.bf16 %v3463_v0  ;;  %v1703_v37 = vsel %vm566_vm0, %v4604_v4, %v3470_v7  ;;  %v1702_v10 = vsel %vm566_vm0, %v4600_v2, %v3469_v36  ;;  %v3778_v7 = vld [vmem:[%s5133_s0 + $0x38] sm:$0xff] }
 0x53a   :  { %3402 = vmatprep.mubr.bf16.mxu0 %v1721_v3  ;;  %v3478_v13 = vpop.permute.xlu0 %3477 }
 0x53b   :  { %3403 = vmatmul.mubr.bf16.vlgmr.msra.gmra.mxu0 %v1722_v5  ;;  %v3480_v23 = vunpack.i.h.bf16 %v3478_v13  ;;  %v3479_v50 = vunpack.i.l.bf16 %v3478_v13  ;;  %v1701_v38 = vsel %vm566_vm0, %v4606_v63, %v3465_v32  ;;  %v1700_v40 = vsel %vm566_vm0, %v4602_v49, %v3464_v22  ;;  %v3777_v5 = vld [vmem:[%s5133_s0 + $0x28] sm:$0xff]  ;;  %v3531_v32 = vld [vmem:[%s5139_s10 + $0xe0] ss:$16 sps:$4 sm:$0xff]   ;;  %v3533_v22 = vld [vmem:[%s5139_s10 + $0xe4] ss:$16 sps:$4 sm:$0xff]  }
 0x53c   :  { %v3473_v18 = vpop.permute.xlu1 %3472  ;;  %2206 = vmatprep.subr.bf16.mxu1 %v3533_v22  ;;  %v3573_v22 = vld [vmem:[%s5139_s10] ss:$16 sps:$4 sm:$0xff]  }
 0x53d   :  { %v3475_v20 = vunpack.i.h.bf16 %v3473_v18  ;;  %v3474_v57 = vunpack.i.l.bf16 %v3473_v18  ;;  %v1710_v17 = vsel %vm923_vm3, %v1702_v10, %v3479_v50  ;;  %v1711_v21 = vsel %vm923_vm3, %v1703_v37, %v3480_v23  ;;  %v3534_v18 = vld [vmem:[%s5139_s10 + $0xe8] ss:$16 sps:$4 sm:$0xff]   ;;  %v3536_v23 = vld [vmem:[%s5139_s10 + $0xec] ss:$16 sps:$4 sm:$0xff]   ;;  %2207 = vmatpush1.bf16.msra.mxu1 %v3531_v32  ;;  %v3575_v32 = vld [vmem:[%s5139_s10 + $0x4] ss:$16 sps:$4 sm:$0xff]  }
 0x53e   :  { %v3488_v48 = vpop.permute.xlu0 %3487  ;;  %2279 = vmatprep.subr.bf16.mxu0 %v3536_v23  ;;  %v3578_v23 = vld [vmem:[%s5139_s10 + $0xc] ss:$16 sps:$4 sm:$0xff]  }
 0x53f   :  { %v3490_v43 = vunpack.i.h.bf16 %v3488_v48  ;;  %v3489_v12 = vunpack.i.l.bf16 %v3488_v48  ;;  %v1708_v58 = vsel %vm923_vm3, %v1700_v40, %v3474_v57  ;;  %v1709_v4 = vsel %vm923_vm3, %v1701_v38, %v3475_v20  ;;  %2280 = vmatpush1.bf16.msra.mxu0 %v3534_v18  ;;  %v3576_v18 = vld [vmem:[%s5139_s10 + $0x8] ss:$16 sps:$4 sm:$0xff]  }
 0x540   :  { %v3483_v30 = vpop.permute.xlu1 %3482 }
 0x541   :  { %v3485_v28 = vunpack.i.h.bf16 %v3483_v30  ;;  %v3484_v60 = vunpack.i.l.bf16 %v3483_v30  ;;  %v1719_v19 = vsel %vm1712_vm10, %v1710_v17, %v3489_v12  ;;  %v1720_v2 = vsel %vm1712_vm10, %v1711_v21, %v3490_v43 }
 0x542   :  { %v1724_v15 = vpack.c.bf16 %v1720_v2, %v1719_v19 }
 0x543   :  { %v1717_v63 = vsel %vm1712_vm10, %v1708_v58, %v3484_v60  ;;  %v1718_v14 = vsel %vm1712_vm10, %v1709_v4, %v3485_v28 }
 0x544   :  { %v1723_v49 = vpack.c.bf16 %v1718_v14, %v1717_v63 }
 0x546   :  { %3406 = vmatprep.mubr.bf16.mxu0 %v1723_v49 }
 0x547   :  { %3407 = vmatmul.mubr.bf16.gmra.mxu0 %v1724_v15 }
 0x548   :  { %2311 = vmatprep.mubr.bf16.mxu0 %v3779_v1 }
 0x5fb   :  { %v3404_v62 = vpop.f32.mrf.mxu0 }
 0x5fc   :  { %v1839_v34 = vadd.f32 %v3404_v62, %v2988_v6 }
 0x5fd   :  { %v1830_v9 = vpop.f32.mrf.mxu0 }
 0x5fe   :  { %v1831_v51 = vadd.f32 %v2988_v6, %v1830_v9  ;;  %v1863_v45 = vadd.f32 %v3774_v26, %v1839_v34 }
 0x5ff   :  { %v3405_v16 = vpop.f32.mrf.mxu0 }
 0x600   :  { %v1861_v59 = vadd.f32 %v3771_v27, %v1831_v51  ;;  %v1842_v25 = vadd.f32 %v3405_v16, %v2988_v6  ;;  %v3539_v51 = vld [vmem:[%s5139_s10 + $0xc4] ss:$16 sps:$4 sm:$0xff]   ;;  %v3542_v16 = vld [vmem:[%s5139_s10 + $0xcc] ss:$16 sps:$4 sm:$0xff]  }
 0x601   :  { %v1833_v39 = vpop.f32.mrf.mxu0  ;;  %2208 = vmatprep.subr.bf16.mxu1 %v3539_v51  ;;  %2281 = vmatprep.subr.bf16.mxu0 %v3542_v16 }
 0x602   :  { %v1834_v8 = vadd.f32 %v2988_v6, %v1833_v39  ;;  %1871 = vadd.xlane.f32.xlu1 %v1861_v59  ;;  %v1864_v42 = vadd.f32 %v3772_v54, %v1842_v25  ;;  %v3540_v25 = vld [vmem:[%s5139_s10 + $0xc8] ss:$16 sps:$4 sm:$0xff]  }
 0x603   :  { %2282 = vmatpush1.bf16.msra.mxu0 %v3540_v25 }
 0x604   :  { %v1862_v24 = vadd.f32 %v3773_v33, %v1834_v8  ;;  %v3548_v33 = vld [vmem:[%s5139_s10 + $0xac] ss:$16 sps:$4 sm:$0xff]  }
 0x605   :  { %2283 = vmatprep.subr.bf16.mxu0 %v3548_v33 }
 0x606   :  { %1873 = vadd.xlane.f32.xlu0 %v1862_v24  ;;  %1877 = vadd.xlane.f32.xlu1 %v1864_v42 }
 0x607   :  { %v3408_v41 = vpop.f32.mrf.mxu0 }
 0x608   :  { %v1855_v46 = vadd.f32 %v3408_v41, %v2988_v6  ;;  %v3546_v41 = vld [vmem:[%s5139_s10 + $0xa8] ss:$16 sps:$4 sm:$0xff]  }
 0x609   :  { %v1846_v31 = vpop.f32.mrf.mxu0  ;;  %2284 = vmatpush1.bf16.msra.mxu0 %v3546_v41 }
 0x60a   :  { %v1847_v55 = vadd.f32 %v2988_v6, %v1846_v31  ;;  %1875 = vadd.xlane.f32.xlu0 %v1863_v45  ;;  %v1867_v0 = vadd.f32 %v3776_v29, %v1855_v46  ;;  %v3554_v31 = vld [vmem:[%s5139_s10 + $0x8c] ss:$16 sps:$4 sm:$0xff]   ;;  %v3557_v46 = vld [vmem:[%s5139_s10 + $0x64] ss:$16 sps:$4 sm:$0xff]  }
 0x60b   :  { %v3409_v47 = vpop.f32.mrf.mxu0  ;;  %2285 = vmatprep.subr.bf16.mxu0 %v3554_v31  ;;  %v3566_v29 = vld [vmem:[%s5139_s10 + $0x4c] ss:$16 sps:$4 sm:$0xff]  }
 0x60c   :  { %v1865_v11 = vadd.f32 %v3775_v53, %v1847_v55  ;;  %v1858_v3 = vadd.f32 %v3409_v47, %v2988_v6  ;;  %v3549_v55 = vld [vmem:[%s5139_s10 + $0x80] ss:$16 sps:$4 sm:$0xff]   ;;  %v3552_v47 = vld [vmem:[%s5139_s10 + $0x88] ss:$16 sps:$4 sm:$0xff]   ;;  %v3560_v53 = vld [vmem:[%s5139_s10 + $0x6c] ss:$16 sps:$4 sm:$0xff]  }
 0x60d   :  { %v1849_v35 = vpop.f32.mrf.mxu0  ;;  %2286 = vmatpush1.bf16.msra.mxu0 %v3552_v47 }
 0x60e   :  { %v1850_v44 = vadd.f32 %v2988_v6, %v1849_v35  ;;  %1879 = vadd.xlane.f32.xlu0 %v1865_v11  ;;  %v1868_v36 = vadd.f32 %v3778_v7, %v1858_v3  ;;  %v3558_v35 = vld [vmem:[%s5139_s10 + $0x68] ss:$16 sps:$4 sm:$0xff]   ;;  %2287 = vmatprep.subr.bf16.mxu0 %v3560_v53  ;;  %v3567_v7 = vld [vmem:[%s5139_s10 + $0x20] ss:$16 sps:$4 sm:$0xff]  }
 0x60f   :  { %v3564_v3 = vld [vmem:[%s5139_s10 + $0x48] ss:$16 sps:$4 sm:$0xff]  }
 0x610   :  { %v1866_v13 = vadd.f32 %v3777_v5, %v1850_v44  ;;  %v3563_v44 = vld [vmem:[%s5139_s10 + $0x44] ss:$16 sps:$4 sm:$0xff]  }
 0x611   :  { %2288 = vmatpush1.bf16.msra.mxu0 %v3558_v35  ;;  %v3569_v5 = vld [vmem:[%s5139_s10 + $0x24] ss:$16 sps:$4 sm:$0xff]  }
 0x612   :  { %1883 = vadd.xlane.f32.xlu0 %v1867_v0  ;;  %1881 = vadd.xlane.f32.xlu1 %v1866_v13 }
 0x613   :  { %2289 = vmatprep.subr.bf16.mxu0 %v3566_v29  ;;  %v3582_v29 = vld [vmem:[%s5140_s12 + $0xb8] sm:$0xff]  }
 0x615   :  { %2290 = vmatpush1.bf16.msra.mxu0 %v3564_v3 }
 0x616   :  { %1885 = vadd.xlane.f32.xlu1 %v1868_v36 }
 0x68b   :  { %v1872_v50 = vpop.xlane.xlu1 %1871 }
 0x68c   :  { %v1888_v20 = vmul.f32 0.0078125, %v1872_v50  ;;  %v3579_v50 = vld [vmem:[%s5140_s12 + $0x78] sm:$0xff]  }
 0x68e   :  { %v4716_v57 = vsub.f32 %v1861_v59, %v1888_v20  ;;  %v3537_v59 = vld [vmem:[%s5139_s10 + $0xc0] ss:$16 sps:$4 sm:$0xff]   ;;  %v3580_v20 = vld [vmem:[%s5140_s12 + $0xf8] sm:$0xff]  }
 0x68f   :  { %v1874_v48 = vpop.xlane.xlu0 %1873  ;;  %v1878_v43 = vpop.xlane.xlu1 %1877  ;;  %2209 = vmatpush1.bf16.msra.mxu1 %v3537_v59 }
 0x690   :  { %v1889_v12 = vmul.f32 0.0078125, %v1874_v48  ;;  %v1891_v37 = vmul.f32 0.0078125, %v1878_v43  ;;  %v1904_v10 = vmul.f32 %v4716_v57, %v4716_v57 }
 0x692   :  { %v4720_v38 = vsub.f32 %v1862_v24, %v1889_v12  ;;  %1912 = vadd.xlane.f32.xlu0 %v1904_v10  ;;  %v4722_v30 = vsub.f32 %v1864_v42, %v1891_v37  ;;  %v3545_v42 = vld [vmem:[%s5139_s10 + $0xa4] ss:$16 sps:$4 sm:$0xff]   ;;  %v3543_v24 = vld [vmem:[%s5139_s10 + $0xa0] ss:$16 sps:$4 sm:$0xff]  }
 0x693   :  { %v1876_v40 = vpop.xlane.xlu0 %1875  ;;  %2210 = vmatprep.subr.bf16.mxu1 %v3545_v42 }
 0x694   :  { %v1890_v17 = vmul.f32 0.0078125, %v1876_v40  ;;  %v1905_v21 = vmul.f32 %v4720_v38, %v4720_v38  ;;  %v1907_v19 = vmul.f32 %v4722_v30, %v4722_v30  ;;  %2211 = vmatpush1.bf16.msra.mxu1 %v3543_v24 }
 0x696   :  { %v4726_v28 = vsub.f32 %v1863_v45, %v1890_v17  ;;  %1914 = vadd.xlane.f32.xlu1 %v1905_v21  ;;  %v3551_v45 = vld [vmem:[%s5139_s10 + $0x84] ss:$16 sps:$4 sm:$0xff]  }
 0x697   :  { %v1880_v60 = vpop.xlane.xlu0 %1879  ;;  %2212 = vmatprep.subr.bf16.mxu1 %v3551_v45 }
 0x698   :  { %v1892_v58 = vmul.f32 0.0078125, %v1880_v60  ;;  %v1906_v4 = vmul.f32 %v4726_v28, %v4726_v28  ;;  %2213 = vmatpush1.bf16.msra.mxu1 %v3549_v55 }
 0x699   :  { %2214 = vmatprep.subr.bf16.mxu1 %v3557_v46 }
 0x69a   :  { %v4732_v2 = vsub.f32 %v1865_v11, %v1892_v58  ;;  %1916 = vadd.xlane.f32.xlu0 %v1906_v4  ;;  %1918 = vadd.xlane.f32.xlu1 %v1907_v19  ;;  %v3555_v11 = vld [vmem:[%s5139_s10 + $0x60] ss:$16 sps:$4 sm:$0xff]  }
 0x69b   :  { %v1884_v63 = vpop.xlane.xlu0 %1883  ;;  %v1882_v14 = vpop.xlane.xlu1 %1881 }
 0x69c   :  { %v1894_v49 = vmul.f32 0.0078125, %v1884_v63  ;;  %v1893_v15 = vmul.f32 0.0078125, %v1882_v14  ;;  %v1908_v62 = vmul.f32 %v4732_v2, %v4732_v2  ;;  %2215 = vmatpush1.bf16.msra.mxu1 %v3555_v11 }
 0x69d   :  { %2216 = vmatprep.subr.bf16.mxu1 %v3563_v44  ;;  %v3581_v44 = vld [vmem:[%s5140_s12 + $0x38] sm:$0xff]  }
 0x69e   :  { %v4736_v6 = vsub.f32 %v1867_v0, %v1894_v49  ;;  %v4738_v9 = vsub.f32 %v1866_v13, %v1893_v15  ;;  %1920 = vadd.xlane.f32.xlu0 %v1908_v62  ;;  %v3561_v0 = vld [vmem:[%s5139_s10 + $0x40] ss:$16 sps:$4 sm:$0xff]   ;;  %v3572_v13 = vld [vmem:[%s5139_s10 + $0x2c] ss:$16 sps:$4 sm:$0xff]  }
 0x69f   :  { %v1886_v27 = vpop.xlane.xlu1 %1885  ;;  %2291 = vmatprep.subr.bf16.mxu0 %v3572_v13 }
 0x6a0   :  { %v1895_v39 = vmul.f32 0.0078125, %v1886_v27  ;;  %v1910_v8 = vmul.f32 %v4736_v6, %v4736_v6  ;;  %v1909_v34 = vmul.f32 %v4738_v9, %v4738_v9  ;;  %2217 = vmatpush1.bf16.msra.mxu1 %v3561_v0 }
 0x6a1   :  { %2218 = vmatprep.subr.bf16.mxu1 %v3569_v5 }
 0x6a2   :  { %v4756_v54 = vsub.f32 %v1868_v36, %v1895_v39  ;;  %1924 = vadd.xlane.f32.xlu0 %v1910_v8  ;;  %1922 = vadd.xlane.f32.xlu1 %v1909_v34  ;;  %v3570_v36 = vld [vmem:[%s5139_s10 + $0x28] ss:$16 sps:$4 sm:$0xff]   ;;  %v4842_v8 = vld [vmem:[%s5141_s8] ss:$0 sm:$0xff] }
 0x6a3   :  { %2292 = vmatpush1.bf16.msra.mxu0 %v3570_v36  ;;  %v3586_v36 = vld [vmem:[%s5140_s12 + $0xb0] sm:$0xff]  }
 0x6a4   :  { %v1911_v26 = vmul.f32 %v4756_v54, %v4756_v54  ;;  %2219 = vmatpush1.bf16.msra.mxu1 %v3567_v7  ;;  %2293 = vmatprep.subr.bf16.mxu0 %v3578_v23  ;;  %v3585_v7 = vld [vmem:[%s5140_s12 + $0x30] sm:$0xff]  }
 0x6a5   :  { %2220 = vmatprep.subr.bf16.mxu1 %v3575_v32  ;;  %v3587_v32 = vld [vmem:[%s5140_s12 + $0x68] sm:$0xff]  }
 0x6a6   :  { %1926 = vadd.xlane.f32.xlu1 %v1911_v26 }
 0x6a7   :  { %2294 = vmatpush1.bf16.msra.mxu0 %v3576_v18 }
 0x6a8   :  { %2221 = vmatpush1.bf16.msra.mxu1 %v3573_v22  ;;  %3194 = vmatprep.subr.bf16.mxu0 %v3580_v20  ;;  %v3588_v22 = vld [vmem:[%s5140_s12 + $0xe8] sm:$0xff]  }
 0x6a9   :  { %3154 = vmatprep.subr.bf16.mxu1 %v3579_v50 }
 0x71b   :  { %v1913_v48 = vpop.xlane.xlu0 %1912 }
 0x71c   :  { %v1928_v43 = vmul.f32 0.0078125, %v1913_v48  ;;  %v3589_v48 = vld [vmem:[%s5140_s12 + $0x28] sm:$0xff]  }
 0x71e   :  { %v1936_v12 = vadd.f32 1e-05, %v1928_v43  ;;  %v3590_v43 = vld [vmem:[%s5140_s12 + $0xa8] sm:$0xff]  }
 0x71f   :  { %v1915_v37 = vpop.xlane.xlu1 %1914 }
 0x720   :  { %3739 = vrsqrt.f32 %v1936_v12  ;;  %v1929_v10 = vmul.f32 0.0078125, %v1915_v37 }
 0x722   :  { %v1937_v40 = vadd.f32 1e-05, %v1929_v10 }
 0x723   :  { %v1917_v17 = vpop.xlane.xlu0 %1916  ;;  %v1919_v21 = vpop.xlane.xlu1 %1918 }
 0x724   :  { %3741 = vrsqrt.f32 %v1937_v40  ;;  %v1930_v60 = vmul.f32 0.0078125, %v1917_v17  ;;  %v1931_v58 = vmul.f32 0.0078125, %v1919_v21 }
 0x726   :  { %v1938_v4 = vadd.f32 1e-05, %v1930_v60  ;;  %v1939_v19 = vadd.f32 1e-05, %v1931_v58  ;;  %v3593_v60 = vld [vmem:[%s5140_s12 + $0x20] sm:$0xff]  }
 0x727   :  { %v1921_v63 = vpop.xlane.xlu0 %1920  ;;  %v3594_v58 = vld [vmem:[%s5140_s12 + $0xa0] sm:$0xff]  }
 0x728   :  { %3743 = vrsqrt.f32 %v1938_v4  ;;  %v1932_v14 = vmul.f32 0.0078125, %v1921_v63  ;;  %v3595_v4 = vld [vmem:[%s5140_s12 + $0x58] sm:$0xff]  }
 0x729   :  { %3745 = vrsqrt.f32 %v1939_v19 }
 0x72a   :  { %v1940_v49 = vadd.f32 1e-05, %v1932_v14 }
 0x72b   :  { %v1925_v15 = vpop.xlane.xlu0 %1924  ;;  %v1923_v62 = vpop.xlane.xlu1 %1922 }
 0x72c   :  { %v1933_v51 = vmul.f32 0.0078125, %v1923_v62  ;;  %3747 = vrsqrt.f32 %v1940_v49  ;;  %v1934_v59 = vmul.f32 0.0078125, %v1925_v15  ;;  %v3597_v15 = vld [vmem:[%s5140_s12 + $0x18] sm:$0xff]  }
 0x72d   :  { %v3740_v16 = vpop.eup %3739  ;;  %v3598_v62 = vld [vmem:[%s5140_s12 + $0x98] sm:$0xff]  }
 0x72e   :  { %v1952_v27 = vmul.f32 %v3740_v16, %v4716_v57  ;;  %v1941_v25 = vadd.f32 1e-05, %v1933_v51  ;;  %v1942_v24 = vadd.f32 1e-05, %v1934_v59  ;;  %v4849_v57 = vld [vmem:[%s5142_s9] ss:$0 sm:$0xff] }
 0x72f   :  { %v1927_v39 = vpop.xlane.xlu1 %1926  ;;  %v3599_v59 = vld [vmem:[%s5140_s12 + $0x50] sm:$0xff]  }
 0x730   :  { %v1935_v34 = vmul.f32 0.0078125, %v1927_v39  ;;  %3749 = vrsqrt.f32 %v1941_v25  ;;  %v1966_v26 = vmul.f32 %v4842_v8, %v1952_v27  ;;  %v3601_v25 = vld [vmem:[%s5140_s12 + $0x10] sm:$0xff]  }
 0x731   :  { %v3742_v42 = vpop.eup %3741  ;;  %v3602_v39 = vld [vmem:[%s5140_s12 + $0x90] sm:$0xff]  }
 0x732   :  { %v1953_v33 = vmul.f32 %v3742_v42, %v4720_v38  ;;  %v1943_v41 = vadd.f32 1e-05, %v1935_v34  ;;  %v4853_v47 = vadd.f32 %v4849_v57, %v1966_v26  ;;  %v3604_v34 = vld [vmem:[%s5140_s12 + $0xc8] sm:$0xff]   ;;  %v3609_v26 = vld [vmem:[%s5140_s12] sm:$0xff]  }
 0x733   :  { %v3605_v42 = vld [vmem:[%s5140_s12 + $0x8] sm:$0xff]  }
 0x734   :  { %3751 = vrsqrt.f32 %v1943_v41  ;;  %v1967_v45 = vmul.f32 %v4842_v8, %v1953_v33  ;;  %v3606_v33 = vld [vmem:[%s5140_s12 + $0x88] sm:$0xff]   ;;  %v3608_v41 = vld [vmem:[%s5140_s12 + $0xc0] sm:$0xff]  }
 0x735   :  { %v3744_v31 = vpop.eup %3743  ;;  %3753 = vrsqrt.f32 %v1942_v24  ;;  %v3607_v24 = vld [vmem:[%s5140_s12 + $0x40] sm:$0xff]  }
 0x736   :  { %v3746_v55 = vpop.eup %3745  ;;  %v4856_v38 = vadd.f32 %v4849_v57, %v1967_v45  ;;  %v1954_v46 = vmul.f32 %v3744_v31, %v4726_v28  ;;  %v3583_v28 = vld [vmem:[%s5140_s12 + $0x70] sm:$0xff]   ;;  %v2040_v45 = vsub.s32 3, %v3996_v52  ;;  %v2036_v31 = vsub.s32 2, %v3996_v52 }
 0x737   :  { %v1955_v53 = vmul.f32 %v3746_v55, %v4722_v30  ;;  %v3584_v30 = vld [vmem:[%s5140_s12 + $0xf0] sm:$0xff]   ;;  %v2024_v55 = vld [vmem:[%s5143_s11] sm:$0xf] }
 0x738   :  { %v1988_v11 = vpack.c.bf16 %v4856_v38, %v4853_v47  ;;  %v1968_v35 = vmul.f32 %v4842_v8, %v1954_v46 }
 0x739   :  { %v1969_v0 = vmul.f32 %v4842_v8, %v1955_v53  ;;  %v3748_v3 = vpop.eup %3747 }
 0x73a   :  { %2239 = vmatmul.mubr.bf16.vlgmr.msra.gmra.mxu1 %v1988_v11  ;;  %2312 = vmatmul.mubr.bf16.vlgmr.msra.gmra.mxu0 %v1988_v11  ;;  %v4879_v5 = vadd.f32 %v4849_v57, %v1968_v35  ;;  %v1956_v23 = vmul.f32 %v3748_v3, %v4732_v2  ;;  %v3591_v2 = vld [vmem:[%s5140_s12 + $0x60] sm:$0xff]   ;;  %v4999_v11 = vrot.slane %v2024_v55, %v238_v61 }
 0x73b   :  { %2248 = vmatprep.mubr.bf16.mxu1 %v3779_v1  ;;  %2321 = vmatprep.mubr.bf16.mxu0 %v3779_v1  ;;  %v4882_v13 = vadd.f32 %v4849_v57, %v1969_v0  ;;  %v5001_v35 = vrot.slane %v2024_v55, %v2040_v45 }
 0x73c   :  { %3155 = vmatpush3.bf16.msra.mxu1 %v3581_v44  ;;  %3195 = vmatpush3.bf16.msra.mxu0 %v3582_v29  ;;  %v1970_v10 = vmul.f32 %v4842_v8, %v1956_v23  ;;  %v5005_v44 = vrot.slane %v2024_v55, %v234_v56  ;;  %v5007_v29 = vrot.slane %v2024_v55, %v2036_v31 }
 0x73d   :  { %3156 = vmatprep.subr.bf16.mxu1 %v3583_v28  ;;  %3196 = vmatprep.subr.bf16.mxu0 %v3584_v30  ;;  %v3750_v18 = vpop.eup %3749  ;;  %v1989_v20 = vpack.c.bf16 %v4882_v13, %v4879_v5 }
 0x73e   :  { %v1957_v50 = vmul.f32 %v3750_v18, %v4738_v9  ;;  %v3592_v9 = vld [vmem:[%s5140_s12 + $0xe0] sm:$0xff]   ;;  %v4933_v19 = vadd.f32 %v4849_v57, %v1970_v10 }
 0x740   :  { %3157 = vmatpush3.bf16.msra.mxu1 %v3585_v7  ;;  %3197 = vmatpush3.bf16.msra.mxu0 %v3586_v36  ;;  %v1971_v37 = vmul.f32 %v4842_v8, %v1957_v50 }
 0x741   :  { %v3752_v12 = vpop.eup %3751  ;;  %3158 = vmatprep.subr.bf16.mxu1 %v3587_v32  ;;  %3198 = vmatprep.subr.bf16.mxu0 %v3588_v22 }
 0x742   :  { %2249 = vmatmul.mubr.bf16.gmra.mxu1 %v1989_v20  ;;  %2322 = vmatmul.mubr.bf16.gmra.mxu0 %v1989_v20  ;;  %v3754_v40 = vpop.eup %3753  ;;  %v4917_v17 = vadd.f32 %v4849_v57, %v1971_v37  ;;  %v1959_v21 = vmul.f32 %v3752_v12, %v4756_v54  ;;  %v3596_v54 = vld [vmem:[%s5140_s12 + $0xd8] sm:$0xff]  }
 0x743   :  { %2258 = vmatprep.mubr.bf16.mxu1 %v3779_v1  ;;  %2331 = vmatprep.mubr.bf16.mxu0 %v3779_v1  ;;  %v1958_v63 = vmul.f32 %v3754_v40, %v4736_v6 }
 0x744   :  { %3159 = vmatpush3.bf16.msra.mxu1 %v3589_v48  ;;  %3199 = vmatpush3.bf16.msra.mxu0 %v3590_v43  ;;  %v1990_v14 = vpack.c.bf16 %v4917_v17, %v4933_v19  ;;  %v1973_v49 = vmul.f32 %v4842_v8, %v1959_v21 }
 0x745   :  { %3160 = vmatprep.subr.bf16.mxu1 %v3591_v2  ;;  %3200 = vmatprep.subr.bf16.mxu0 %v3592_v9  ;;  %v1972_v6 = vmul.f32 %v4842_v8, %v1958_v63  ;;  %v3603_v8 = vld [vmem:[%s5140_s12 + $0x48] sm:$0xff]  }
 0x746   :  { %v4949_v51 = vadd.f32 %v4849_v57, %v1973_v49 }
 0x747   :  { %v4952_v16 = vadd.f32 %v4849_v57, %v1972_v6  ;;  %v3610_v57 = vld [vmem:[%s5140_s12 + $0x80] sm:$0xff]  }
 0x748   :  { %3161 = vmatpush3.bf16.msra.mxu1 %v3593_v60  ;;  %3201 = vmatpush3.bf16.msra.mxu0 %v3594_v58 }
 0x749   :  { %3162 = vmatprep.subr.bf16.mxu1 %v3595_v4  ;;  %3202 = vmatprep.subr.bf16.mxu0 %v3596_v54  ;;  %v1991_v27 = vpack.c.bf16 %v4949_v51, %v4952_v16 }
 0x74a   :  { %2259 = vmatmul.mubr.bf16.gmra.mxu1 %v1990_v14  ;;  %2332 = vmatmul.mubr.bf16.gmra.mxu0 %v1990_v14 }
 0x74b   :  { %2268 = vmatprep.mubr.bf16.mxu1 %v3779_v1  ;;  %2341 = vmatprep.mubr.bf16.mxu0 %v3779_v1  ;;  %v3600_v1 = vld [vmem:[%s5140_s12 + $0xd0] sm:$0xff]  }
 0x74c   :  { %3163 = vmatpush3.bf16.msra.mxu1 %v3597_v15  ;;  %3203 = vmatpush3.bf16.msra.mxu0 %v3598_v62 }
 0x74d   :  { %3164 = vmatprep.subr.bf16.mxu1 %v3599_v59  ;;  %3204 = vmatprep.subr.bf16.mxu0 %v3600_v1 }
 0x750   :  { %3165 = vmatpush3.bf16.msra.mxu1 %v3601_v25  ;;  %3205 = vmatpush3.bf16.msra.mxu0 %v3602_v39 }
 0x751   :  { %3166 = vmatprep.subr.bf16.mxu1 %v3603_v8  ;;  %3206 = vmatprep.subr.bf16.mxu0 %v3604_v34 }
 0x752   :  { %2269 = vmatmul.mubr.bf16.gmra.mxu1 %v1991_v27  ;;  %2342 = vmatmul.mubr.bf16.gmra.mxu0 %v1991_v27 }
 0x754   :  { %3167 = vmatpush3.bf16.msra.mxu1 %v3605_v42  ;;  %3207 = vmatpush3.bf16.msra.mxu0 %v3606_v33 }
 0x755   :  { %3168 = vmatprep.subr.bf16.mxu1 %v3607_v24  ;;  %3208 = vmatprep.subr.bf16.mxu0 %v3608_v41 }
 0x758   :  { %3169 = vmatpush3.bf16.msra.mxu1 %v3609_v26  ;;  %3209 = vmatpush3.bf16.msra.mxu0 %v3610_v57 }
 0x7fa   :  { %v2240_v46 = vpop.f32.mrf.mxu1  ;;  %v2313_v53 = vpop.f32.mrf.mxu0 }
 0x7fb   :  { %v2241_v22 = vadd.f32 %v2240_v46, %v5005_v44  ;;  %v2314_v52 = vadd.f32 %v2313_v53, %v5007_v29 }
 0x7fc   :  { %v2242_v0 = vpop.f32.mrf.mxu1  ;;  %v2315_v28 = vpop.f32.mrf.mxu0 }
 0x7fd   :  { %v2243_v7 = vadd.f32 %v2242_v0, %v4999_v11  ;;  %v2316_v36 = vadd.f32 %v2315_v28, %v5001_v35  ;;  %v2352_v40 = vmax.f32 %v2241_v22, 0.0  ;;  %v2354_v21 = vmax.f32 %v2314_v52, 0.0 }
 0x7fe   :  { %v2244_v30 = vpop.f32.mrf.mxu1  ;;  %v2317_v3 = vpop.f32.mrf.mxu0 }
 0x7ff   :  { %v2245_v32 = vadd.f32 %v2244_v30, %v5005_v44  ;;  %v2318_v61 = vadd.f32 %v2317_v3, %v5007_v29  ;;  %v2353_v37 = vmax.f32 %v2243_v7, 0.0  ;;  %v2355_v2 = vmax.f32 %v2316_v36, 0.0 }
 0x800   :  { %v2246_v56 = vpop.f32.mrf.mxu1  ;;  %v2319_v18 = vpop.f32.mrf.mxu0 }
 0x801   :  { %v2247_v23 = vadd.f32 %v2246_v56, %v4999_v11  ;;  %v2320_v50 = vadd.f32 %v2319_v18, %v5001_v35  ;;  %v2356_v20 = vmax.f32 %v2245_v32, 0.0  ;;  %v2358_v48 = vmax.f32 %v2318_v61, 0.0 }
 0x802   :  { %v2250_v43 = vpop.f32.mrf.mxu1  ;;  %v2323_v12 = vpop.f32.mrf.mxu0 }
 0x803   :  { %v2357_v9 = vmax.f32 %v2247_v23, 0.0  ;;  %v2359_v10 = vmax.f32 %v2320_v50, 0.0  ;;  %v2384_v63 = vpack.c.bf16 %v2356_v20, %v2352_v40  ;;  %v2386_v14 = vpack.c.bf16 %v2358_v48, %v2354_v21 }
 0x804   :  { %v2252_v60 = vpop.f32.mrf.mxu1  ;;  %v2325_v58 = vpop.f32.mrf.mxu0  ;;  %v2251_v1 = vadd.f32 %v2250_v43, %v5005_v44  ;;  %v2324_v25 = vadd.f32 %v2323_v12, %v5007_v29 }
 0x805   :  { %v2385_v4 = vpack.c.bf16 %v2357_v9, %v2353_v37  ;;  %v2387_v54 = vpack.c.bf16 %v2359_v10, %v2355_v2  ;;  %v2253_v49 = vadd.f32 %v2252_v60, %v4999_v11  ;;  %v2326_v6 = vadd.f32 %v2325_v58, %v5001_v35 }
 0x806   :  { %v2254_v15 = vpop.f32.mrf.mxu1  ;;  %v2327_v62 = vpop.f32.mrf.mxu0  ;;  %v2360_v46 = vmax.f32 %v2251_v1, 0.0  ;;  %v2362_v53 = vmax.f32 %v2324_v25, 0.0 }
 0x807   :  { %v2255_v27 = vadd.f32 %v2254_v15, %v5005_v44  ;;  %v2328_v59 = vadd.f32 %v2327_v62, %v5007_v29  ;;  %2695 = vmatprep.mubr.bf16.mxu1 %v2385_v4  ;;  %2760 = vmatprep.mubr.bf16.mxu0 %v2387_v54  ;;  %v2361_v57 = vmax.f32 %v2253_v49, 0.0  ;;  %v2363_v45 = vmax.f32 %v2326_v6, 0.0 }
 0x808   :  { %v2256_v39 = vpop.f32.mrf.mxu1  ;;  %v2329_v8 = vpop.f32.mrf.mxu0  ;;  %2696 = vmatmul.mubr.bf16.vlgmr.msra.gmra.mxu1 %v2384_v63  ;;  %2761 = vmatmul.mubr.bf16.vlgmr.msra.gmra.mxu0 %v2386_v14 }
 0x809   :  { %v2257_v34 = vadd.f32 %v2256_v39, %v4999_v11  ;;  %v2330_v42 = vadd.f32 %v2329_v8, %v5001_v35  ;;  %v2364_v33 = vmax.f32 %v2255_v27, 0.0  ;;  %v2366_v24 = vmax.f32 %v2328_v59, 0.0 }
 0x80a   :  { %v2260_v41 = vpop.f32.mrf.mxu1  ;;  %v2333_v26 = vpop.f32.mrf.mxu0 }
 0x80b   :  { %v2365_v31 = vmax.f32 %v2257_v34, 0.0  ;;  %v2367_v55 = vmax.f32 %v2330_v42, 0.0  ;;  %v2388_v7 = vpack.c.bf16 %v2364_v33, %v2360_v46  ;;  %v2390_v36 = vpack.c.bf16 %v2366_v24, %v2362_v53 }
 0x80c   :  { %v2262_v0 = vpop.f32.mrf.mxu1  ;;  %v2335_v28 = vpop.f32.mrf.mxu0  ;;  %v2261_v23 = vadd.f32 %v2260_v41, %v5005_v44  ;;  %v2334_v50 = vadd.f32 %v2333_v26, %v5007_v29 }
 0x80d   :  { %v2389_v30 = vpack.c.bf16 %v2365_v31, %v2361_v57  ;;  %v2391_v3 = vpack.c.bf16 %v2367_v55, %v2363_v45  ;;  %v2263_v32 = vadd.f32 %v2262_v0, %v4999_v11  ;;  %v2336_v52 = vadd.f32 %v2335_v28, %v5001_v35 }
 0x80e   :  { %v2264_v61 = vpop.f32.mrf.mxu1  ;;  %v2337_v22 = vpop.f32.mrf.mxu0  ;;  %v2368_v4 = vmax.f32 %v2261_v23, 0.0  ;;  %v2370_v54 = vmax.f32 %v2334_v50, 0.0 }
 0x80f   :  { %v2265_v56 = vadd.f32 %v2264_v61, %v5005_v44  ;;  %v2338_v18 = vadd.f32 %v2337_v22, %v5007_v29  ;;  %2703 = vmatprep.mubr.bf16.mxu1 %v2389_v30  ;;  %2768 = vmatprep.mubr.bf16.mxu0 %v2391_v3  ;;  %v2369_v40 = vmax.f32 %v2263_v32, 0.0  ;;  %v2371_v21 = vmax.f32 %v2336_v52, 0.0 }
 0x810   :  { %v2266_v20 = vpop.f32.mrf.mxu1  ;;  %v2339_v48 = vpop.f32.mrf.mxu0  ;;  %2704 = vmatmul.mubr.bf16.gmra.mxu1 %v2388_v7  ;;  %2769 = vmatmul.mubr.bf16.gmra.mxu0 %v2390_v36 }
 0x811   :  { %v2267_v43 = vadd.f32 %v2266_v20, %v4999_v11  ;;  %v2340_v12 = vadd.f32 %v2339_v48, %v5001_v35  ;;  %v2372_v37 = vmax.f32 %v2265_v56, 0.0  ;;  %v2374_v2 = vmax.f32 %v2338_v18, 0.0 }
 0x812   :  { %v2270_v9 = vpop.f32.mrf.mxu1  ;;  %v2343_v10 = vpop.f32.mrf.mxu0 }
 0x813   :  { %v2373_v60 = vmax.f32 %v2267_v43, 0.0  ;;  %v2375_v58 = vmax.f32 %v2340_v12, 0.0  ;;  %v2392_v62 = vpack.c.bf16 %v2372_v37, %v2368_v4  ;;  %v2394_v6 = vpack.c.bf16 %v2374_v2, %v2370_v54 }
 0x814   :  { %v2272_v63 = vpop.f32.mrf.mxu1  ;;  %v2345_v14 = vpop.f32.mrf.mxu0  ;;  %v2271_v34 = vadd.f32 %v2270_v9, %v5005_v44  ;;  %v2344_v42 = vadd.f32 %v2343_v10, %v5007_v29 }
 0x815   :  { %v2393_v49 = vpack.c.bf16 %v2373_v60, %v2369_v40  ;;  %v2395_v15 = vpack.c.bf16 %v2375_v58, %v2371_v21  ;;  %v2273_v27 = vadd.f32 %v2272_v63, %v4999_v11  ;;  %v2346_v25 = vadd.f32 %v2345_v14, %v5001_v35 }
 0x816   :  { %v2274_v59 = vpop.f32.mrf.mxu1  ;;  %v2347_v1 = vpop.f32.mrf.mxu0  ;;  %v2376_v0 = vmax.f32 %v2271_v34, 0.0  ;;  %v2378_v28 = vmax.f32 %v2344_v42, 0.0 }
 0x817   :  { %v2275_v39 = vadd.f32 %v2274_v59, %v5005_v44  ;;  %v2348_v8 = vadd.f32 %v2347_v1, %v5007_v29  ;;  %2711 = vmatprep.mubr.bf16.mxu1 %v2393_v49  ;;  %2776 = vmatprep.mubr.bf16.mxu0 %v2395_v15  ;;  %v2377_v31 = vmax.f32 %v2273_v27, 0.0  ;;  %v2379_v55 = vmax.f32 %v2346_v25, 0.0 }
 0x818   :  { %v2276_v33 = vpop.f32.mrf.mxu1  ;;  %v2349_v24 = vpop.f32.mrf.mxu0  ;;  %2712 = vmatmul.mubr.bf16.gmra.mxu1 %v2392_v62  ;;  %2777 = vmatmul.mubr.bf16.gmra.mxu0 %v2394_v6 }
 0x819   :  { %v2277_v41 = vadd.f32 %v2276_v33, %v4999_v11  ;;  %v2350_v26 = vadd.f32 %v2349_v24, %v5001_v35  ;;  %v2380_v57 = vmax.f32 %v2275_v39, 0.0  ;;  %v2382_v45 = vmax.f32 %v2348_v8, 0.0  ;;  %v5044_v35 = vld [vmem:[%s5144_s13] ss:$0 sm:$0xff] }
 0x81b   :  { %v2381_v46 = vmax.f32 %v2277_v41, 0.0  ;;  %v2383_v53 = vmax.f32 %v2350_v26, 0.0  ;;  %v2396_v3 = vpack.c.bf16 %v2380_v57, %v2376_v0  ;;  %v2398_v29 = vpack.c.bf16 %v2382_v45, %v2378_v28 }
 0x81d   :  { %v2397_v30 = vpack.c.bf16 %v2381_v46, %v2377_v31  ;;  %v2399_v44 = vpack.c.bf16 %v2383_v53, %v2379_v55 }
 0x81f   :  { %2719 = vmatprep.mubr.bf16.mxu1 %v2397_v30  ;;  %2784 = vmatprep.mubr.bf16.mxu0 %v2399_v44 }
 0x820   :  { %2720 = vmatmul.mubr.bf16.gmra.mxu1 %v2396_v3  ;;  %2785 = vmatmul.mubr.bf16.gmra.mxu0 %v2398_v29 }
 0x8c8   :  { %v3170_v7 = vpop.f32.mrf.mxu1  ;;  %v3210_v11 = vpop.f32.mrf.mxu0 }
 0x8ca   :  { %v3171_v36 = vpop.f32.mrf.mxu1  ;;  %v3211_v32 = vpop.f32.mrf.mxu0 }
 0x8cb   :  { %v3172_v61 = vadd.f32 %v3171_v36, %v3170_v7  ;;  %v3212_v18 = vadd.f32 %v3211_v32, %v3210_v11 }
 0x8cc   :  { %v3173_v22 = vpop.f32.mrf.mxu1  ;;  %v3213_v52 = vpop.f32.mrf.mxu0 }
 0x8cd   :  { %v2698_v56 = vadd.f32 %v3172_v61, %v5044_v35 }
 0x8ce   :  { %v3174_v23 = vpop.f32.mrf.mxu1  ;;  %v3214_v50 = vpop.f32.mrf.mxu0 }
 0x8cf   :  { %v2763_v20 = vadd.f32 %v3212_v18, %v2698_v56  ;;  %v3175_v48 = vadd.f32 %v3174_v23, %v3173_v22  ;;  %v3215_v2 = vadd.f32 %v3214_v50, %v3213_v52 }
 0x8d0   :  { %v3176_v43 = vpop.f32.mrf.mxu1  ;;  %v3216_v12 = vpop.f32.mrf.mxu0 }
 0x8d1   :  { %v2701_v37 = vadd.f32 %v3175_v48, %v5044_v35  ;;  %v5049_v9 = vadd.f32 %v2763_v20, %v4853_v47 }
 0x8d2   :  { %v3177_v10 = vpop.f32.mrf.mxu1  ;;  %v3217_v40 = vpop.f32.mrf.mxu0 }
 0x8d3   :  { %v2766_v21 = vadd.f32 %v3215_v2, %v2701_v37  ;;  %v3178_v60 = vadd.f32 %v3177_v10, %v3176_v43  ;;  %2803 = vadd.xlane.f32.xlu0 %v5049_v9  ;;  %v3218_v63 = vadd.f32 %v3217_v40, %v3216_v12 }
 0x8d4   :  { %v3179_v58 = vpop.f32.mrf.mxu1  ;;  %v3219_v4 = vpop.f32.mrf.mxu0 }
 0x8d5   :  { %v2706_v54 = vadd.f32 %v3178_v60, %v5044_v35  ;;  %v2794_v14 = vadd.f32 %v2766_v21, %v4856_v38 }
 0x8d6   :  { %v3180_v49 = vpop.f32.mrf.mxu1  ;;  %v3220_v15 = vpop.f32.mrf.mxu0 }
 0x8d7   :  { %v2771_v62 = vadd.f32 %v3218_v63, %v2706_v54  ;;  %v3181_v6 = vadd.f32 %v3180_v49, %v3179_v58  ;;  %2805 = vadd.xlane.f32.xlu1 %v2794_v14  ;;  %v3221_v1 = vadd.f32 %v3220_v15, %v3219_v4 }
 0x8d8   :  { %v3182_v47 = vpop.f32.mrf.mxu1  ;;  %v3222_v27 = vpop.f32.mrf.mxu0 }
 0x8d9   :  { %v2709_v59 = vadd.f32 %v3181_v6, %v5044_v35  ;;  %v2795_v25 = vadd.f32 %v2771_v62, %v4879_v5 }
 0x8da   :  { %v3183_v39 = vpop.f32.mrf.mxu1  ;;  %v3223_v8 = vpop.f32.mrf.mxu0 }
 0x8db   :  { %v2774_v34 = vadd.f32 %v3221_v1, %v2709_v59  ;;  %v3184_v42 = vadd.f32 %v3183_v39, %v3182_v47  ;;  %2807 = vadd.xlane.f32.xlu0 %v2795_v25  ;;  %v3224_v41 = vadd.f32 %v3223_v8, %v3222_v27 }
 0x8dc   :  { %v3185_v33 = vpop.f32.mrf.mxu1  ;;  %v3225_v24 = vpop.f32.mrf.mxu0 }
 0x8dd   :  { %v2714_v38 = vadd.f32 %v3184_v42, %v5044_v35  ;;  %v2796_v26 = vadd.f32 %v2774_v34, %v4882_v13 }
 0x8de   :  { %v3186_v57 = vpop.f32.mrf.mxu1  ;;  %v3226_v45 = vpop.f32.mrf.mxu0 }
 0x8df   :  { %v2779_v31 = vadd.f32 %v3224_v41, %v2714_v38  ;;  %v3187_v55 = vadd.f32 %v3186_v57, %v3185_v33  ;;  %2809 = vadd.xlane.f32.xlu1 %v2796_v26  ;;  %v3227_v0 = vadd.f32 %v3226_v45, %v3225_v24 }
 0x8e0   :  { %v3188_v46 = vpop.f32.mrf.mxu1  ;;  %v3228_v53 = vpop.f32.mrf.mxu0 }
 0x8e1   :  { %v2717_v5 = vadd.f32 %v3187_v55, %v5044_v35  ;;  %v2797_v28 = vadd.f32 %v2779_v31, %v4933_v19 }
 0x8e2   :  { %v3189_v30 = vpop.f32.mrf.mxu1  ;;  %v3229_v44 = vpop.f32.mrf.mxu0 }
 0x8e3   :  { %v2782_v3 = vadd.f32 %v3227_v0, %v2717_v5  ;;  %v3190_v29 = vadd.f32 %v3189_v30, %v3188_v46  ;;  %2811 = vadd.xlane.f32.xlu0 %v2797_v28  ;;  %v3230_v36 = vadd.f32 %v3229_v44, %v3228_v53  ;;  %v3064_v44 = vld [vmem:[%s5145_s14] ss:$0 sm:$0xff] }
 0x8e4   :  { %v3191_v7 = vpop.f32.mrf.mxu1  ;;  %v3231_v11 = vpop.f32.mrf.mxu0 }
 0x8e5   :  { %v2722_v13 = vadd.f32 %v3190_v29, %v5044_v35  ;;  %v2798_v32 = vadd.f32 %v2782_v3, %v4917_v17 }
 0x8e6   :  { %v3192_v61 = vpop.f32.mrf.mxu1  ;;  %v3232_v22 = vpop.f32.mrf.mxu0 }
 0x8e7   :  { %v2787_v52 = vadd.f32 %v3230_v36, %v2722_v13  ;;  %v3193_v56 = vadd.f32 %v3192_v61, %v3191_v7  ;;  %2813 = vadd.xlane.f32.xlu1 %v2798_v32  ;;  %v3233_v19 = vadd.f32 %v3232_v22, %v3231_v11  ;;  %v3065_v7 = vld [vmem:[%s5146_s15] ss:$0 sm:$0xff] }
 0x8e9   :  { %v2725_v18 = vadd.f32 %v3193_v56, %v5044_v35  ;;  %v2799_v23 = vadd.f32 %v2787_v52, %v4952_v16 }
 0x8eb   :  { %v2790_v50 = vadd.f32 %v3233_v19, %v2725_v18  ;;  %2815 = vadd.xlane.f32.xlu0 %v2799_v23 }
 0x8ed   :  { %v2800_v20 = vadd.f32 %v2790_v50, %v4949_v51 }
 0x8ef   :  { %2817 = vadd.xlane.f32.xlu1 %v2800_v20 }
 0x95c   :  { %v2804_v48 = vpop.xlane.xlu0 %2803 }
 0x95d   :  { %v2819_v43 = vmul.f32 0.0078125, %v2804_v48 }
 0x95f   :  { %v2827_v12 = vsub.f32 %v5049_v9, %v2819_v43 }
 0x960   :  { %v2806_v17 = vpop.xlane.xlu1 %2805 }
 0x961   :  { %v2820_v37 = vmul.f32 0.0078125, %v2806_v17  ;;  %v2835_v2 = vmul.f32 %v2827_v12, %v2827_v12 }
 0x963   :  { %v5066_v10 = vsub.f32 %v2794_v14, %v2820_v37  ;;  %2843 = vadd.xlane.f32.xlu0 %v2835_v2 }
 0x964   :  { %v2808_v40 = vpop.xlane.xlu0 %2807 }
 0x965   :  { %v2821_v35 = vmul.f32 0.0078125, %v2808_v40  ;;  %v2836_v16 = vmul.f32 %v5066_v10, %v5066_v10 }
 0x967   :  { %v5070_v21 = vsub.f32 %v2795_v25, %v2821_v35  ;;  %2845 = vadd.xlane.f32.xlu1 %v2836_v16 }
 0x968   :  { %v2810_v51 = vpop.xlane.xlu1 %2809 }
 0x969   :  { %v2822_v60 = vmul.f32 0.0078125, %v2810_v51  ;;  %v2837_v58 = vmul.f32 %v5070_v21, %v5070_v21 }
 0x96b   :  { %v5074_v9 = vsub.f32 %v2796_v26, %v2822_v60  ;;  %2847 = vadd.xlane.f32.xlu0 %v2837_v58 }
 0x96c   :  { %v2812_v4 = vpop.xlane.xlu0 %2811 }
 0x96d   :  { %v2823_v54 = vmul.f32 0.0078125, %v2812_v4  ;;  %v2838_v63 = vmul.f32 %v5074_v9, %v5074_v9 }
 0x96f   :  { %v5078_v14 = vsub.f32 %v2797_v28, %v2823_v54  ;;  %2849 = vadd.xlane.f32.xlu1 %v2838_v63 }
 0x970   :  { %v2814_v49 = vpop.xlane.xlu1 %2813 }
 0x971   :  { %v2824_v15 = vmul.f32 0.0078125, %v2814_v49  ;;  %v2839_v62 = vmul.f32 %v5078_v14, %v5078_v14 }
 0x973   :  { %v5082_v6 = vsub.f32 %v2798_v32, %v2824_v15  ;;  %2851 = vadd.xlane.f32.xlu0 %v2839_v62 }
 0x974   :  { %v2816_v47 = vpop.xlane.xlu0 %2815 }
 0x975   :  { %v2825_v27 = vmul.f32 0.0078125, %v2816_v47  ;;  %v2840_v59 = vmul.f32 %v5082_v6, %v5082_v6 }
 0x977   :  { %v5086_v1 = vsub.f32 %v2799_v23, %v2825_v27  ;;  %2853 = vadd.xlane.f32.xlu1 %v2840_v59 }
 0x978   :  { %v2818_v25 = vpop.xlane.xlu1 %2817 }
 0x979   :  { %v2826_v39 = vmul.f32 0.0078125, %v2818_v25  ;;  %v2841_v8 = vmul.f32 %v5086_v1, %v5086_v1 }
 0x97b   :  { %v5090_v34 = vsub.f32 %v2800_v20, %v2826_v39  ;;  %2855 = vadd.xlane.f32.xlu0 %v2841_v8 }
 0x97d   :  { %v2842_v42 = vmul.f32 %v5090_v34, %v5090_v34 }
 0x97f   :  { %2857 = vadd.xlane.f32.xlu1 %v2842_v42 }
 0x9ec   :  { %v2844_v33 = vpop.xlane.xlu0 %2843 }
 0x9ed   :  { %v2859_v24 = vmul.f32 0.0078125, %v2844_v33 }
 0x9ef   :  { %v2867_v38 = vadd.f32 1e-05, %v2859_v24 }
 0x9f0   :  { %v2846_v41 = vpop.xlane.xlu1 %2845 }
 0x9f1   :  { %3755 = vrsqrt.f32 %v2867_v38  ;;  %v2860_v26 = vmul.f32 0.0078125, %v2846_v41 }
 0x9f3   :  { %v2868_v57 = vadd.f32 1e-05, %v2860_v26 }
 0x9f4   :  { %v2848_v45 = vpop.xlane.xlu0 %2847 }
 0x9f5   :  { %3757 = vrsqrt.f32 %v2868_v57  ;;  %v2861_v31 = vmul.f32 0.0078125, %v2848_v45 }
 0x9f7   :  { %v2869_v55 = vadd.f32 1e-05, %v2861_v31 }
 0x9f8   :  { %v2850_v46 = vpop.xlane.xlu1 %2849 }
 0x9f9   :  { %3759 = vrsqrt.f32 %v2869_v55  ;;  %v2862_v53 = vmul.f32 0.0078125, %v2850_v46 }
 0x9fb   :  { %v2870_v5 = vadd.f32 1e-05, %v2862_v53 }
 0x9fc   :  { %v2852_v0 = vpop.xlane.xlu0 %2851 }
 0x9fd   :  { %3761 = vrsqrt.f32 %v2870_v5  ;;  %v2863_v28 = vmul.f32 0.0078125, %v2852_v0 }
 0x9fe   :  { %v3756_v30 = vpop.eup %3755 }
 0x9ff   :  { %v2883_v3 = vmul.f32 %v3756_v30, %v2827_v12  ;;  %v2871_v29 = vadd.f32 1e-05, %v2863_v28 }
 0xa00   :  { %v2854_v11 = vpop.xlane.xlu1 %2853 }
 0xa01   :  { %v2897_v13 = vmul.f32 %v3064_v44, %v2883_v3  ;;  %3763 = vrsqrt.f32 %v2871_v29  ;;  %v2864_v36 = vmul.f32 0.0078125, %v2854_v11 }
 0xa02   :  { %v3758_v32 = vpop.eup %3757 }
 0xa03   :  { %v2911_v61 = vadd.f32 %v3065_v7, %v2897_v13  ;;  %v2884_v22 = vmul.f32 %v3758_v32, %v5066_v10  ;;  %v2872_v52 = vadd.f32 1e-05, %v2864_v36 }
 0xa04   :  { %v2856_v56 = vpop.xlane.xlu0 %2855 }
 0xa05   :  { %2919 = vst [vmem:[%s5147_s16] sm:$0xff] %v2911_v61  ;;  %v2898_v18 = vmul.f32 %v3064_v44, %v2884_v22  ;;  %3765 = vrsqrt.f32 %v2872_v52  ;;  %v2865_v19 = vmul.f32 0.0078125, %v2856_v56 }
 0xa06   :  { %v3760_v23 = vpop.eup %3759 }
 0xa07   :  { %v2912_v50 = vadd.f32 %v3065_v7, %v2898_v18  ;;  %v2885_v20 = vmul.f32 %v3760_v23, %v5070_v21  ;;  %v2873_v48 = vadd.f32 1e-05, %v2865_v19 }
 0xa08   :  { %v2858_v43 = vpop.xlane.xlu1 %2857 }
 0xa09   :  { %2920 = vst [vmem:[%s5147_s16 + $0x8] sm:$0xff] %v2912_v50  ;;  %v2899_v12 = vmul.f32 %v3064_v44, %v2885_v20  ;;  %3767 = vrsqrt.f32 %v2873_v48  ;;  %v2866_v17 = vmul.f32 0.0078125, %v2858_v43 }
 0xa0a   :  { %v3762_v37 = vpop.eup %3761 }
 0xa0b   :  { %v2913_v2 = vadd.f32 %v3065_v7, %v2899_v12  ;;  %v2886_v10 = vmul.f32 %v3762_v37, %v5074_v9  ;;  %v2874_v40 = vadd.f32 1e-05, %v2866_v17 }
 0xa0d   :  { %2921 = vst [vmem:[%s5147_s16 + $0x10] sm:$0xff] %v2913_v2  ;;  %v2900_v35 = vmul.f32 %v3064_v44, %v2886_v10  ;;  %3769 = vrsqrt.f32 %v2874_v40 }
 0xa0e   :  { %v3764_v16 = vpop.eup %3763 }
 0xa0f   :  { %v2914_v21 = vadd.f32 %v3065_v7, %v2900_v35  ;;  %v2887_v51 = vmul.f32 %v3764_v16, %v5078_v14 }
 0xa11   :  { %2922 = vst [vmem:[%s5147_s16 + $0x18] sm:$0xff] %v2914_v21  ;;  %v2901_v60 = vmul.f32 %v3064_v44, %v2887_v51 }
 0xa12   :  { %v3766_v58 = vpop.eup %3765 }
 0xa13   :  { %v2915_v4 = vadd.f32 %v3065_v7, %v2901_v60  ;;  %v2888_v9 = vmul.f32 %v3766_v58, %v5082_v6 }
 0xa15   :  { %2923 = vst [vmem:[%s5147_s16 + $0x20] sm:$0xff] %v2915_v4  ;;  %v2902_v54 = vmul.f32 %v3064_v44, %v2888_v9 }
 0xa16   :  { %v3768_v63 = vpop.eup %3767 }
 0xa17   :  { %v2916_v49 = vadd.f32 %v3065_v7, %v2902_v54  ;;  %v2889_v15 = vmul.f32 %v3768_v63, %v5086_v1 }
 0xa19   :  { %2924 = vst [vmem:[%s5147_s16 + $0x28] sm:$0xff] %v2916_v49  ;;  %v2903_v14 = vmul.f32 %v3064_v44, %v2889_v15 }
 0xa1a   :  { %v3770_v62 = vpop.eup %3769 }
 0xa1b   :  { %v2917_v47 = vadd.f32 %v3065_v7, %v2903_v14  ;;  %v2890_v27 = vmul.f32 %v3770_v62, %v5090_v34 }
 0xa1d   :  { %2925 = vst [vmem:[%s5147_s16 + $0x30] sm:$0xff] %v2917_v47  ;;  %v2904_v6 = vmul.f32 %v3064_v44, %v2890_v27 }
 0xa1f   :  { %v2918_v59 = vadd.f32 %v3065_v7, %v2904_v6 }
 0xa21   :  { %2926 = vst [vmem:[%s5147_s16 + $0x38] sm:$0xff] %v2918_v59 }

// kernel: stt_forward.11
= control target key start
LH: loop header
LB: loop body
LE: loop exit
PB: predicated region body
PF: predicated region fallthrough
CT: control target
= control target key end

     0   :  { %v3779_v1 = vmov 0   ;;  %v232_v49 = vlaneseq  ;;  %vm566_vm0 = vcmask 261120   ;;  %vm923_vm3 = vcmask 523264   ;;  %s5131_s4 = inlined_call_operand.vmem [shape: bf16[128,256], index: 4, kind: input, shape index: {}]   ;;  %s5132_s2 = inlined_call_operand.vmem [shape: bf16[128,128], index: 2, kind: input, shape index: {}]   ;;  %s5133_s0 = inlined_call_operand.vmem [shape: f32[64,128], index: 0, kind: input, shape index: {}, may-alias: {0,1}]   ;;  %s5134_s1 = inlined_call_operand.vmem [shape: f32[64,128], index: 1, kind: input, shape index: {}, may-alias: {0,1}]   ;;  %s5135_s5 = inlined_call_operand.vmem [shape: f32[1,256], index: 5, kind: input, shape index: {}]   ;;  %s5136_s3 = inlined_call_operand.vmem [shape: f32[1,128], index: 3, kind: input, shape index: {}]   ;;  %s5137_s6 = inlined_call_operand.vmem [shape: bf16[128,128], index: 6, kind: input, shape index: {}]   ;;  %s5138_s7 = inlined_call_operand.vmem [shape: f32[1,128], index: 7, kind: input, shape index: {}]   ;;  %s5139_s10 = inlined_call_operand.vmem [shape: bf16[128,512], index: 10, kind: input, shape index: {}]   ;;  %s5140_s12 = inlined_call_operand.vmem [shape: bf16[512,128], index: 12, kind: input, shape index: {}]   ;;  %s5141_s8 = inlined_call_operand.vmem [shape: f32[1,128], index: 8, kind: input, shape index: {}]   ;;  %s5142_s9 = inlined_call_operand.vmem [shape: f32[1,128], index: 9, kind: input, shape index: {}]   ;;  %s5143_s11 = inlined_call_operand.vmem [shape: f32[1,512], index: 11, kind: input, shape index: {}]   ;;  %s5144_s13 = inlined_call_operand.vmem [shape: f32[1,128], index: 13, kind: input, shape index: {}]   ;;  %s5145_s14 = inlined_call_operand.vmem [shape: f32[1,128], index: 14, kind: input, shape index: {}]   ;;  %s5146_s15 = inlined_call_operand.vmem [shape: f32[1,128], index: 15, kind: input, shape index: {}]   ;;  %s5147_s16 = inlined_call_operand.vmem [shape: f32[64,128], index: 16, kind: output, shape index: {}]  }
   0x1   :  { %5149 = sst [smem:[#allocation2_spill]] %s5131_s4  ;;  %354 = vmatprep.mubr.bf16.mxu1 %v3779_v1  ;;  %v3503_v6 = vld [vmem:[%s5132_s2 + $0x38] sm:$0xff]   ;;  %v3507_v9 = vld [vmem:[%s5132_s2 + $0x30] sm:$0xff]   ;;  %v3511_v10 = vld [vmem:[%s5132_s2 + $0x28] sm:$0xff]   ;;  %s3782_s4 = smov 64   ;;  %vm1712_vm10 = vcmask 785408  }
   0x2   :  { %s5150_s23 = sld [smem:[#allocation2_spill]]  ;;  %3234 = vmatprep.subr.bf16.mxu0 %v3503_v6  ;;  %v3515_v13 = vld [vmem:[%s5132_s2 + $0x20] sm:$0xff]   ;;  %v3519_v16 = vld [vmem:[%s5132_s2 + $0x18] sm:$0xff]   ;;  %v55_v20 = vld [vmem:[%s5133_s0 + $0x8] sm:$0xff]  ;;  %v3996_v52 = vshrl.u32 %v232_v49, 7 }
   0x3   :  { %3235 = vmatpush3.bf16.msra.mxu0 %v3503_v6  ;;  %v54_v19 = vld [vmem:[%s5133_s0] sm:$0xff]  ;;  %v3520_v22 = vld [vmem:[%s5132_s2 + $0x10] sm:$0xff]   ;;  %v3521_v25 = vld [vmem:[%s5132_s2 + $0x8] sm:$0xff]  }
   0x4   :  { %3236 = vmatprep.subr.bf16.mxu0 %v3507_v9  ;;  %v70_v21 = vpack.c.bf16 %v55_v20, %v54_v19  ;;  %v62_v27 = vld [vmem:[%s5134_s1] sm:$0xff]  ;;  %v63_v28 = vld [vmem:[%s5134_s1 + $0x8] sm:$0xff]  ;;  %v56_v31 = vld [vmem:[%s5133_s0 + $0x10] sm:$0xff]  ;;  %v234_v56 = vsub.s32 0, %v3996_v52  ;;  %v238_v61 = vsub.s32 1, %v3996_v52 }
   0x5   :  { %v210_v29 = vpack.c.bf16 %v63_v28, %v62_v27  ;;  %v3522_v30 = vld [vmem:[%s5132_s2] sm:$0xff]   ;;  %v57_v32 = vld [vmem:[%s5133_s0 + $0x18] sm:$0xff]  ;;  %v59_v34 = vld [vmem:[%s5133_s0 + $0x28] sm:$0xff] }
   0x6   :  { %3250 = vmatprep.mubr.bf16.mxu0 %v70_v21  ;;  %v58_v33 = vld [vmem:[%s5133_s0 + $0x20] sm:$0xff]  ;;  %v64_v35 = vld [vmem:[%s5134_s1 + $0x10] sm:$0xff]  ;;  %v65_v36 = vld [vmem:[%s5134_s1 + $0x18] sm:$0xff]  ;;  %v71_v37 = vpack.c.bf16 %v57_v32, %v56_v31 }
   0x7   :  { %3237 = vmatpush3.bf16.msra.mxu0 %v3507_v9  ;;  %v72_v38 = vpack.c.bf16 %v59_v34, %v58_v33  ;;  %v211_v39 = vpack.c.bf16 %v65_v36, %v64_v35  ;;  %v60_v40 = vld [vmem:[%s5133_s0 + $0x30] sm:$0xff]  ;;  %v61_v41 = vld [vmem:[%s5133_s0 + $0x38] sm:$0xff]  ;;  %v66_v42 = vld [vmem:[%s5134_s1 + $0x20] sm:$0xff] }
   0x8   :  { %v3491_v0 = vld [vmem:[%s5150_s23 + $0x74] ss:$8 sps:$4 sm:$0xff]   ;;  %v3493_v2 = vld [vmem:[%s5150_s23 + $0x70] ss:$8 sps:$4 sm:$0xff]   ;;  %v3494_v3 = vld [vmem:[%s5150_s23 + $0x64] ss:$8 sps:$4 sm:$0xff]   ;;  %3238 = vmatprep.subr.bf16.mxu0 %v3511_v10  ;;  %v73_v44 = vpack.c.bf16 %v61_v41, %v60_v40 }
   0x9   :  { %322 = vmatprep.subr.bf16.mxu1 %v3491_v0  ;;  %v3496_v4 = vld [vmem:[%s5150_s23 + $0x60] ss:$8 sps:$4 sm:$0xff]   ;;  %v3497_v5 = vld [vmem:[%s5150_s23 + $0x54] ss:$8 sps:$4 sm:$0xff]   ;;  %v3499_v7 = vld [vmem:[%s5150_s23 + $0x50] ss:$8 sps:$4 sm:$0xff]  }
   0xa   :  { %323 = vmatpush1.bf16.msra.mxu1 %v3493_v2  ;;  %v3500_v8 = vld [vmem:[%s5150_s23 + $0x44] ss:$8 sps:$4 sm:$0xff]   ;;  %v3502_v11 = vld [vmem:[%s5150_s23 + $0x40] ss:$8 sps:$4 sm:$0xff]   ;;  %v3504_v12 = vld [vmem:[%s5150_s23 + $0x34] ss:$8 sps:$4 sm:$0xff]  }
   0xb   :  { %324 = vmatprep.subr.bf16.mxu1 %v3494_v3  ;;  %v3506_v14 = vld [vmem:[%s5150_s23 + $0x30] ss:$8 sps:$4 sm:$0xff]   ;;  %v3508_v15 = vld [vmem:[%s5150_s23 + $0x24] ss:$8 sps:$4 sm:$0xff]   ;;  %3239 = vmatpush3.bf16.msra.mxu0 %v3511_v10  ;;  %v3510_v17 = vld [vmem:[%s5150_s23 + $0x20] ss:$8 sps:$4 sm:$0xff]  }
   0xc   :  { %3240 = vmatprep.subr.bf16.mxu0 %v3515_v13  ;;  %v3512_v18 = vld [vmem:[%s5150_s23 + $0x14] ss:$8 sps:$4 sm:$0xff]   ;;  %v3514_v23 = vld [vmem:[%s5150_s23 + $0x10] ss:$8 sps:$4 sm:$0xff]   ;;  %v3516_v24 = vld [vmem:[%s5150_s23 + $0x4] ss:$8 sps:$4 sm:$0xff]  }
   0xd   :  { %v3518_v26 = vld [vmem:[%s5150_s23] ss:$8 sps:$4 sm:$0xff]   ;;  %v68_v46 = vld [vmem:[%s5134_s1 + $0x30] sm:$0xff]  ;;  %v69_v47 = vld [vmem:[%s5134_s1 + $0x38] sm:$0xff] }
   0xe   :  { %325 = vmatpush1.bf16.msra.mxu1 %v3496_v4  ;;  %v67_v43 = vld [vmem:[%s5134_s1 + $0x28] sm:$0xff]  ;;  %v213_v48 = vpack.c.bf16 %v69_v47, %v68_v46  ;;  %v230_v57 = vld [vmem:[%s5135_s5] sm:$0x3]  ;;  %s3781_s5 = smov 32  }
   0xf   :  { %326 = vmatprep.subr.bf16.mxu1 %v3497_v5  ;;  %3241 = vmatpush3.bf16.msra.mxu0 %v3515_v13  ;;  %v212_v45 = vpack.c.bf16 %v67_v43, %v66_v42  ;;  %v4007_v59 = vld [vmem:[%s5136_s3] ss:$0 sm:$0xff]  ;;  %v235_v0 = vrot.slane %v230_v57, %v234_v56  ;;  %v4015_v5 = vrot.slane %v230_v57, %v238_v61  ;;  %s3780_s3 = smov 96  }
  0x10   :  { %3242 = vmatprep.subr.bf16.mxu0 %v3519_v16 }
  0x12   :  { %327 = vmatpush1.bf16.msra.mxu1 %v3499_v7 }
  0x13   :  { %328 = vmatprep.subr.bf16.mxu1 %v3500_v8  ;;  %3243 = vmatpush3.bf16.msra.mxu0 %v3519_v16 }
  0x14   :  { %3244 = vmatprep.subr.bf16.mxu0 %v3520_v22 }
  0x16   :  { %329 = vmatpush1.bf16.msra.mxu1 %v3502_v11 }
  0x17   :  { %330 = vmatprep.subr.bf16.mxu1 %v3504_v12  ;;  %3245 = vmatpush3.bf16.msra.mxu0 %v3520_v22 }
  0x18   :  { %3246 = vmatprep.subr.bf16.mxu0 %v3521_v25 }
  0x1a   :  { %331 = vmatpush1.bf16.msra.mxu1 %v3506_v14 }
  0x1b   :  { %332 = vmatprep.subr.bf16.mxu1 %v3508_v15  ;;  %3247 = vmatpush3.bf16.msra.mxu0 %v3521_v25 }
  0x1c   :  { %3248 = vmatprep.subr.bf16.mxu0 %v3522_v30 }
  0x1e   :  { %333 = vmatpush1.bf16.msra.mxu1 %v3510_v17 }
  0x1f   :  { %334 = vmatprep.subr.bf16.mxu1 %v3512_v18  ;;  %3249 = vmatpush3.bf16.msra.mxu0 %v3522_v30 }
  0x22   :  { %335 = vmatpush1.bf16.msra.mxu1 %v3514_v23  ;;  %3251 = vmatmul.mubr.bf16.vlgmr.msra.gmra.mxu0 %v71_v37 }
  0x23   :  { %336 = vmatprep.subr.bf16.mxu1 %v3516_v24  ;;  %3254 = vmatprep.mubr.bf16.mxu0 %v72_v38 }
  0x26   :  { %337 = vmatpush1.bf16.msra.mxu1 %v3518_v26 }
  0x29   :  { %355 = vmatmul.mubr.bf16.vlgmr.msra.gmra.mxu1 %v210_v29 }
  0x2a   :  { %364 = vmatprep.mubr.bf16.mxu1 %v3779_v1  ;;  %3255 = vmatmul.mubr.bf16.gmra.mxu0 %v73_v44 }
  0x31   :  { %365 = vmatmul.mubr.bf16.gmra.mxu1 %v211_v39 }
  0x32   :  { %374 = vmatprep.mubr.bf16.mxu1 %v3779_v1 }
  0x39   :  { %375 = vmatmul.mubr.bf16.gmra.mxu1 %v212_v45 }
  0x3a   :  { %384 = vmatprep.mubr.bf16.mxu1 %v3779_v1 }
  0x41   :  { %385 = vmatmul.mubr.bf16.gmra.mxu1 %v213_v48 }
  0xe2   :  { %v3252_v55 = vpop.f32.mrf.mxu0 }
  0xe3   :  { %v188_v21 = vadd.f32 %v3252_v55, %v4007_v59 }
  0xe4   :  { %v179_v60 = vpop.f32.mrf.mxu0 }
  0xe5   :  { %v180_v2 = vadd.f32 %v4007_v59, %v179_v60 }
  0xe6   :  { %v3253_v63 = vpop.f32.mrf.mxu0 }
  0xe7   :  { %v191_v22 = vadd.f32 %v3253_v63, %v4007_v59 }
  0xe8   :  { %v182_v4 = vpop.f32.mrf.mxu0 }
  0xe9   :  { %v356_v50 = vpop.f32.mrf.mxu1  ;;  %v183_v8 = vadd.f32 %v4007_v59, %v182_v4  ;;  %v396_v25 = vpack.c.bf16 %v191_v22, %v188_v21 }
  0xea   :  { %v357_v16 = vadd.f32 %v356_v50, %v235_v0  ;;  %v3256_v35 = vpop.f32.mrf.mxu0 }
  0xeb   :  { %v3993_v51 = vpop.f32.mrf.mxu1  ;;  %v4020_v14 = vpack.c.bf16 %v183_v8, %v180_v2  ;;  %v204_v43 = vadd.f32 %v3256_v35, %v4007_v59 }
  0xec   :  { %v195_v36 = vpop.f32.mrf.mxu0  ;;  %v359_v50 = vadd.f32 %v3993_v51, %v4015_v5 }
  0xed   :  { %v360_v53 = vpop.f32.mrf.mxu1  ;;  %3266 = vmatprep.mubr.msk.bf16.mxu0 %vm566_vm0, %v4020_v14  ;;  %v196_v40 = vadd.f32 %v4007_v59, %v195_v36 }
  0xee   :  { %v361_v9 = vadd.f32 %v360_v53, %v235_v0  ;;  %v3257_v38 = vpop.f32.mrf.mxu0 }
  0xef   :  { %v3998_v54 = vpop.f32.mrf.mxu1  ;;  %v207_v44 = vadd.f32 %v3257_v38, %v4007_v59 }
  0xf0   :  { %v399_v19 = vpack.c.bf16 %v361_v9, %v357_v16  ;;  %v198_v39 = vpop.f32.mrf.mxu0  ;;  %v363_v48 = vadd.f32 %v3998_v54, %v4015_v5 }
  0xf1   :  { %v366_v58 = vpop.f32.mrf.mxu1  ;;  %v199_v42 = vadd.f32 %v4007_v59, %v198_v39  ;;  %v398_v46 = vpack.c.bf16 %v207_v44, %v204_v43  ;;  %v506_v43 = vadd.s32 16, %v3996_v52  ;;  %v521_v44 = vand.u32 127, %v232_v49 }
  0xf2   :  { %v367_v6 = vadd.f32 %v366_v58, %v235_v0  ;;  %v580_v47 = vsel %vm566_vm0, %v399_v19, 0  ;;  %v4067_v53 = vpack.c.bf16 %v363_v48, %v359_v50  ;;  %v507_v48 = vadd.s32 24, %v3996_v52 }
  0xf3   :  { %v368_v62 = vpop.f32.mrf.mxu1  ;;  %v397_v45 = vpack.c.bf16 %v199_v42, %v196_v40  ;;  %v505_v50 = vadd.s32 8, %v3996_v52 }
  0xf4   :  { %v369_v11 = vadd.f32 %v368_v62, %v4015_v5 }
  0xf5   :  { %v370_v3 = vpop.f32.mrf.mxu1 }
  0xf6   :  { %v371_v7 = vadd.f32 %v370_v3, %v235_v0 }
  0xf7   :  { %v372_v10 = vpop.f32.mrf.mxu1 }
  0xf8   :  { %v401_v12 = vpack.c.bf16 %v371_v7, %v367_v6  ;;  %v373_v13 = vadd.f32 %v372_v10, %v4015_v5 }
  0xf9   :  { %v376_v15 = vpop.f32.mrf.mxu1 }
  0xfa   :  { %v4022_v17 = vpack.c.bf16 %v373_v13, %v369_v11  ;;  %441 = vrot.lane.b32.xlu1 %v401_v12, %s3780_s3  ;;  %v377_v31 = vadd.f32 %v376_v15, %v235_v0  ;;  %v583_v41 = vsel %vm566_vm0, %v401_v12, 0 }
  0xfb   :  { %v4027_v18 = vpop.f32.mrf.mxu1 }
  0xfc   :  { %v379_v54 = vadd.f32 %v4027_v18, %v4015_v5 }
  0xfd   :  { %v380_v20 = vpop.f32.mrf.mxu1 }
  0xfe   :  { %439 = vrot.lane.b32.xlu1 %v399_v19, %s3780_s3  ;;  %v381_v27 = vadd.f32 %v380_v20, %v235_v0 }
  0xff   :  { %v382_v23 = vpop.f32.mrf.mxu1 }
 0x100   :  { %v403_v33 = vpack.c.bf16 %v381_v27, %v377_v31  ;;  %v383_v55 = vadd.f32 %v382_v23, %v4015_v5 }
 0x101   :  { %v386_v24 = vpop.f32.mrf.mxu1 }
 0x102   :  { %411 = vrot.lane.b32.xlu1 %v4020_v14, %s3780_s3  ;;  %v387_v29 = vadd.f32 %v386_v24, %v235_v0  ;;  %v586_v37 = vsel %vm566_vm0, %v403_v33, 0  ;;  %v4078_v51 = vpack.c.bf16 %v383_v55, %v379_v54  ;;  %v510_v54 = vadd.s32 48, %v3996_v52 }
 0x103   :  { %v388_v26 = vpop.f32.mrf.mxu1 }
 0x104   :  { %v389_v59 = vadd.f32 %v388_v26, %v4015_v5  ;;  %v518_v49 = vcvt.s32.f32 %v510_v54 }
 0x105   :  { %v390_v28 = vpop.f32.mrf.mxu1 }
 0x106   :  { %v391_v30 = vadd.f32 %v390_v28, %v235_v0  ;;  %413 = vrot.lane.b32.xlu1 %v396_v25, %s3780_s3 }
 0x107   :  { %v392_v57 = vpop.f32.mrf.mxu1 }
 0x108   :  { %v405_v32 = vpack.c.bf16 %v391_v30, %v387_v29  ;;  %v393_v58 = vadd.f32 %v392_v57, %v4015_v5 }
 0x10a   :  { %445 = vrot.lane.b32.xlu0 %v405_v32, %s3780_s3  ;;  %3410 = vmatprep.subr.msk.bf16.mxu0 %vm566_vm0, %v405_v32  ;;  %v589_v34 = vsel %vm566_vm0, %v405_v32, 0  ;;  %v4086_v60 = vpack.c.bf16 %v393_v58, %v389_v59  ;;  %v515_v58 = vcvt.s32.f32 %v507_v48  ;;  %v513_v59 = vcvt.s32.f32 %v505_v50 }
 0x10b   :  { %459 = vrot.lane.b32.xlu1 %v403_v33, %s3781_s5  ;;  %3259 = vmatpush3.bf16.xpose.msra.mxu0 %v589_v34 }
 0x10c   :  { %3411 = vmatprep.subr.msk.bf16.mxu0 %vm566_vm0, %v403_v33 }
 0x10e   :  { %443 = vrot.lane.b32.xlu0 %v403_v33, %s3780_s3 }
 0x10f   :  { %457 = vrot.lane.b32.xlu1 %v401_v12, %s3781_s5 }
 0x112   :  { %453 = vrot.lane.b32.xlu0 %v405_v32, %s3782_s4 }
 0x113   :  { %447 = vrot.lane.b32.xlu1 %v399_v19, %s3782_s4  ;;  %3261 = vmatpush3.bf16.xpose.msra.mxu0 %v586_v37 }
 0x114   :  { %3412 = vmatprep.subr.msk.bf16.mxu0 %vm566_vm0, %v401_v12 }
 0x116   :  { %461 = vrot.lane.b32.xlu0 %v405_v32, %s3781_s5 }
 0x117   :  { %455 = vrot.lane.b32.xlu1 %v399_v19, %s3781_s5 }
 0x11a   :  { %451 = vrot.lane.b32.xlu0 %v403_v33, %s3782_s4 }
 0x11b   :  { %421 = vrot.lane.b32.xlu1 %v396_v25, %s3782_s4  ;;  %3263 = vmatpush3.bf16.xpose.msra.mxu0 %v583_v41 }
 0x11c   :  { %3413 = vmatprep.subr.msk.bf16.mxu0 %vm566_vm0, %v399_v19 }
 0x11e   :  { %449 = vrot.lane.b32.xlu0 %v401_v12, %s3782_s4 }
 0x11f   :  { %429 = vrot.lane.b32.xlu1 %v396_v25, %s3781_s5 }
 0x122   :  { %415 = vrot.lane.b32.xlu0 %v397_v45, %s3780_s3 }
 0x123   :  { %425 = vrot.lane.b32.xlu1 %v398_v46, %s3782_s4  ;;  %3265 = vmatpush3.bf16.xpose.msra.mxu0 %v580_v47  ;;  %v512_v47 = vcvt.s32.f32 %v3996_v52 }
 0x126   :  { %417 = vrot.lane.b32.xlu0 %v398_v46, %s3780_s3 }
 0x127   :  { %433 = vrot.lane.b32.xlu1 %v398_v46, %s3781_s5 }
 0x12a   :  { %419 = vrot.lane.b32.xlu0 %v4020_v14, %s3782_s4  ;;  %3267 = vmatmul.mubr.msk.bf16.vlgmr.msra.gmra.mxu0 %vm566_vm0, %v396_v25 }
 0x12b   :  { %467 = vrot.lane.b32.xlu1 %v4067_v53, %s3780_s3  ;;  %3270 = vmatprep.mubr.msk.bf16.mxu0 %vm566_vm0, %v397_v45 }
 0x12e   :  { %427 = vrot.lane.b32.xlu0 %v4020_v14, %s3781_s5 }
 0x12f   :  { %495 = vrot.lane.b32.xlu1 %v4078_v51, %s3781_s5 }
 0x132   :  { %423 = vrot.lane.b32.xlu0 %v397_v45, %s3782_s4  ;;  %3271 = vmatmul.mubr.msk.bf16.gmra.mxu0 %vm566_vm0, %v398_v46  ;;  %v522_v46 = vcvt.s32.f32 %v521_v44 }
 0x133   :  { %473 = vrot.lane.b32.xlu1 %v4086_v60, %s3780_s3 }
 0x134   :  { %v547_v57 = vadd.f32 0.5, %v522_v46 }
 0x136   :  { %431 = vrot.lane.b32.xlu0 %v397_v45, %s3781_s5  ;;  %v514_v45 = vcvt.s32.f32 %v506_v43 }
 0x138   :  { %v525_v55 = vadd.f32 0.5, %v514_v45 }
 0x13a   :  { %471 = vrot.lane.b32.xlu0 %v4078_v51, %s3780_s3 }
 0x13e   :  { %469 = vrot.lane.b32.xlu0 %v4022_v17, %s3780_s3 }
 0x142   :  { %483 = vrot.lane.b32.xlu0 %v4078_v51, %s3782_s4 }
 0x146   :  { %485 = vrot.lane.b32.xlu0 %v4086_v60, %s3782_s4 }
 0x14a   :  { %497 = vrot.lane.b32.xlu0 %v4086_v60, %s3781_s5 }
 0x16c   :  { %v442_v62 = vpop.permute.xlu1 %441 }
 0x16d   :  { %v672_v12 = vsel %vm566_vm0, %v442_v62, 0 }
 0x170   :  { %v440_v63 = vpop.permute.xlu1 %439 }
 0x171   :  { %v669_v19 = vsel %vm566_vm0, %v440_v63, 0 }
 0x174   :  { %v412_v0 = vpop.permute.xlu1 %411 }
 0x175   :  { %3282 = vmatprep.mubr.msk.bf16.mxu1 %vm566_vm0, %v412_v0  ;;  %v511_v0 = vadd.s32 56, %v3996_v52 }
 0x178   :  { %v414_v5 = vpop.permute.xlu1 %413 }
 0x17c   :  { %v446_v2 = vpop.permute.xlu0 %445 }
 0x17d   :  { %3414 = vmatprep.subr.msk.bf16.mxu1 %vm566_vm0, %v446_v2  ;;  %v678_v3 = vsel %vm566_vm0, %v446_v2, 0  ;;  %v460_v9 = vpop.permute.xlu1 %459 }
 0x17e   :  { %3275 = vmatpush3.bf16.xpose.msra.mxu1 %v678_v3  ;;  %v853_v30 = vsel %vm566_vm0, %v460_v9, 0  ;;  %v526_v3 = vadd.f32 0.5, %v515_v58 }
 0x180   :  { %v444_v4 = vpop.permute.xlu0 %443 }
 0x181   :  { %3415 = vmatprep.subr.msk.bf16.mxu1 %vm566_vm0, %v444_v4  ;;  %v675_v7 = vsel %vm566_vm0, %v444_v4, 0  ;;  %v458_v14 = vpop.permute.xlu1 %457  ;;  %v524_v4 = vadd.f32 0.5, %v513_v59 }
 0x182   :  { %v850_v34 = vsel %vm566_vm0, %v458_v14, 0 }
 0x184   :  { %v454_v6 = vpop.permute.xlu0 %453 }
 0x185   :  { %3418 = vmatprep.subr.msk.bf16.mxu0 %vm566_vm0, %v454_v6  ;;  %v767_v8 = vsel %vm566_vm0, %v454_v6, 0  ;;  %v448_v16 = vpop.permute.xlu1 %447 }
 0x186   :  { %3277 = vmatpush3.bf16.xpose.msra.mxu1 %v675_v7  ;;  %3291 = vmatpush3.bf16.xpose.msra.mxu0 %v767_v8  ;;  %v758_v24 = vsel %vm566_vm0, %v448_v16, 0 }
 0x187   :  { %3416 = vmatprep.subr.msk.bf16.mxu1 %vm566_vm0, %v442_v62  ;;  %v533_v62 = vmul.f32 0.25, %v525_v55 }
 0x188   :  { %v462_v10 = vpop.permute.xlu0 %461 }
 0x189   :  { %v456_v22 = vpop.permute.xlu1 %455  ;;  %v856_v25 = vsel %vm566_vm0, %v462_v10, 0  ;;  %v541_v7 = vfloor.f32 %v533_v62 }
 0x18a   :  { %v847_v37 = vsel %vm566_vm0, %v456_v22, 0 }
 0x18c   :  { %v452_v11 = vpop.permute.xlu0 %451 }
 0x18d   :  { %3419 = vmatprep.subr.msk.bf16.mxu0 %vm566_vm0, %v452_v11  ;;  %v764_v13 = vsel %vm566_vm0, %v452_v11, 0  ;;  %v422_v26 = vpop.permute.xlu1 %421 }
 0x18e   :  { %3279 = vmatpush3.bf16.xpose.msra.mxu1 %v672_v12  ;;  %3293 = vmatpush3.bf16.xpose.msra.mxu0 %v764_v13  ;;  %v534_v12 = vmul.f32 0.25, %v526_v3  ;;  %v532_v13 = vmul.f32 0.25, %v524_v4 }
 0x18f   :  { %3417 = vmatprep.subr.msk.bf16.mxu1 %vm566_vm0, %v440_v63  ;;  %v548_v63 = vmul.f32 0.25, %v547_v57 }
 0x190   :  { %v450_v15 = vpop.permute.xlu0 %449 }
 0x191   :  { %3420 = vmatprep.subr.msk.bf16.mxu0 %vm566_vm0, %v450_v15  ;;  %v761_v20 = vsel %vm566_vm0, %v450_v15, 0  ;;  %v430_v29 = vpop.permute.xlu1 %429  ;;  %v549_v8 = vfloor.f32 %v548_v63 }
 0x193   :  { %vm552_vm1 = vcmp.eq.f32.partialorder %v541_v7, %v549_v8 }
 0x194   :  { %v416_v18 = vpop.permute.xlu0 %415 }
 0x195   :  { %v426_v32 = vpop.permute.xlu1 %425 }
 0x196   :  { %3281 = vmatpush3.bf16.xpose.msra.mxu1 %v669_v19  ;;  %3295 = vmatpush3.bf16.xpose.msra.mxu0 %v761_v20  ;;  %v542_v19 = vfloor.f32 %v534_v12  ;;  %v540_v20 = vfloor.f32 %v532_v13 }
 0x197   :  { %3421 = vmatprep.subr.msk.bf16.mxu0 %vm566_vm0, %v448_v16  ;;  %3422 = vmatprep.subr.msk.bf16.mxu1 %vm566_vm0, %v462_v10  ;;  %v519_v10 = vcvt.s32.f32 %v511_v0 }
 0x198   :  { %v418_v21 = vpop.permute.xlu0 %417  ;;  %vm553_vm4 = vcmp.eq.f32.partialorder %v542_v19, %v549_v8  ;;  %vm551_vm5 = vcmp.eq.f32.partialorder %v540_v20, %v549_v8 }
 0x199   :  { %v434_v39 = vpop.permute.xlu1 %433 }
 0x19c   :  { %v420_v23 = vpop.permute.xlu0 %419 }
 0x19d   :  { %3283 = vmatmul.mubr.msk.bf16.vlgmr.msra.gmra.mxu1 %vm566_vm0, %v414_v5  ;;  %3298 = vmatprep.mubr.msk.bf16.mxu0 %vm566_vm0, %v420_v23  ;;  %v4142_v40 = vpop.permute.xlu1 %467  ;;  %v509_v5 = vadd.s32 40, %v3996_v52 }
 0x19e   :  { %3286 = vmatprep.mubr.msk.bf16.mxu1 %vm566_vm0, %v416_v18  ;;  %3297 = vmatpush3.bf16.xpose.msra.mxu0 %v758_v24  ;;  %v530_v18 = vadd.f32 0.5, %v519_v10 }
 0x19f   :  { %3307 = vmatpush3.bf16.xpose.msra.mxu1 %v856_v25 }
 0x1a0   :  { %3423 = vmatprep.subr.msk.bf16.mxu1 %vm566_vm0, %v460_v9  ;;  %v428_v27 = vpop.permute.xlu0 %427  ;;  %v529_v9 = vadd.f32 0.5, %v518_v49 }
 0x1a1   :  { %v4149_v41 = vpop.permute.xlu1 %495 }
 0x1a2   :  { %v537_v16 = vmul.f32 0.25, %v529_v9 }
 0x1a4   :  { %v424_v28 = vpop.permute.xlu0 %423  ;;  %v545_v25 = vfloor.f32 %v537_v16 }
 0x1a5   :  { %3287 = vmatmul.mubr.msk.bf16.gmra.mxu1 %vm566_vm0, %v418_v21  ;;  %3299 = vmatmul.mubr.msk.bf16.vlgmr.msra.gmra.mxu0 %vm566_vm0, %v422_v26  ;;  %v4154_v42 = vpop.permute.xlu1 %473  ;;  %v538_v26 = vmul.f32 0.25, %v530_v18 }
 0x1a6   :  { %3302 = vmatprep.mubr.msk.bf16.mxu0 %vm566_vm0, %v424_v28  ;;  %3314 = vmatprep.mubr.msk.bf16.mxu1 %vm566_vm0, %v428_v27  ;;  %vm556_vm6 = vcmp.eq.f32.partialorder %v545_v25, %v549_v8 }
 0x1a7   :  { %3309 = vmatpush3.bf16.xpose.msra.mxu1 %v853_v30 }
 0x1a8   :  { %3424 = vmatprep.subr.msk.bf16.mxu1 %vm566_vm0, %v458_v14  ;;  %v432_v31 = vpop.permute.xlu0 %431  ;;  %v517_v14 = vcvt.s32.f32 %v509_v5 }
 0x1aa   :  { %v528_v21 = vadd.f32 0.5, %v517_v14 }
 0x1ac   :  { %v4132_v33 = vpop.permute.xlu0 %471  ;;  %v536_v30 = vmul.f32 0.25, %v528_v21 }
 0x1ad   :  { %3303 = vmatmul.mubr.msk.bf16.gmra.mxu0 %vm566_vm0, %v426_v32 }
 0x1ae   :  { %v544_v44 = vfloor.f32 %v536_v30 }
 0x1af   :  { %3311 = vmatpush3.bf16.xpose.msra.mxu1 %v850_v34 }
 0x1b0   :  { %3425 = vmatprep.subr.msk.bf16.mxu1 %vm566_vm0, %v456_v22  ;;  %v4137_v35 = vpop.permute.xlu0 %469  ;;  %v3783_v22 = vmov -1e+30   ;;  %vm555_vm9 = vcmp.eq.f32.partialorder %v544_v44, %v549_v8 }
 0x1b1   :  { %v4167_v23 = vsel %vm552_vm1, 0.0, %v3783_v22  ;;  %v4181_v43 = vsel %vm551_vm5, 0.0, %v3783_v22  ;;  %v4183_v46 = vsel %vm556_vm6, 0.0, %v3783_v22  ;;  %v4204_v63 = vsel %vm555_vm9, 0.0, %v3783_v22 }
 0x1b4   :  { %v484_v36 = vpop.permute.xlu0 %483 }
 0x1b7   :  { %3313 = vmatpush3.bf16.xpose.msra.mxu1 %v847_v37  ;;  %v546_v37 = vfloor.f32 %v538_v26 }
 0x1b8   :  { %3322 = vmatprep.subr.bf16.mxu1 %v4086_v60  ;;  %v486_v38 = vpop.permute.xlu0 %485 }
 0x1b9   :  { %3354 = vmatprep.subr.bf16.mxu0 %v486_v38  ;;  %vm557_vm8 = vcmp.eq.f32.partialorder %v546_v37, %v549_v8 }
 0x1ba   :  { %3355 = vmatpush3.bf16.msra.mxu0 %v486_v38  ;;  %v4179_v38 = vsel %vm553_vm4, 0.0, %v3783_v22  ;;  %v4200_v59 = vsel %vm557_vm8, 0.0, %v3783_v22 }
 0x1bb   :  { %3356 = vmatprep.subr.bf16.mxu0 %v484_v36 }
 0x1be   :  { %3315 = vmatmul.mubr.msk.bf16.vlgmr.msra.gmra.mxu1 %vm566_vm0, %v430_v29  ;;  %3357 = vmatpush3.bf16.msra.mxu0 %v484_v36 }
 0x1bf   :  { %3318 = vmatprep.mubr.msk.bf16.mxu1 %vm566_vm0, %v432_v31  ;;  %3323 = vmatpush3.bf16.msra.mxu1 %v4086_v60  ;;  %v508_v60 = vadd.s32 32, %v3996_v52 }
 0x1c0   :  { %3324 = vmatprep.subr.bf16.mxu1 %v4078_v51 }
 0x1c1   :  { %v516_v6 = vcvt.s32.f32 %v508_v60 }
 0x1c3   :  { %3325 = vmatpush3.bf16.msra.mxu1 %v4078_v51  ;;  %v523_v51 = vadd.f32 0.5, %v512_v47  ;;  %v527_v15 = vadd.f32 0.5, %v516_v6 }
 0x1c4   :  { %3326 = vmatprep.subr.bf16.mxu1 %v4022_v17 }
 0x1c5   :  { %v531_v2 = vmul.f32 0.25, %v523_v51  ;;  %v535_v24 = vmul.f32 0.25, %v527_v15 }
 0x1c6   :  { %3319 = vmatmul.mubr.msk.bf16.gmra.mxu1 %vm566_vm0, %v434_v39 }
 0x1c7   :  { %3327 = vmatpush3.bf16.msra.mxu1 %v4022_v17  ;;  %v539_v11 = vfloor.f32 %v531_v2  ;;  %v543_v32 = vfloor.f32 %v535_v24 }
 0x1c8   :  { %3328 = vmatprep.subr.bf16.mxu1 %v4067_v53 }
 0x1c9   :  { %vm550_vm2 = vcmp.eq.f32.partialorder %v539_v11, %v549_v8  ;;  %vm554_vm7 = vcmp.eq.f32.partialorder %v543_v32, %v549_v8 }
 0x1ca   :  { %v4169_v28 = vsel %vm550_vm2, 0.0, %v3783_v22  ;;  %v4198_v51 = vsel %vm554_vm7, 0.0, %v3783_v22 }
 0x1cb   :  { %3329 = vmatpush3.bf16.msra.mxu1 %v4067_v53 }
 0x1cc   :  { %3338 = vmatprep.subr.bf16.mxu1 %v4154_v42 }
 0x1ea   :  { %v3268_v27 = vpop.f32.mrf.mxu0 }
 0x1eb   :  { %v4172_v29 = vadd.f32 %v3268_v27, %v4167_v23 }
 0x1ec   :  { %v625_v31 = vpop.f32.mrf.mxu0 }
 0x1ed   :  { %v4175_v34 = vadd.f32 %v625_v31, %v4169_v28  ;;  %v930_v36 = vsel %vm923_vm3, %v4172_v29, -inf }
 0x1ee   :  { %931 = vmax.xlane.f32.xlu0 %v930_v36  ;;  %v3269_v39 = vpop.f32.mrf.mxu0 }
 0x1ef   :  { %v4186_v47 = vadd.f32 %v3269_v39, %v4179_v38  ;;  %v924_v50 = vsel %vm923_vm3, %v4175_v34, -inf }
 0x1f0   :  { %v628_v45 = vpop.f32.mrf.mxu0 }
 0x1f1   :  { %v4189_v48 = vadd.f32 %v628_v45, %v4181_v43  ;;  %v933_v60 = vsel %vm923_vm3, %v4186_v47, -inf }
 0x1f2   :  { %v3272_v55 = vpop.f32.mrf.mxu0  ;;  %925 = vmax.xlane.f32.xlu0 %v924_v50 }
 0x1f3   :  { %v4194_v57 = vadd.f32 %v3272_v55, %v4183_v46  ;;  %v927_v54 = vsel %vm923_vm3, %v4189_v48, -inf }
 0x1f4   :  { %v641_v58 = vpop.f32.mrf.mxu0  ;;  %928 = vmax.xlane.f32.xlu1 %v927_v54 }
 0x1f5   :  { %v4207_v49 = vadd.f32 %v641_v58, %v4198_v51  ;;  %v942_v2 = vsel %vm923_vm3, %v4194_v57, -inf }
 0x1f6   :  { %v3273_v62 = vpop.f32.mrf.mxu0  ;;  %934 = vmax.xlane.f32.xlu0 %v933_v60 }
 0x1f7   :  { %v4210_v0 = vadd.f32 %v3273_v62, %v4200_v59  ;;  %v936_v6 = vsel %vm923_vm3, %v4207_v49, -inf }
 0x1f8   :  { %v644_v3 = vpop.f32.mrf.mxu0  ;;  %943 = vmax.xlane.f32.xlu1 %v942_v2 }
 0x1f9   :  { %v4215_v4 = vadd.f32 %v644_v3, %v4204_v63  ;;  %v945_v5 = vsel %vm923_vm3, %v4210_v0, -inf }
 0x1fa   :  { %946 = vmax.xlane.f32.xlu0 %v945_v5 }
 0x1fb   :  { %v939_v7 = vsel %vm923_vm3, %v4215_v4, -inf }
 0x1fc   :  { %937 = vmax.xlane.f32.xlu1 %v936_v6 }
 0x1fe   :  { %940 = vmax.xlane.f32.xlu0 %v939_v7 }
 0x25d   :  { %v3284_v8 = vpop.f32.mrf.mxu1 }
 0x25e   :  { %v4224_v9 = vadd.f32 %v3284_v8, %v4167_v23 }
 0x25f   :  { %v714_v10 = vpop.f32.mrf.mxu1 }
 0x260   :  { %v954_v11 = vsel %vm923_vm3, %v4224_v9, -inf  ;;  %v4237_v20 = vadd.f32 %v714_v10, %v4169_v28 }
 0x261   :  { %v3285_v12 = vpop.f32.mrf.mxu1  ;;  %955 = vmax.xlane.f32.xlu1 %v954_v11 }
 0x262   :  { %v4229_v13 = vadd.f32 %v3285_v12, %v4179_v38  ;;  %v948_v31 = vsel %vm923_vm3, %v4237_v20, -inf }
 0x263   :  { %v717_v15 = vpop.f32.mrf.mxu1 }
 0x264   :  { %v957_v14 = vsel %vm923_vm3, %v4229_v13, -inf  ;;  %v4245_v27 = vadd.f32 %v717_v15, %v4181_v43 }
 0x265   :  { %v3300_v16 = vpop.f32.mrf.mxu0  ;;  %958 = vmax.xlane.f32.xlu0 %v957_v14  ;;  %v3288_v22 = vpop.f32.mrf.mxu1 }
 0x266   :  { %v4234_v18 = vadd.f32 %v3300_v16, %v4167_v23  ;;  %v4255_v39 = vadd.f32 %v3288_v22, %v4183_v46  ;;  %v951_v50 = vsel %vm923_vm3, %v4245_v27, -inf }
 0x267   :  { %v803_v19 = vpop.f32.mrf.mxu0  ;;  %v730_v36 = vpop.f32.mrf.mxu1 }
 0x268   :  { %v978_v21 = vsel %vm923_vm3, %v4234_v18, -inf  ;;  %v4248_v30 = vadd.f32 %v803_v19, %v4169_v28  ;;  %v966_v62 = vsel %vm923_vm3, %v4255_v39, -inf  ;;  %v4275_v5 = vadd.f32 %v730_v36, %v4198_v51 }
 0x269   :  { %v3301_v24 = vpop.f32.mrf.mxu0  ;;  %979 = vmax.xlane.f32.xlu1 %v978_v21  ;;  %v3289_v55 = vpop.f32.mrf.mxu1 }
 0x26a   :  { %v4242_v25 = vadd.f32 %v3301_v24, %v4179_v38  ;;  %v972_v45 = vsel %vm923_vm3, %v4248_v30, -inf  ;;  %v4265_v58 = vadd.f32 %v3289_v55, %v4200_v59  ;;  %v960_v14 = vsel %vm923_vm3, %v4275_v5, -inf }
 0x26b   :  { %v806_v26 = vpop.f32.mrf.mxu0  ;;  %v733_v10 = vpop.f32.mrf.mxu1 }
 0x26c   :  { %v981_v32 = vsel %vm923_vm3, %v4242_v25, -inf  ;;  %v4258_v44 = vadd.f32 %v806_v26, %v4181_v43  ;;  %v969_v8 = vsel %vm923_vm3, %v4265_v58, -inf  ;;  %v4285_v11 = vadd.f32 %v733_v10, %v4204_v63 }
 0x26d   :  { %v3304_v37 = vpop.f32.mrf.mxu0  ;;  %949 = vmax.xlane.f32.xlu1 %v948_v31  ;;  %982 = vmax.xlane.f32.xlu0 %v981_v32 }
 0x26e   :  { %v4268_v60 = vadd.f32 %v3304_v37, %v4183_v46  ;;  %v975_v2 = vsel %vm923_vm3, %v4258_v44, -inf  ;;  %v963_v31 = vsel %vm923_vm3, %v4285_v11, -inf }
 0x26f   :  { %v819_v54 = vpop.f32.mrf.mxu0 }
 0x270   :  { %v990_v7 = vsel %vm923_vm3, %v4268_v60, -inf  ;;  %v4288_v12 = vadd.f32 %v819_v54, %v4198_v51 }
 0x271   :  { %973 = vmax.xlane.f32.xlu1 %v972_v45  ;;  %952 = vmax.xlane.f32.xlu0 %v951_v50  ;;  %v3305_v3 = vpop.f32.mrf.mxu0 }
 0x272   :  { %v4278_v6 = vadd.f32 %v3305_v3, %v4200_v59  ;;  %v984_v26 = vsel %vm923_vm3, %v4288_v12, -inf }
 0x273   :  { %v822_v16 = vpop.f32.mrf.mxu0 }
 0x274   :  { %v993_v15 = vsel %vm923_vm3, %v4278_v6, -inf  ;;  %v4295_v21 = vadd.f32 %v822_v16, %v4204_v63 }
 0x275   :  { %967 = vmax.xlane.f32.xlu1 %v966_v62  ;;  %976 = vmax.xlane.f32.xlu0 %v975_v2 }
 0x276   :  { %v987_v50 = vsel %vm923_vm3, %v4295_v21, -inf }
 0x279   :  { %991 = vmax.xlane.f32.xlu1 %v990_v7  ;;  %970 = vmax.xlane.f32.xlu0 %v969_v8  ;;  %v4333_v8 = vpop.permute.xlu0 %497 }
 0x27d   :  { %961 = vmax.xlane.f32.xlu1 %v960_v14  ;;  %994 = vmax.xlane.f32.xlu0 %v993_v15  ;;  %v932_v10 = vpop.xlane.xlu0 %931  ;;  %v929_v14 = vpop.xlane.xlu1 %928 }
 0x27e   :  { %v3316_v19 = vpop.f32.mrf.mxu1  ;;  %v1022_v15 = vsub.f32 %v4172_v29, %v932_v10 }
 0x27f   :  { %v4298_v22 = vadd.f32 %v3316_v19, %v4167_v23 }
 0x280   :  { %v892_v24 = vpop.f32.mrf.mxu1 }
 0x281   :  { %985 = vmax.xlane.f32.xlu1 %v984_v26  ;;  %964 = vmax.xlane.f32.xlu0 %v963_v31  ;;  %v4305_v36 = vadd.f32 %v892_v24, %v4169_v28  ;;  %v1002_v23 = vsel %vm923_vm3, %v4298_v22, -inf  ;;  %v944_v24 = vpop.xlane.xlu1 %943  ;;  %v1056_v26 = vmul.f32 1.442695, %v1022_v15 }
 0x282   :  { %v3317_v32 = vpop.f32.mrf.mxu1 }
 0x283   :  { %v4308_v37 = vadd.f32 %v3317_v32, %v4179_v38  ;;  %v996_v28 = vsel %vm923_vm3, %v4305_v36, -inf  ;;  %3611 = vpow2.f32 %v1056_v26 }
 0x284   :  { %v895_v45 = vpop.f32.mrf.mxu1 }
 0x285   :  { %1003 = vmax.xlane.f32.xlu1 %v1002_v23  ;;  %988 = vmax.xlane.f32.xlu0 %v987_v50  ;;  %v4315_v54 = vadd.f32 %v895_v45, %v4181_v43  ;;  %v1005_v38 = vsel %vm923_vm3, %v4308_v37, -inf  ;;  %v1021_v45 = vsub.f32 %v4189_v48, %v929_v14 }
 0x286   :  { %v3320_v55 = vpop.f32.mrf.mxu1 }
 0x287   :  { %v4318_v62 = vadd.f32 %v3320_v55, %v4183_v46  ;;  %v999_v43 = vsel %vm923_vm3, %v4315_v54, -inf  ;;  %v1026_v55 = vsub.f32 %v4194_v57, %v944_v24 }
 0x288   :  { %v908_v2 = vpop.f32.mrf.mxu1 }
 0x289   :  { %997 = vmax.xlane.f32.xlu1 %v996_v28  ;;  %1006 = vmax.xlane.f32.xlu0 %v1005_v38  ;;  %v4325_v3 = vadd.f32 %v908_v2, %v4198_v51  ;;  %v1014_v7 = vsel %vm923_vm3, %v4318_v62, -inf  ;;  %v926_v51 = vpop.xlane.xlu0 %925  ;;  %v1054_v28 = vmul.f32 1.442695, %v1021_v45  ;;  %v1064_v38 = vmul.f32 1.442695, %v1026_v55 }
 0x28a   :  { %v1020_v19 = vsub.f32 %v4175_v34, %v926_v51 }
 0x28b   :  { %v1008_v46 = vsel %vm923_vm3, %v4325_v3, -inf }
 0x28c   :  { %v1052_v32 = vmul.f32 1.442695, %v1020_v19 }
 0x28d   :  { %1015 = vmax.xlane.f32.xlu1 %v1014_v7  ;;  %1000 = vmax.xlane.f32.xlu0 %v999_v43  ;;  %v935_v16 = vpop.xlane.xlu0 %934  ;;  %v3321_v7 = vpop.f32.mrf.mxu1 }
 0x28e   :  { %v1023_v31 = vsub.f32 %v4186_v47, %v935_v16  ;;  %3613 = vpow2.f32 %v1052_v32 }
 0x28f   :  { %v911_v57 = vpop.f32.mrf.mxu1 }
 0x290   :  { %v1058_v50 = vmul.f32 1.442695, %v1023_v31  ;;  %v4355_v51 = vpop.eup %3611 }
 0x291   :  { %1009 = vmax.xlane.f32.xlu1 %v1008_v46  ;;  %v947_v23 = vpop.xlane.xlu0 %946  ;;  %v4348_v46 = vadd.f32 %v3321_v7, %v4200_v59  ;;  %v1122_v59 = vsel %vm923_vm3, %v4355_v51, 0.0 }
 0x292   :  { %v1027_v29 = vsub.f32 %v4210_v0, %v947_v23  ;;  %3615 = vpow2.f32 %v1058_v50  ;;  %v4351_v0 = vadd.f32 %v911_v57, %v4204_v63 }
 0x293   :  { %3617 = vpow2.f32 %v1054_v28 }
 0x294   :  { %v1066_v47 = vmul.f32 1.442695, %v1027_v29  ;;  %3619 = vpow2.f32 %v1064_v38 }
 0x295   :  { %v941_v2 = vpop.xlane.xlu0 %940 }
 0x296   :  { %v1025_v43 = vsub.f32 %v4215_v4, %v941_v2  ;;  %3621 = vpow2.f32 %v1066_v47  ;;  %v1011_v4 = vsel %vm923_vm3, %v4351_v0, -inf }
 0x298   :  { %v1062_v10 = vmul.f32 1.442695, %v1025_v43 }
 0x29b   :  { %v4357_v14 = vpop.eup %3613 }
 0x29c   :  { %v1116_v16 = vsel %vm923_vm3, %v4357_v14, 0.0 }
 0x29f   :  { %v4363_v15 = vpop.eup %3615 }
 0x2a0   :  { %v4365_v63 = vpop.eup %3617  ;;  %v1125_v19 = vsel %vm923_vm3, %v4363_v15, 0.0 }
 0x2a1   :  { %v4371_v24 = vpop.eup %3619  ;;  %v1119_v32 = vsel %vm923_vm3, %v4365_v63, 0.0 }
 0x2a2   :  { %481 = vrot.lane.b32.xlu1 %v4022_v17, %s3782_s4  ;;  %v1134_v31 = vsel %vm923_vm3, %v4371_v24, 0.0 }
 0x2a3   :  { %493 = vrot.lane.b32.xlu0 %v4022_v17, %s3781_s5  ;;  %v938_v17 = vpop.xlane.xlu1 %937  ;;  %v4373_v26 = vpop.eup %3621 }
 0x2a4   :  { %v1024_v34 = vsub.f32 %v4207_v49, %v938_v17  ;;  %v1017_v49 = vsel %vm923_vm3, %v4348_v46, -inf  ;;  %v1137_v50 = vsel %vm923_vm3, %v4373_v26, 0.0 }
 0x2a6   :  { %v1060_v48 = vmul.f32 1.442695, %v1024_v34 }
 0x2a8   :  { %3623 = vpow2.f32 %v1060_v48 }
 0x2a9   :  { %3625 = vpow2.f32 %v1062_v10 }
 0x2b5   :  { %v4379_v45 = vpop.eup %3623 }
 0x2b6   :  { %v1128_v23 = vsel %vm923_vm3, %v4379_v45, 0.0  ;;  %v4385_v55 = vpop.eup %3625 }
 0x2b7   :  { %v1131_v17 = vsel %vm923_vm3, %v4385_v55, 0.0 }
 0x2c2   :  { %1018 = vmax.xlane.f32.xlu0 %v1017_v49 }
 0x2c6   :  { %1123 = vadd.xlane.f32.xlu1 %v1122_v59  ;;  %1012 = vmax.xlane.f32.xlu0 %v1011_v4 }
 0x2ca   :  { %1117 = vadd.xlane.f32.xlu1 %v1116_v16  ;;  %1126 = vadd.xlane.f32.xlu0 %v1125_v19 }
 0x2ce   :  { %1135 = vadd.xlane.f32.xlu1 %v1134_v31  ;;  %1120 = vadd.xlane.f32.xlu0 %v1119_v32 }
 0x2d2   :  { %1129 = vadd.xlane.f32.xlu1 %v1128_v23  ;;  %1138 = vadd.xlane.f32.xlu0 %v1137_v50 }
 0x2d6   :  { %1132 = vadd.xlane.f32.xlu0 %v1131_v17 }
 0x2ea   :  { %v956_v28 = vpop.xlane.xlu1 %955 }
 0x2eb   :  { %v1030_v29 = vsub.f32 %v4224_v9, %v956_v28 }
 0x2ed   :  { %v1072_v38 = vmul.f32 1.442695, %v1030_v29 }
 0x2ee   :  { %v959_v34 = vpop.xlane.xlu0 %958 }
 0x2ef   :  { %3627 = vpow2.f32 %v1072_v38  ;;  %v1031_v10 = vsub.f32 %v4229_v13, %v959_v34 }
 0x2f1   :  { %v1074_v19 = vmul.f32 1.442695, %v1031_v10 }
 0x2f2   :  { %v980_v2 = vpop.xlane.xlu1 %979 }
 0x2f3   :  { %v1038_v7 = vsub.f32 %v4234_v18, %v980_v2 }
 0x2f5   :  { %v1088_v47 = vmul.f32 1.442695, %v1038_v7 }
 0x2f6   :  { %v950_v48 = vpop.xlane.xlu1 %949  ;;  %v983_v43 = vpop.xlane.xlu0 %982 }
 0x2f7   :  { %3629 = vpow2.f32 %v1088_v47  ;;  %v1028_v57 = vsub.f32 %v4237_v20, %v950_v48  ;;  %v1039_v31 = vsub.f32 %v4242_v25, %v983_v43 }
 0x2f9   :  { %v1068_v49 = vmul.f32 1.442695, %v1028_v57  ;;  %v1090_v17 = vmul.f32 1.442695, %v1039_v31 }
 0x2fa   :  { %v974_v59 = vpop.xlane.xlu1 %973  ;;  %v953_v4 = vpop.xlane.xlu0 %952 }
 0x2fb   :  { %3631 = vpow2.f32 %v1068_v49  ;;  %v1036_v9 = vsub.f32 %v4248_v30, %v974_v59  ;;  %v1029_v50 = vsub.f32 %v4245_v27, %v953_v4 }
 0x2fc   :  { %v4394_v16 = vpop.eup %3627 }
 0x2fd   :  { %v1084_v18 = vmul.f32 1.442695, %v1036_v9  ;;  %v1146_v32 = vsel %vm923_vm3, %v4394_v16, 0.0  ;;  %v1070_v25 = vmul.f32 1.442695, %v1029_v50 }
 0x2fe   :  { %v968_v23 = vpop.xlane.xlu1 %967  ;;  %1147 = vadd.xlane.f32.xlu1 %v1146_v32  ;;  %v977_v20 = vpop.xlane.xlu0 %976 }
 0x2ff   :  { %3633 = vpow2.f32 %v1084_v18  ;;  %v1034_v13 = vsub.f32 %v4255_v39, %v968_v23  ;;  %v1037_v34 = vsub.f32 %v4258_v44, %v977_v20 }
 0x300   :  { %3635 = vpow2.f32 %v1074_v19 }
 0x301   :  { %v1080_v30 = vmul.f32 1.442695, %v1034_v13  ;;  %v1086_v48 = vmul.f32 1.442695, %v1037_v34 }
 0x302   :  { %v992_v28 = vpop.xlane.xlu1 %991  ;;  %v971_v29 = vpop.xlane.xlu0 %970 }
 0x303   :  { %3637 = vpow2.f32 %v1080_v30  ;;  %v1042_v43 = vsub.f32 %v4268_v60, %v992_v28  ;;  %v1035_v23 = vsub.f32 %v4265_v58, %v971_v29 }
 0x304   :  { %v4401_v38 = vpop.eup %3629  ;;  %3639 = vpow2.f32 %v1090_v17 }
 0x305   :  { %v1170_v2 = vsel %vm923_vm3, %v4401_v38, 0.0  ;;  %3641 = vpow2.f32 %v1070_v25  ;;  %v1082_v28 = vmul.f32 1.442695, %v1035_v23 }
 0x306   :  { %v962_v7 = vpop.xlane.xlu1 %961  ;;  %1171 = vadd.xlane.f32.xlu0 %v1170_v2  ;;  %v995_v39 = vpop.xlane.xlu0 %994 }
 0x307   :  { %v1032_v47 = vsub.f32 %v4275_v5, %v962_v7  ;;  %v1096_v5 = vmul.f32 1.442695, %v1042_v43  ;;  %v1043_v58 = vsub.f32 %v4278_v6, %v995_v39 }
 0x308   :  { %v4407_v27 = vpop.eup %3631 }
 0x309   :  { %v1076_v57 = vmul.f32 1.442695, %v1032_v47  ;;  %v1140_v10 = vsel %vm923_vm3, %v4407_v27, 0.0  ;;  %v1098_v47 = vmul.f32 1.442695, %v1043_v58 }
 0x30a   :  { %v986_v49 = vpop.xlane.xlu1 %985  ;;  %1141 = vadd.xlane.f32.xlu1 %v1140_v10  ;;  %v965_v44 = vpop.xlane.xlu0 %964 }
 0x30b   :  { %3643 = vpow2.f32 %v1076_v57  ;;  %v1040_v9 = vsub.f32 %v4288_v12, %v986_v49 }
 0x30c   :  { %v4412_v59 = vpop.eup %3633  ;;  %3645 = vpow2.f32 %v1086_v48 }
 0x30d   :  { %v4414_v4 = vpop.eup %3635  ;;  %v1164_v19 = vsel %vm923_vm3, %v4412_v59, 0.0  ;;  %3647 = vpow2.f32 %v1096_v5  ;;  %v1092_v13 = vmul.f32 1.442695, %v1040_v9 }
 0x30e   :  { %v1004_v60 = vpop.xlane.xlu1 %1003  ;;  %1165 = vadd.xlane.f32.xlu0 %v1164_v19  ;;  %v989_v31 = vpop.xlane.xlu0 %988  ;;  %v1149_v20 = vsel %vm923_vm3, %v4414_v4, 0.0 }
 0x30f   :  { %v1041_v18 = vsub.f32 %v4295_v21, %v989_v31  ;;  %v1046_v57 = vsub.f32 %v4298_v22, %v1004_v60 }
 0x310   :  { %v4420_v32 = vpop.eup %3637 }
 0x311   :  { %v1094_v50 = vmul.f32 1.442695, %v1041_v18  ;;  %v1158_v12 = vsel %vm923_vm3, %v4420_v32, 0.0  ;;  %v4427_v17 = vpop.eup %3639  ;;  %v1104_v9 = vmul.f32 1.442695, %v1046_v57 }
 0x312   :  { %v998_v30 = vpop.xlane.xlu1 %997  ;;  %1159 = vadd.xlane.f32.xlu1 %v1158_v12  ;;  %1150 = vadd.xlane.f32.xlu0 %v1149_v20  ;;  %v4430_v25 = vpop.eup %3641  ;;  %v1173_v34 = vsel %vm923_vm3, %v4427_v17, 0.0 }
 0x313   :  { %v1044_v21 = vsub.f32 %v4305_v36, %v998_v30  ;;  %3649 = vpow2.f32 %v1094_v50  ;;  %v1033_v36 = vsub.f32 %v4285_v11, %v965_v44  ;;  %v1143_v6 = vsel %vm923_vm3, %v4430_v25, 0.0  ;;  %v1007_v10 = vpop.xlane.xlu0 %1006 }
 0x314   :  { %3651 = vpow2.f32 %v1092_v13  ;;  %v1047_v31 = vsub.f32 %v4308_v37, %v1007_v10 }
 0x315   :  { %v1100_v29 = vmul.f32 1.442695, %v1044_v21  ;;  %v1078_v49 = vmul.f32 1.442695, %v1033_v36 }
 0x316   :  { %v1016_v2 = vpop.xlane.xlu1 %1015  ;;  %1174 = vadd.xlane.f32.xlu0 %v1173_v34  ;;  %v1106_v50 = vmul.f32 1.442695, %v1047_v31 }
 0x317   :  { %3653 = vpow2.f32 %v1100_v29  ;;  %v1001_v18 = vpop.xlane.xlu0 %1000  ;;  %v1050_v21 = vsub.f32 %v4318_v62, %v1016_v2 }
 0x318   :  { %v4435_v7 = vpop.eup %3643  ;;  %3655 = vpow2.f32 %v1082_v28  ;;  %v1045_v12 = vsub.f32 %v4315_v54, %v1001_v18 }
 0x319   :  { %v1152_v48 = vsel %vm923_vm3, %v4435_v7, 0.0  ;;  %v4442_v39 = vpop.eup %3645  ;;  %3657 = vpow2.f32 %v1098_v47  ;;  %v1112_v34 = vmul.f32 1.442695, %v1050_v21 }
 0x31a   :  { %v1010_v43 = vpop.xlane.xlu1 %1009  ;;  %1153 = vadd.xlane.f32.xlu1 %v1152_v48  ;;  %1144 = vadd.xlane.f32.xlu0 %v1143_v6  ;;  %v1167_v5 = vsel %vm923_vm3, %v4442_v39, 0.0  ;;  %v4447_v11 = vpop.eup %3647  ;;  %3659 = vpow2.f32 %v1078_v49  ;;  %v1102_v28 = vmul.f32 1.442695, %v1045_v12 }
 0x31b   :  { %v1182_v22 = vsel %vm923_vm3, %v4447_v11, 0.0  ;;  %3661 = vpow2.f32 %v1104_v9  ;;  %v1048_v54 = vsub.f32 %v4325_v3, %v1010_v43  ;;  %v4499_v31 = vpop.permute.xlu0 %493 }
 0x31c   :  { %3663 = vpow2.f32 %v1106_v50 }
 0x31d   :  { %3665 = vpow2.f32 %v1102_v28  ;;  %v1108_v62 = vmul.f32 1.442695, %v1048_v54 }
 0x31e   :  { %v482_v44 = vpop.permute.xlu1 %481  ;;  %1168 = vadd.xlane.f32.xlu0 %v1167_v5  ;;  %3667 = vpow2.f32 %v1112_v34 }
 0x31f   :  { %3358 = vmatprep.subr.bf16.mxu0 %v482_v44  ;;  %3669 = vpow2.f32 %v1108_v62 }
 0x320   :  { %3359 = vmatpush3.bf16.msra.mxu0 %v482_v44  ;;  %v4449_v19 = vpop.eup %3649 }
 0x321   :  { %v4454_v60 = vpop.eup %3651  ;;  %v1179_v23 = vsel %vm923_vm3, %v4449_v19, 0.0 }
 0x322   :  { %1183 = vadd.xlane.f32.xlu0 %v1182_v22  ;;  %1180 = vadd.xlane.f32.xlu1 %v1179_v23  ;;  %v1176_v37 = vsel %vm923_vm3, %v4454_v60, 0.0 }
 0x324   :  { %v4458_v20 = vpop.eup %3653 }
 0x325   :  { %v4460_v13 = vpop.eup %3655  ;;  %v1188_v30 = vsel %vm923_vm3, %v4458_v20, 0.0 }
 0x326   :  { %1177 = vadd.xlane.f32.xlu0 %v1176_v37  ;;  %1189 = vadd.xlane.f32.xlu1 %v1188_v30  ;;  %v1161_v58 = vsel %vm923_vm3, %v4460_v13, 0.0  ;;  %v4470_v29 = vpop.eup %3657 }
 0x327   :  { %v1185_v47 = vsel %vm923_vm3, %v4470_v29, 0.0  ;;  %v4475_v36 = vpop.eup %3659 }
 0x328   :  { %v4477_v48 = vpop.eup %3661  ;;  %v1155_v2 = vsel %vm923_vm3, %v4475_v36, 0.0 }
 0x329   :  { %v1194_v6 = vsel %vm923_vm3, %v4477_v48, 0.0  ;;  %v4483_v57 = vpop.eup %3663 }
 0x32a   :  { %1162 = vadd.xlane.f32.xlu0 %v1161_v58  ;;  %v1197_v3 = vsel %vm923_vm3, %v4483_v57, 0.0  ;;  %v4487_v43 = vpop.eup %3665 }
 0x32b   :  { %v1191_v10 = vsel %vm923_vm3, %v4487_v43, 0.0  ;;  %v4491_v49 = vpop.eup %3667 }
 0x32c   :  { %v1206_v5 = vsel %vm923_vm3, %v4491_v49, 0.0  ;;  %v4495_v44 = vpop.eup %3669 }
 0x32d   :  { %v1200_v9 = vsel %vm923_vm3, %v4495_v44, 0.0 }
 0x32e   :  { %1186 = vadd.xlane.f32.xlu0 %v1185_v47 }
 0x332   :  { %1156 = vadd.xlane.f32.xlu0 %v1155_v2 }
 0x336   :  { %1195 = vadd.xlane.f32.xlu0 %v1194_v6 }
 0x33a   :  { %1198 = vadd.xlane.f32.xlu0 %v1197_v3 }
 0x33e   :  { %1192 = vadd.xlane.f32.xlu0 %v1191_v10 }
 0x342   :  { %1207 = vadd.xlane.f32.xlu0 %v1206_v5 }
 0x346   :  { %1201 = vadd.xlane.f32.xlu0 %v1200_v9 }
 0x34b   :  { %v1019_v22 = vpop.xlane.xlu0 %1018 }
 0x34c   :  { %v1051_v18 = vsub.f32 %v4348_v46, %v1019_v22 }
 0x34e   :  { %v1114_v23 = vmul.f32 1.442695, %v1051_v18 }
 0x34f   :  { %v1124_v50 = vpop.xlane.xlu1 %1123  ;;  %v1013_v12 = vpop.xlane.xlu0 %1012 }
 0x350   :  { %3671 = vpow2.f32 %v1114_v23  ;;  %v1049_v37 = vsub.f32 %v4351_v0, %v1013_v12 }
 0x352   :  { %v1110_v30 = vmul.f32 1.442695, %v1049_v37 }
 0x353   :  { %v1118_v21 = vpop.xlane.xlu1 %1117  ;;  %v1127_v28 = vpop.xlane.xlu0 %1126 }
 0x354   :  { %3673 = vpow2.f32 %v1110_v30 }
 0x355   :  { %3675 = vrcp.f32 %v1127_v28 }
 0x356   :  { %3677 = vrcp.f32 %v1118_v21 }
 0x357   :  { %v1136_v58 = vpop.xlane.xlu1 %1135  ;;  %v1121_v34 = vpop.xlane.xlu0 %1120  ;;  %3679 = vrcp.f32 %v1124_v50 }
 0x358   :  { %3681 = vrcp.f32 %v1121_v34 }
 0x35b   :  { %v1130_v54 = vpop.xlane.xlu1 %1129  ;;  %v1139_v47 = vpop.xlane.xlu0 %1138 }
 0x35c   :  { %491 = vrot.lane.b32.xlu0 %v4067_v53, %s3781_s5  ;;  %3683 = vrcp.f32 %v1130_v54 }
 0x35d   :  { %v4505_v46 = vpop.eup %3671  ;;  %3685 = vrcp.f32 %v1139_v47 }
 0x35e   :  { %v1209_v0 = vsel %vm923_vm3, %v4505_v46, 0.0  ;;  %3687 = vrcp.f32 %v1136_v58 }
 0x35f   :  { %1210 = vadd.xlane.f32.xlu1 %v1209_v0  ;;  %v1133_v62 = vpop.xlane.xlu0 %1132 }
 0x360   :  { %3689 = vrcp.f32 %v1133_v62 }
 0x361   :  { %v4509_v2 = vpop.eup %3673 }
 0x362   :  { %v1203_v6 = vsel %vm923_vm3, %v4509_v2, 0.0  ;;  %v3676_v3 = vpop.eup %3675 }
 0x363   :  { %1204 = vadd.xlane.f32.xlu1 %v1203_v6  ;;  %v3678_v10 = vpop.eup %3677  ;;  %v1247_v22 = vmul.f32 %v3676_v3, %v4363_v15 }
 0x364   :  { %v3680_v5 = vpop.eup %3679  ;;  %v1244_v18 = vmul.f32 %v3678_v10, %v4357_v14 }
 0x365   :  { %v3682_v9 = vpop.eup %3681  ;;  %v1246_v50 = vmul.f32 %v3680_v5, %v4355_v51 }
 0x366   :  { %v1245_v23 = vmul.f32 %v3682_v9, %v4365_v63 }
 0x367   :  { %v1277_v30 = vpack.c.bf16 %v1247_v22, %v1246_v50 }
 0x368   :  { %v1276_v12 = vpack.c.bf16 %v1245_v23, %v1244_v18 }
 0x369   :  { %v3684_v37 = vpop.eup %3683 }
 0x36a   :  { %v3686_v21 = vpop.eup %3685  ;;  %3330 = vmatprep.mubr.msk.bf16.mxu1 %vm923_vm3, %v1276_v12  ;;  %v1248_v14 = vmul.f32 %v3684_v37, %v4379_v45 }
 0x36b   :  { %v3688_v28 = vpop.eup %3687  ;;  %3331 = vmatmul.mubr.msk.bf16.vlgmr.msra.gmra.mxu1 %vm923_vm3, %v1277_v30  ;;  %v1251_v51 = vmul.f32 %v3686_v21, %v4373_v26 }
 0x36c   :  { %3339 = vmatpush3.bf16.msra.mxu1 %v4154_v42  ;;  %v1250_v34 = vmul.f32 %v3688_v28, %v4371_v24 }
 0x36d   :  { %v3690_v58 = vpop.eup %3689  ;;  %3340 = vmatprep.subr.bf16.mxu1 %v4132_v33 }
 0x36e   :  { %v1249_v15 = vmul.f32 %v3690_v58, %v4385_v55  ;;  %v1279_v54 = vpack.c.bf16 %v1251_v51, %v1250_v34 }
 0x370   :  { %v1278_v63 = vpack.c.bf16 %v1249_v15, %v1248_v14  ;;  %3341 = vmatpush3.bf16.msra.mxu1 %v4132_v33 }
 0x371   :  { %3342 = vmatprep.subr.bf16.mxu1 %v4137_v35 }
 0x372   :  { %3334 = vmatprep.mubr.msk.bf16.mxu1 %vm923_vm3, %v1278_v63 }
 0x373   :  { %3335 = vmatmul.mubr.msk.bf16.gmra.mxu1 %vm923_vm3, %v1279_v54 }
 0x374   :  { %479 = vrot.lane.b32.xlu1 %v4067_v53, %s3782_s4  ;;  %3343 = vmatpush3.bf16.msra.mxu1 %v4137_v35 }
 0x375   :  { %3344 = vmatprep.subr.bf16.mxu1 %v4142_v40 }
 0x378   :  { %3345 = vmatpush3.bf16.msra.mxu1 %v4142_v40 }
 0x379   :  { %3370 = vmatprep.subr.bf16.mxu1 %v4333_v8 }
 0x387   :  { %v1148_v26 = vpop.xlane.xlu1 %1147 }
 0x38f   :  { %v1172_v42 = vpop.xlane.xlu0 %1171 }
 0x390   :  { %3691 = vrcp.f32 %v1172_v42 }
 0x393   :  { %v1142_v55 = vpop.xlane.xlu1 %1141 }
 0x397   :  { %v1166_v33 = vpop.xlane.xlu0 %1165 }
 0x39b   :  { %v1151_v24 = vpop.xlane.xlu0 %1150  ;;  %v1160_v12 = vpop.xlane.xlu1 %1159 }
 0x39d   :  { %v3692_v35 = vpop.eup %3691 }
 0x39e   :  { %v4538_v62 = vmul.f32 %v3692_v35, %v4401_v38 }
 0x39f   :  { %v1175_v45 = vpop.xlane.xlu0 %1174 }
 0x3a0   :  { %3693 = vrcp.f32 %v1175_v45 }
 0x3a1   :  { %3695 = vrcp.f32 %v1151_v24 }
 0x3a2   :  { %3697 = vrcp.f32 %v1142_v55 }
 0x3a3   :  { %v1145_v47 = vpop.xlane.xlu0 %1144  ;;  %3699 = vrcp.f32 %v1148_v26  ;;  %v1154_v51 = vpop.xlane.xlu1 %1153 }
 0x3a4   :  { %3701 = vrcp.f32 %v1145_v47 }
 0x3a5   :  { %3703 = vrcp.f32 %v1166_v33 }
 0x3a7   :  { %v1169_v53 = vpop.xlane.xlu0 %1168 }
 0x3a8   :  { %3705 = vrcp.f32 %v1169_v53 }
 0x3ab   :  { %v4535_v40 = vpop.xlane.xlu0 %1183 }
 0x3ad   :  { %v3694_v0 = vpop.eup %3693 }
 0x3ae   :  { %v4541_v6 = vmul.f32 %v3694_v0, %v4427_v17  ;;  %v3696_v3 = vpop.eup %3695 }
 0x3af   :  { %v4543_v10 = vpop.xlane.xlu0 %1177  ;;  %v3698_v5 = vpop.eup %3697  ;;  %v1255_v23 = vmul.f32 %v3696_v3, %v4414_v4 }
 0x3b0   :  { %v1285_v9 = vpack.c.bf16 %v4541_v6, %v4538_v62  ;;  %v3700_v22 = vpop.eup %3699  ;;  %v1252_v38 = vmul.f32 %v3698_v5, %v4407_v27  ;;  %v1181_v27 = vpop.xlane.xlu1 %1180 }
 0x3b1   :  { %v3702_v18 = vpop.eup %3701  ;;  %v1254_v17 = vmul.f32 %v3700_v22, %v4394_v16 }
 0x3b2   :  { %v3704_v50 = vpop.eup %3703  ;;  %v1253_v30 = vmul.f32 %v3702_v18, %v4430_v25 }
 0x3b3   :  { %v1163_v37 = vpop.xlane.xlu0 %1162  ;;  %v1281_v58 = vpack.c.bf16 %v1255_v23, %v1254_v17  ;;  %v1260_v14 = vmul.f32 %v3704_v50, %v4412_v59 }
 0x3b4   :  { %v1280_v28 = vpack.c.bf16 %v1253_v30, %v1252_v38  ;;  %3707 = vrcp.f32 %v1163_v37  ;;  %v1190_v25 = vpop.xlane.xlu1 %1189 }
 0x3b5   :  { %v3706_v21 = vpop.eup %3705  ;;  %3709 = vrcp.f32 %v1154_v51 }
 0x3b6   :  { %v1261_v15 = vmul.f32 %v3706_v21, %v4442_v39  ;;  %3346 = vmatprep.mubr.msk.bf16.mxu1 %vm923_vm3, %v1280_v28  ;;  %3711 = vrcp.f32 %v1160_v12 }
 0x3b7   :  { %v1187_v4 = vpop.xlane.xlu0 %1186  ;;  %3347 = vmatmul.mubr.msk.bf16.vlgmr.msra.gmra.mxu1 %vm923_vm3, %v1281_v58 }
 0x3b8   :  { %v1284_v63 = vpack.c.bf16 %v1261_v15, %v1260_v14  ;;  %3371 = vmatpush3.bf16.msra.mxu1 %v4333_v8 }
 0x3b9   :  { %3372 = vmatprep.subr.bf16.mxu1 %v4149_v41 }
 0x3ba   :  { %3362 = vmatprep.mubr.msk.bf16.mxu0 %vm923_vm3, %v1284_v63 }
 0x3bb   :  { %v1157_v16 = vpop.xlane.xlu0 %1156 }
 0x3bc   :  { %3713 = vrcp.f32 %v1157_v16  ;;  %3373 = vmatpush3.bf16.msra.mxu1 %v4149_v41  ;;  %v3523_v16 = vld [vmem:[%s5137_s6 + $0x38] sm:$0xff]  }
 0x3bd   :  { %3374 = vmatprep.subr.bf16.mxu1 %v4499_v31 }
 0x3bf   :  { %v1196_v59 = vpop.xlane.xlu0 %1195 }
 0x3c0   :  { %3375 = vmatpush3.bf16.msra.mxu1 %v4499_v31 }
 0x3c1   :  { %v3708_v8 = vpop.eup %3707 }
 0x3c2   :  { %v3710_v34 = vpop.eup %3709  ;;  %v1259_v24 = vmul.f32 %v3708_v8, %v4460_v13 }
 0x3c3   :  { %v1199_v39 = vpop.xlane.xlu0 %1198  ;;  %v3712_v42 = vpop.eup %3711  ;;  %v1256_v41 = vmul.f32 %v3710_v34, %v4435_v7 }
 0x3c4   :  { %3715 = vrcp.f32 %v1199_v39  ;;  %v1258_v31 = vmul.f32 %v3712_v42, %v4420_v32  ;;  %v3525_v39 = vld [vmem:[%s5137_s6 + $0x28] sm:$0xff]  }
 0x3c5   :  { %3717 = vrcp.f32 %v1190_v25 }
 0x3c6   :  { %3719 = vrcp.f32 %v1196_v59  ;;  %v1283_v47 = vpack.c.bf16 %v1259_v24, %v1258_v31  ;;  %v3524_v59 = vld [vmem:[%s5137_s6 + $0x30] sm:$0xff]   ;;  %v3527_v24 = vld [vmem:[%s5137_s6 + $0x18] sm:$0xff]  }
 0x3c7   :  { %v1193_v54 = vpop.xlane.xlu0 %1192 }
 0x3c8   :  { %3721 = vrcp.f32 %v1193_v54 }
 0x3c9   :  { %v3714_v33 = vpop.eup %3713  ;;  %3723 = vrcp.f32 %v4543_v10 }
 0x3ca   :  { %v1257_v26 = vmul.f32 %v3714_v33, %v4475_v36  ;;  %3725 = vrcp.f32 %v1181_v27  ;;  %v3526_v33 = vld [vmem:[%s5137_s6 + $0x20] sm:$0xff]  }
 0x3cb   :  { %v1208_v45 = vpop.xlane.xlu0 %1207  ;;  %3727 = vrcp.f32 %v1187_v4 }
 0x3cc   :  { %v1282_v55 = vpack.c.bf16 %v1257_v26, %v1256_v41  ;;  %3729 = vrcp.f32 %v4535_v40 }
 0x3ce   :  { %3350 = vmatprep.mubr.msk.bf16.mxu1 %vm923_vm3, %v1282_v55  ;;  %v3528_v55 = vld [vmem:[%s5137_s6 + $0x10] sm:$0xff]  }
 0x3cf   :  { %3351 = vmatmul.mubr.msk.bf16.gmra.mxu1 %vm923_vm3, %v1283_v47  ;;  %v1202_v53 = vpop.xlane.xlu0 %1201 }
 0x3d1   :  { %v3716_v35 = vpop.eup %3715 }
 0x3d2   :  { %v3718_v0 = vpop.eup %3717  ;;  %v1271_v7 = vmul.f32 %v3716_v35, %v4483_v57 }
 0x3d3   :  { %v492_v3 = vpop.permute.xlu0 %491  ;;  %v3720_v5 = vpop.eup %3719  ;;  %v1268_v36 = vmul.f32 %v3718_v0, %v4458_v20 }
 0x3d4   :  { %3376 = vmatprep.subr.bf16.mxu1 %v492_v3  ;;  %v1270_v22 = vmul.f32 %v3720_v5, %v4477_v48  ;;  %v3530_v5 = vld [vmem:[%s5137_s6] sm:$0xff]  }
 0x3d5   :  { %v3722_v13 = vpop.eup %3721  ;;  %3377 = vmatpush3.bf16.msra.mxu1 %v492_v3 }
 0x3d6   :  { %v1269_v32 = vmul.f32 %v3722_v13, %v4487_v43  ;;  %v1289_v23 = vpack.c.bf16 %v1271_v7, %v1270_v22  ;;  %v3724_v57 = vpop.eup %3723 }
 0x3d7   :  { %v3726_v48 = vpop.eup %3725  ;;  %v1264_v12 = vmul.f32 %v3724_v57, %v4454_v60 }
 0x3d8   :  { %v1288_v18 = vpack.c.bf16 %v1269_v32, %v1268_v36  ;;  %v1265_v37 = vmul.f32 %v3726_v48, %v4449_v19  ;;  %v3728_v10 = vpop.eup %3727 }
 0x3d9   :  { %v3730_v40 = vpop.eup %3729  ;;  %v1267_v17 = vmul.f32 %v3728_v10, %v4470_v29 }
 0x3da   :  { %3378 = vmatprep.mubr.msk.bf16.mxu1 %vm923_vm3, %v1288_v18  ;;  %v1286_v38 = vpack.c.bf16 %v1265_v37, %v1264_v12  ;;  %v1266_v60 = vmul.f32 %v3730_v40, %v4447_v11 }
 0x3db   :  { %3379 = vmatmul.mubr.msk.bf16.vlgmr.msra.gmra.mxu1 %vm923_vm3, %v1289_v23 }
 0x3dc   :  { %v1287_v14 = vpack.c.bf16 %v1267_v17, %v1266_v60 }
 0x3e8   :  { %v1211_v50 = vpop.xlane.xlu1 %1210 }
 0x3e9   :  { %3731 = vrcp.f32 %v1211_v50 }
 0x3ea   :  { %3733 = vrcp.f32 %v1202_v53  ;;  %v3529_v53 = vld [vmem:[%s5137_s6 + $0x8] sm:$0xff]  }
 0x3eb   :  { %3735 = vrcp.f32 %v1208_v45 }
 0x3ec   :  { %v1205_v20 = vpop.xlane.xlu1 %1204 }
 0x3ed   :  { %3737 = vrcp.f32 %v1205_v20 }
 0x3f0   :  { %v480_v43 = vpop.permute.xlu1 %479 }
 0x3f1   :  { %3360 = vmatprep.subr.bf16.mxu0 %v480_v43 }
 0x3f2   :  { %3361 = vmatpush3.bf16.msra.mxu0 %v480_v43 }
 0x3f3   :  { %3386 = vmatprep.subr.bf16.mxu0 %v3523_v16 }
 0x3f5   :  { %3363 = vmatmul.mubr.msk.bf16.vlgmr.msra.gmra.mxu0 %vm923_vm3, %v1285_v9 }
 0x3f6   :  { %3366 = vmatprep.mubr.msk.bf16.mxu0 %vm923_vm3, %v1286_v38  ;;  %v3732_v30 = vpop.eup %3731  ;;  %3387 = vmatpush3.bf16.msra.mxu0 %v3523_v16 }
 0x3f7   :  { %v3734_v21 = vpop.eup %3733  ;;  %v1275_v19 = vmul.f32 %v3732_v30, %v4505_v46  ;;  %3388 = vmatprep.subr.bf16.mxu0 %v3524_v59 }
 0x3f8   :  { %v3736_v28 = vpop.eup %3735  ;;  %v1272_v15 = vmul.f32 %v3734_v21, %v4495_v44 }
 0x3f9   :  { %v1274_v6 = vmul.f32 %v3736_v28, %v4491_v49 }
 0x3fa   :  { %v3738_v58 = vpop.eup %3737  ;;  %3389 = vmatpush3.bf16.msra.mxu0 %v3524_v59 }
 0x3fb   :  { %v1273_v62 = vmul.f32 %v3738_v58, %v4509_v2  ;;  %v1291_v51 = vpack.c.bf16 %v1275_v19, %v1274_v6  ;;  %3390 = vmatprep.subr.bf16.mxu0 %v3525_v39 }
 0x3fd   :  { %3367 = vmatmul.mubr.msk.bf16.gmra.mxu0 %vm923_vm3, %v1287_v14  ;;  %v1290_v9 = vpack.c.bf16 %v1273_v62, %v1272_v15 }
 0x3fe   :  { %3391 = vmatpush3.bf16.msra.mxu0 %v3525_v39 }
 0x3ff   :  { %3382 = vmatprep.mubr.msk.bf16.mxu1 %vm923_vm3, %v1290_v9  ;;  %3392 = vmatprep.subr.bf16.mxu0 %v3526_v33 }
 0x400   :  { %3383 = vmatmul.mubr.msk.bf16.gmra.mxu1 %vm923_vm3, %v1291_v51 }
 0x401   :  { %2238 = vmatprep.mubr.bf16.mxu1 %v3779_v1 }
 0x402   :  { %3393 = vmatpush3.bf16.msra.mxu0 %v3526_v33 }
 0x403   :  { %3394 = vmatprep.subr.bf16.mxu0 %v3527_v24 }
 0x406   :  { %3395 = vmatpush3.bf16.msra.mxu0 %v3527_v24 }
 0x407   :  { %3396 = vmatprep.subr.bf16.mxu0 %v3528_v55 }
 0x40a   :  { %3397 = vmatpush3.bf16.msra.mxu0 %v3528_v55 }
 0x40b   :  { %3398 = vmatprep.subr.bf16.mxu0 %v3529_v53 }
 0x40e   :  { %3399 = vmatpush3.bf16.msra.mxu0 %v3529_v53 }
 0x40f   :  { %3400 = vmatprep.subr.bf16.mxu0 %v3530_v5 }
 0x412   :  { %3401 = vmatpush3.bf16.msra.mxu0 %v3530_v5 }
 0x42b   :  { %v4592_v11 = vpop.f32.mrf.mxu1 }
 0x42d   :  { %v4594_v29 = vpop.f32.mrf.mxu1 }
 0x42f   :  { %v4596_v46 = vpop.f32.mrf.mxu1 }
 0x431   :  { %v4598_v44 = vpop.f32.mrf.mxu1 }
 0x433   :  { %v4600_v2 = vpop.f32.mrf.mxu1 }
 0x435   :  { %v4602_v49 = vpop.f32.mrf.mxu1 }
 0x437   :  { %v4604_v4 = vpop.f32.mrf.mxu1 }
 0x439   :  { %v4606_v63 = vpop.f32.mrf.mxu1 }
 0x477   :  { %v3348_v27 = vpop.f32.mrf.mxu1 }
 0x479   :  { %v1415_v25 = vpop.f32.mrf.mxu1 }
 0x47b   :  { %v3349_v8 = vpop.f32.mrf.mxu1 }
 0x47c   :  { %v3431_v34 = vpack.i.bf16 %v3349_v8, %v3348_v27 }
 0x47d   :  { %v1418_v54 = vpop.f32.mrf.mxu1 }
 0x47e   :  { %v3441_v42 = vpack.i.bf16 %v1418_v54, %v1415_v25  ;;  %3432 = vrot.lane.b32.xlu0 %v3431_v34, %s3781_s5 }
 0x480   :  { %3442 = vrot.lane.b32.xlu1 %v3441_v42, %s3781_s5 }
 0x48f   :  { %v3352_v41 = vpop.f32.mrf.mxu1 }
 0x491   :  { %v1431_v26 = vpop.f32.mrf.mxu1 }
 0x493   :  { %v3353_v45 = vpop.f32.mrf.mxu1 }
 0x494   :  { %v3466_v12 = vpack.i.bf16 %v3353_v45, %v3352_v41 }
 0x495   :  { %v1434_v31 = vpop.f32.mrf.mxu1 }
 0x496   :  { %v3461_v10 = vpack.i.bf16 %v1434_v31, %v1431_v26 }
 0x49b   :  { %v3380_v47 = vpop.f32.mrf.mxu1 }
 0x49d   :  { %v1569_v35 = vpop.f32.mrf.mxu1 }
 0x49f   :  { %v3381_v13 = vpop.f32.mrf.mxu1 }
 0x4a0   :  { %v3456_v50 = vpack.i.bf16 %v3381_v13, %v3380_v47 }
 0x4a1   :  { %v1572_v18 = vpop.f32.mrf.mxu1 }
 0x4a2   :  { %v3451_v57 = vpack.i.bf16 %v1572_v18, %v1569_v35 }
 0x4b5   :  { %v3364_v0 = vpop.f32.mrf.mxu0 }
 0x4b7   :  { %v1492_v3 = vpop.f32.mrf.mxu0 }
 0x4b9   :  { %v3365_v7 = vpop.f32.mrf.mxu0 }
 0x4ba   :  { %v3436_v36 = vpack.i.bf16 %v3365_v7, %v3364_v0 }
 0x4bb   :  { %v1495_v32 = vpop.f32.mrf.mxu0 }
 0x4bc   :  { %v3446_v22 = vpack.i.bf16 %v1495_v32, %v1492_v3  ;;  %3437 = vrot.lane.b32.xlu0 %v3436_v36, %s3782_s4 }
 0x4bd   :  { %v3368_v23 = vpop.f32.mrf.mxu0 }
 0x4be   :  { %3447 = vrot.lane.b32.xlu1 %v3446_v22, %s3782_s4 }
 0x4bf   :  { %v1508_v20 = vpop.f32.mrf.mxu0 }
 0x4c0   :  { %3457 = vrot.lane.b32.xlu0 %v3456_v50, %s3780_s3  ;;  %v3384_v48 = vpop.f32.mrf.mxu1 }
 0x4c1   :  { %v3369_v43 = vpop.f32.mrf.mxu0 }
 0x4c2   :  { %3452 = vrot.lane.b32.xlu1 %v3451_v57, %s3780_s3  ;;  %v1585_v37 = vpop.f32.mrf.mxu1  ;;  %v3476_v30 = vpack.i.bf16 %v3369_v43, %v3368_v23 }
 0x4c3   :  { %v1511_v38 = vpop.f32.mrf.mxu0 }
 0x4c4   :  { %3467 = vrot.lane.b32.xlu0 %v3466_v12, %s3781_s5  ;;  %v3385_v40 = vpop.f32.mrf.mxu1  ;;  %v3471_v17 = vpack.i.bf16 %v1511_v38, %v1508_v20 }
 0x4c5   :  { %v3486_v28 = vpack.i.bf16 %v3385_v40, %v3384_v48 }
 0x4c6   :  { %3462 = vrot.lane.b32.xlu1 %v3461_v10, %s3781_s5  ;;  %v1588_v21 = vpop.f32.mrf.mxu1 }
 0x4c7   :  { %v3481_v60 = vpack.i.bf16 %v1588_v21, %v1585_v37 }
 0x4c8   :  { %3477 = vrot.lane.b32.xlu0 %v3476_v30, %s3782_s4 }
 0x4ca   :  { %3472 = vrot.lane.b32.xlu1 %v3471_v17, %s3782_s4 }
 0x4cc   :  { %3487 = vrot.lane.b32.xlu0 %v3486_v28, %s3780_s3 }
 0x4ce   :  { %3482 = vrot.lane.b32.xlu1 %v3481_v60, %s3780_s3 }
 0x4f0   :  { %v3433_v58 = vpop.permute.xlu0 %3432 }
 0x4f1   :  { %v3435_v15 = vunpack.i.h.bf16 %v3433_v58  ;;  %v3434_v62 = vunpack.i.l.bf16 %v3433_v58 }
 0x4f2   :  { %v3443_v19 = vpop.permute.xlu1 %3442 }
 0x4f3   :  { %v3445_v6 = vunpack.i.h.bf16 %v3443_v19  ;;  %v3444_v9 = vunpack.i.l.bf16 %v3443_v19  ;;  %v1699_v54 = vsel %vm566_vm0, %v4596_v46, %v3435_v15  ;;  %v1698_v42 = vsel %vm566_vm0, %v4592_v11, %v3434_v62 }
 0x4f5   :  { %v1697_v33 = vsel %vm566_vm0, %v4598_v44, %v3445_v6  ;;  %v1696_v24 = vsel %vm566_vm0, %v4594_v29, %v3444_v9  ;;  %v2988_v6 = vld [vmem:[%s5138_s7] ss:$0 sm:$0xff] }
 0x52e   :  { %v3438_v14 = vpop.permute.xlu0 %3437 }
 0x52f   :  { %v3440_v16 = vunpack.i.h.bf16 %v3438_v14  ;;  %v3439_v27 = vunpack.i.l.bf16 %v3438_v14 }
 0x530   :  { %v3448_v51 = vpop.permute.xlu1 %3447 }
 0x531   :  { %v3450_v59 = vunpack.i.h.bf16 %v3448_v51  ;;  %v3449_v25 = vunpack.i.l.bf16 %v3448_v51  ;;  %v1706_v26 = vsel %vm923_vm3, %v1698_v42, %v3439_v27  ;;  %v1707_v45 = vsel %vm923_vm3, %v1699_v54, %v3440_v16  ;;  %v3771_v27 = vld [vmem:[%s5133_s0] sm:$0xff]  ;;  %v3772_v54 = vld [vmem:[%s5133_s0 + $0x18] sm:$0xff] }
 0x532   :  { %v3458_v39 = vpop.permute.xlu0 %3457 }
 0x533   :  { %v3460_v8 = vunpack.i.h.bf16 %v3458_v39  ;;  %v3459_v34 = vunpack.i.l.bf16 %v3458_v39  ;;  %v1705_v47 = vsel %vm923_vm3, %v1697_v33, %v3450_v59  ;;  %v1704_v46 = vsel %vm923_vm3, %v1696_v24, %v3449_v25  ;;  %v3773_v33 = vld [vmem:[%s5133_s0 + $0x8] sm:$0xff] }
 0x534   :  { %v3453_v41 = vpop.permute.xlu1 %3452 }
 0x535   :  { %v3455_v31 = vunpack.i.h.bf16 %v3453_v41  ;;  %v3454_v55 = vunpack.i.l.bf16 %v3453_v41  ;;  %v1715_v53 = vsel %vm1712_vm10, %v1706_v26, %v3459_v34  ;;  %v1716_v11 = vsel %vm1712_vm10, %v1707_v45, %v3460_v8  ;;  %v3774_v26 = vld [vmem:[%s5133_s0 + $0x10] sm:$0xff] }
 0x536   :  { %v3468_v35 = vpop.permute.xlu0 %3467  ;;  %v1722_v5 = vpack.c.bf16 %v1716_v11, %v1715_v53  ;;  %v3775_v53 = vld [vmem:[%s5133_s0 + $0x20] sm:$0xff] }
 0x537   :  { %v1713_v44 = vsel %vm1712_vm10, %v1704_v46, %v3454_v55  ;;  %v1714_v29 = vsel %vm1712_vm10, %v1705_v47, %v3455_v31  ;;  %v3470_v7 = vunpack.i.h.bf16 %v3468_v35  ;;  %v3469_v36 = vunpack.i.l.bf16 %v3468_v35 }
 0x538   :  { %v3463_v0 = vpop.permute.xlu1 %3462  ;;  %v1721_v3 = vpack.c.bf16 %v1714_v29, %v1713_v44  ;;  %v3776_v29 = vld [vmem:[%s5133_s0 + $0x30] sm:$0xff] }
 0x539   :  { %v3465_v32 = vunpack.i.h.bf16 %v3463_v0  ;;  %v3464_v22 = vunpack.i.l.bf16 %v3463_v0  ;;  %v1703_v37 = vsel %vm566_vm0, %v4604_v4, %v3470_v7  ;;  %v1702_v10 = vsel %vm566_vm0, %v4600_v2, %v3469_v36  ;;  %v3778_v7 = vld [vmem:[%s5133_s0 + $0x38] sm:$0xff] }
 0x53a   :  { %3402 = vmatprep.mubr.bf16.mxu0 %v1721_v3  ;;  %v3478_v13 = vpop.permute.xlu0 %3477 }
 0x53b   :  { %3403 = vmatmul.mubr.bf16.vlgmr.msra.gmra.mxu0 %v1722_v5  ;;  %v3480_v23 = vunpack.i.h.bf16 %v3478_v13  ;;  %v3479_v50 = vunpack.i.l.bf16 %v3478_v13  ;;  %v1701_v38 = vsel %vm566_vm0, %v4606_v63, %v3465_v32  ;;  %v1700_v40 = vsel %vm566_vm0, %v4602_v49, %v3464_v22  ;;  %v3777_v5 = vld [vmem:[%s5133_s0 + $0x28] sm:$0xff]  ;;  %v3531_v32 = vld [vmem:[%s5139_s10 + $0xe0] ss:$16 sps:$4 sm:$0xff]   ;;  %v3533_v22 = vld [vmem:[%s5139_s10 + $0xe4] ss:$16 sps:$4 sm:$0xff]  }
 0x53c   :  { %v3473_v18 = vpop.permute.xlu1 %3472  ;;  %2206 = vmatprep.subr.bf16.mxu1 %v3533_v22  ;;  %v3573_v22 = vld [vmem:[%s5139_s10] ss:$16 sps:$4 sm:$0xff]  }
 0x53d   :  { %v3475_v20 = vunpack.i.h.bf16 %v3473_v18  ;;  %v3474_v57 = vunpack.i.l.bf16 %v3473_v18  ;;  %v1710_v17 = vsel %vm923_vm3, %v1702_v10, %v3479_v50  ;;  %v1711_v21 = vsel %vm923_vm3, %v1703_v37, %v3480_v23  ;;  %v3534_v18 = vld [vmem:[%s5139_s10 + $0xe8] ss:$16 sps:$4 sm:$0xff]   ;;  %v3536_v23 = vld [vmem:[%s5139_s10 + $0xec] ss:$16 sps:$4 sm:$0xff]   ;;  %2207 = vmatpush1.bf16.msra.mxu1 %v3531_v32  ;;  %v3575_v32 = vld [vmem:[%s5139_s10 + $0x4] ss:$16 sps:$4 sm:$0xff]  }
 0x53e   :  { %v3488_v48 = vpop.permute.xlu0 %3487  ;;  %2279 = vmatprep.subr.bf16.mxu0 %v3536_v23  ;;  %v3578_v23 = vld [vmem:[%s5139_s10 + $0xc] ss:$16 sps:$4 sm:$0xff]  }
 0x53f   :  { %v3490_v43 = vunpack.i.h.bf16 %v3488_v48  ;;  %v3489_v12 = vunpack.i.l.bf16 %v3488_v48  ;;  %v1708_v58 = vsel %vm923_vm3, %v1700_v40, %v3474_v57  ;;  %v1709_v4 = vsel %vm923_vm3, %v1701_v38, %v3475_v20  ;;  %2280 = vmatpush1.bf16.msra.mxu0 %v3534_v18  ;;  %v3576_v18 = vld [vmem:[%s5139_s10 + $0x8] ss:$16 sps:$4 sm:$0xff]  }
 0x540   :  { %v3483_v30 = vpop.permute.xlu1 %3482 }
 0x541   :  { %v3485_v28 = vunpack.i.h.bf16 %v3483_v30  ;;  %v3484_v60 = vunpack.i.l.bf16 %v3483_v30  ;;  %v1719_v19 = vsel %vm1712_vm10, %v1710_v17, %v3489_v12  ;;  %v1720_v2 = vsel %vm1712_vm10, %v1711_v21, %v3490_v43 }
 0x542   :  { %v1724_v15 = vpack.c.bf16 %v1720_v2, %v1719_v19 }
 0x543   :  { %v1717_v63 = vsel %vm1712_vm10, %v1708_v58, %v3484_v60  ;;  %v1718_v14 = vsel %vm1712_vm10, %v1709_v4, %v3485_v28 }
 0x544   :  { %v1723_v49 = vpack.c.bf16 %v1718_v14, %v1717_v63 }
 0x546   :  { %3406 = vmatprep.mubr.bf16.mxu0 %v1723_v49 }
 0x547   :  { %3407 = vmatmul.mubr.bf16.gmra.mxu0 %v1724_v15 }
 0x548   :  { %2311 = vmatprep.mubr.bf16.mxu0 %v3779_v1 }
 0x5fb   :  { %v3404_v62 = vpop.f32.mrf.mxu0 }
 0x5fc   :  { %v1839_v34 = vadd.f32 %v3404_v62, %v2988_v6 }
 0x5fd   :  { %v1830_v9 = vpop.f32.mrf.mxu0 }
 0x5fe   :  { %v1831_v51 = vadd.f32 %v2988_v6, %v1830_v9  ;;  %v1863_v45 = vadd.f32 %v3774_v26, %v1839_v34 }
 0x5ff   :  { %v3405_v16 = vpop.f32.mrf.mxu0 }
 0x600   :  { %v1861_v59 = vadd.f32 %v3771_v27, %v1831_v51  ;;  %v1842_v25 = vadd.f32 %v3405_v16, %v2988_v6  ;;  %v3539_v51 = vld [vmem:[%s5139_s10 + $0xc4] ss:$16 sps:$4 sm:$0xff]   ;;  %v3542_v16 = vld [vmem:[%s5139_s10 + $0xcc] ss:$16 sps:$4 sm:$0xff]  }
 0x601   :  { %v1833_v39 = vpop.f32.mrf.mxu0  ;;  %2208 = vmatprep.subr.bf16.mxu1 %v3539_v51  ;;  %2281 = vmatprep.subr.bf16.mxu0 %v3542_v16 }
 0x602   :  { %v1834_v8 = vadd.f32 %v2988_v6, %v1833_v39  ;;  %1871 = vadd.xlane.f32.xlu1 %v1861_v59  ;;  %v1864_v42 = vadd.f32 %v3772_v54, %v1842_v25  ;;  %v3540_v25 = vld [vmem:[%s5139_s10 + $0xc8] ss:$16 sps:$4 sm:$0xff]  }
 0x603   :  { %2282 = vmatpush1.bf16.msra.mxu0 %v3540_v25 }
 0x604   :  { %v1862_v24 = vadd.f32 %v3773_v33, %v1834_v8  ;;  %v3548_v33 = vld [vmem:[%s5139_s10 + $0xac] ss:$16 sps:$4 sm:$0xff]  }
 0x605   :  { %2283 = vmatprep.subr.bf16.mxu0 %v3548_v33 }
 0x606   :  { %1873 = vadd.xlane.f32.xlu0 %v1862_v24  ;;  %1877 = vadd.xlane.f32.xlu1 %v1864_v42 }
 0x607   :  { %v3408_v41 = vpop.f32.mrf.mxu0 }
 0x608   :  { %v1855_v46 = vadd.f32 %v3408_v41, %v2988_v6  ;;  %v3546_v41 = vld [vmem:[%s5139_s10 + $0xa8] ss:$16 sps:$4 sm:$0xff]  }
 0x609   :  { %v1846_v31 = vpop.f32.mrf.mxu0  ;;  %2284 = vmatpush1.bf16.msra.mxu0 %v3546_v41 }
 0x60a   :  { %v1847_v55 = vadd.f32 %v2988_v6, %v1846_v31  ;;  %1875 = vadd.xlane.f32.xlu0 %v1863_v45  ;;  %v1867_v0 = vadd.f32 %v3776_v29, %v1855_v46  ;;  %v3554_v31 = vld [vmem:[%s5139_s10 + $0x8c] ss:$16 sps:$4 sm:$0xff]   ;;  %v3557_v46 = vld [vmem:[%s5139_s10 + $0x64] ss:$16 sps:$4 sm:$0xff]  }
 0x60b   :  { %v3409_v47 = vpop.f32.mrf.mxu0  ;;  %2285 = vmatprep.subr.bf16.mxu0 %v3554_v31  ;;  %v3566_v29 = vld [vmem:[%s5139_s10 + $0x4c] ss:$16 sps:$4 sm:$0xff]  }
 0x60c   :  { %v1865_v11 = vadd.f32 %v3775_v53, %v1847_v55  ;;  %v1858_v3 = vadd.f32 %v3409_v47, %v2988_v6  ;;  %v3549_v55 = vld [vmem:[%s5139_s10 + $0x80] ss:$16 sps:$4 sm:$0xff]   ;;  %v3552_v47 = vld [vmem:[%s5139_s10 + $0x88] ss:$16 sps:$4 sm:$0xff]   ;;  %v3560_v53 = vld [vmem:[%s5139_s10 + $0x6c] ss:$16 sps:$4 sm:$0xff]  }
 0x60d   :  { %v1849_v35 = vpop.f32.mrf.mxu0  ;;  %2286 = vmatpush1.bf16.msra.mxu0 %v3552_v47 }
 0x60e   :  { %v1850_v44 = vadd.f32 %v2988_v6, %v1849_v35  ;;  %1879 = vadd.xlane.f32.xlu0 %v1865_v11  ;;  %v1868_v36 = vadd.f32 %v3778_v7, %v1858_v3  ;;  %v3558_v35 = vld [vmem:[%s5139_s10 + $0x68] ss:$16 sps:$4 sm:$0xff]   ;;  %2287 = vmatprep.subr.bf16.mxu0 %v3560_v53  ;;  %v3567_v7 = vld [vmem:[%s5139_s10 + $0x20] ss:$16 sps:$4 sm:$0xff]  }
 0x60f   :  { %v3564_v3 = vld [vmem:[%s5139_s10 + $0x48] ss:$16 sps:$4 sm:$0xff]  }
 0x610   :  { %v1866_v13 = vadd.f32 %v3777_v5, %v1850_v44  ;;  %v3563_v44 = vld [vmem:[%s5139_s10 + $0x44] ss:$16 sps:$4 sm:$0xff]  }
 0x611   :  { %2288 = vmatpush1.bf16.msra.mxu0 %v3558_v35  ;;  %v3569_v5 = vld [vmem:[%s5139_s10 + $0x24] ss:$16 sps:$4 sm:$0xff]  }
 0x612   :  { %1883 = vadd.xlane.f32.xlu0 %v1867_v0  ;;  %1881 = vadd.xlane.f32.xlu1 %v1866_v13 }
 0x613   :  { %2289 = vmatprep.subr.bf16.mxu0 %v3566_v29  ;;  %v3582_v29 = vld [vmem:[%s5140_s12 + $0xb8] sm:$0xff]  }
 0x615   :  { %2290 = vmatpush1.bf16.msra.mxu0 %v3564_v3 }
 0x616   :  { %1885 = vadd.xlane.f32.xlu1 %v1868_v36 }
 0x68b   :  { %v1872_v50 = vpop.xlane.xlu1 %1871 }
 0x68c   :  { %v1888_v20 = vmul.f32 0.0078125, %v1872_v50  ;;  %v3579_v50 = vld [vmem:[%s5140_s12 + $0x78] sm:$0xff]  }
 0x68e   :  { %v4716_v57 = vsub.f32 %v1861_v59, %v1888_v20  ;;  %v3537_v59 = vld [vmem:[%s5139_s10 + $0xc0] ss:$16 sps:$4 sm:$0xff]   ;;  %v3580_v20 = vld [vmem:[%s5140_s12 + $0xf8] sm:$0xff]  }
 0x68f   :  { %v1874_v48 = vpop.xlane.xlu0 %1873  ;;  %v1878_v43 = vpop.xlane.xlu1 %1877  ;;  %2209 = vmatpush1.bf16.msra.mxu1 %v3537_v59 }
 0x690   :  { %v1889_v12 = vmul.f32 0.0078125, %v1874_v48  ;;  %v1891_v37 = vmul.f32 0.0078125, %v1878_v43  ;;  %v1904_v10 = vmul.f32 %v4716_v57, %v4716_v57 }
 0x692   :  { %v4720_v38 = vsub.f32 %v1862_v24, %v1889_v12  ;;  %1912 = vadd.xlane.f32.xlu0 %v1904_v10  ;;  %v4722_v30 = vsub.f32 %v1864_v42, %v1891_v37  ;;  %v3545_v42 = vld [vmem:[%s5139_s10 + $0xa4] ss:$16 sps:$4 sm:$0xff]   ;;  %v3543_v24 = vld [vmem:[%s5139_s10 + $0xa0] ss:$16 sps:$4 sm:$0xff]  }
 0x693   :  { %v1876_v40 = vpop.xlane.xlu0 %1875  ;;  %2210 = vmatprep.subr.bf16.mxu1 %v3545_v42 }
 0x694   :  { %v1890_v17 = vmul.f32 0.0078125, %v1876_v40  ;;  %v1905_v21 = vmul.f32 %v4720_v38, %v4720_v38  ;;  %v1907_v19 = vmul.f32 %v4722_v30, %v4722_v30  ;;  %2211 = vmatpush1.bf16.msra.mxu1 %v3543_v24 }
 0x696   :  { %v4726_v28 = vsub.f32 %v1863_v45, %v1890_v17  ;;  %1914 = vadd.xlane.f32.xlu1 %v1905_v21  ;;  %v3551_v45 = vld [vmem:[%s5139_s10 + $0x84] ss:$16 sps:$4 sm:$0xff]  }
 0x697   :  { %v1880_v60 = vpop.xlane.xlu0 %1879  ;;  %2212 = vmatprep.subr.bf16.mxu1 %v3551_v45 }
 0x698   :  { %v1892_v58 = vmul.f32 0.0078125, %v1880_v60  ;;  %v1906_v4 = vmul.f32 %v4726_v28, %v4726_v28  ;;  %2213 = vmatpush1.bf16.msra.mxu1 %v3549_v55 }
 0x699   :  { %2214 = vmatprep.subr.bf16.mxu1 %v3557_v46 }
 0x69a   :  { %v4732_v2 = vsub.f32 %v1865_v11, %v1892_v58  ;;  %1916 = vadd.xlane.f32.xlu0 %v1906_v4  ;;  %1918 = vadd.xlane.f32.xlu1 %v1907_v19  ;;  %v3555_v11 = vld [vmem:[%s5139_s10 + $0x60] ss:$16 sps:$4 sm:$0xff]  }
 0x69b   :  { %v1884_v63 = vpop.xlane.xlu0 %1883  ;;  %v1882_v14 = vpop.xlane.xlu1 %1881 }
 0x69c   :  { %v1894_v49 = vmul.f32 0.0078125, %v1884_v63  ;;  %v1893_v15 = vmul.f32 0.0078125, %v1882_v14  ;;  %v1908_v62 = vmul.f32 %v4732_v2, %v4732_v2  ;;  %2215 = vmatpush1.bf16.msra.mxu1 %v3555_v11 }
 0x69d   :  { %2216 = vmatprep.subr.bf16.mxu1 %v3563_v44  ;;  %v3581_v44 = vld [vmem:[%s5140_s12 + $0x38] sm:$0xff]  }
 0x69e   :  { %v4736_v6 = vsub.f32 %v1867_v0, %v1894_v49  ;;  %v4738_v9 = vsub.f32 %v1866_v13, %v1893_v15  ;;  %1920 = vadd.xlane.f32.xlu0 %v1908_v62  ;;  %v3561_v0 = vld [vmem:[%s5139_s10 + $0x40] ss:$16 sps:$4 sm:$0xff]   ;;  %v3572_v13 = vld [vmem:[%s5139_s10 + $0x2c] ss:$16 sps:$4 sm:$0xff]  }
 0x69f   :  { %v1886_v27 = vpop.xlane.xlu1 %1885  ;;  %2291 = vmatprep.subr.bf16.mxu0 %v3572_v13 }
 0x6a0   :  { %v1895_v39 = vmul.f32 0.0078125, %v1886_v27  ;;  %v1910_v8 = vmul.f32 %v4736_v6, %v4736_v6  ;;  %v1909_v34 = vmul.f32 %v4738_v9, %v4738_v9  ;;  %2217 = vmatpush1.bf16.msra.mxu1 %v3561_v0 }
 0x6a1   :  { %2218 = vmatprep.subr.bf16.mxu1 %v3569_v5 }
 0x6a2   :  { %v4756_v54 = vsub.f32 %v1868_v36, %v1895_v39  ;;  %1924 = vadd.xlane.f32.xlu0 %v1910_v8  ;;  %1922 = vadd.xlane.f32.xlu1 %v1909_v34  ;;  %v3570_v36 = vld [vmem:[%s5139_s10 + $0x28] ss:$16 sps:$4 sm:$0xff]   ;;  %v4842_v8 = vld [vmem:[%s5141_s8] ss:$0 sm:$0xff] }
 0x6a3   :  { %2292 = vmatpush1.bf16.msra.mxu0 %v3570_v36  ;;  %v3586_v36 = vld [vmem:[%s5140_s12 + $0xb0] sm:$0xff]  }
 0x6a4   :  { %v1911_v26 = vmul.f32 %v4756_v54, %v4756_v54  ;;  %2219 = vmatpush1.bf16.msra.mxu1 %v3567_v7  ;;  %2293 = vmatprep.subr.bf16.mxu0 %v3578_v23  ;;  %v3585_v7 = vld [vmem:[%s5140_s12 + $0x30] sm:$0xff]  }
 0x6a5   :  { %2220 = vmatprep.subr.bf16.mxu1 %v3575_v32  ;;  %v3587_v32 = vld [vmem:[%s5140_s12 + $0x68] sm:$0xff]  }
 0x6a6   :  { %1926 = vadd.xlane.f32.xlu1 %v1911_v26 }
 0x6a7   :  { %2294 = vmatpush1.bf16.msra.mxu0 %v3576_v18 }
 0x6a8   :  { %2221 = vmatpush1.bf16.msra.mxu1 %v3573_v22  ;;  %3194 = vmatprep.subr.bf16.mxu0 %v3580_v20  ;;  %v3588_v22 = vld [vmem:[%s5140_s12 + $0xe8] sm:$0xff]  }
 0x6a9   :  { %3154 = vmatprep.subr.bf16.mxu1 %v3579_v50 }
 0x71b   :  { %v1913_v48 = vpop.xlane.xlu0 %1912 }
 0x71c   :  { %v1928_v43 = vmul.f32 0.0078125, %v1913_v48  ;;  %v3589_v48 = vld [vmem:[%s5140_s12 + $0x28] sm:$0xff]  }
 0x71e   :  { %v1936_v12 = vadd.f32 1e-05, %v1928_v43  ;;  %v3590_v43 = vld [vmem:[%s5140_s12 + $0xa8] sm:$0xff]  }
 0x71f   :  { %v1915_v37 = vpop.xlane.xlu1 %1914 }
 0x720   :  { %3739 = vrsqrt.f32 %v1936_v12  ;;  %v1929_v10 = vmul.f32 0.0078125, %v1915_v37 }
 0x722   :  { %v1937_v40 = vadd.f32 1e-05, %v1929_v10 }
 0x723   :  { %v1917_v17 = vpop.xlane.xlu0 %1916  ;;  %v1919_v21 = vpop.xlane.xlu1 %1918 }
 0x724   :  { %3741 = vrsqrt.f32 %v1937_v40  ;;  %v1930_v60 = vmul.f32 0.0078125, %v1917_v17  ;;  %v1931_v58 = vmul.f32 0.0078125, %v1919_v21 }
 0x726   :  { %v1938_v4 = vadd.f32 1e-05, %v1930_v60  ;;  %v1939_v19 = vadd.f32 1e-05, %v1931_v58  ;;  %v3593_v60 = vld [vmem:[%s5140_s12 + $0x20] sm:$0xff]  }
 0x727   :  { %v1921_v63 = vpop.xlane.xlu0 %1920  ;;  %v3594_v58 = vld [vmem:[%s5140_s12 + $0xa0] sm:$0xff]  }
 0x728   :  { %3743 = vrsqrt.f32 %v1938_v4  ;;  %v1932_v14 = vmul.f32 0.0078125, %v1921_v63  ;;  %v3595_v4 = vld [vmem:[%s5140_s12 + $0x58] sm:$0xff]  }
 0x729   :  { %3745 = vrsqrt.f32 %v1939_v19 }
 0x72a   :  { %v1940_v49 = vadd.f32 1e-05, %v1932_v14 }
 0x72b   :  { %v1925_v15 = vpop.xlane.xlu0 %1924  ;;  %v1923_v62 = vpop.xlane.xlu1 %1922 }
 0x72c   :  { %v1933_v51 = vmul.f32 0.0078125, %v1923_v62  ;;  %3747 = vrsqrt.f32 %v1940_v49  ;;  %v1934_v59 = vmul.f32 0.0078125, %v1925_v15  ;;  %v3597_v15 = vld [vmem:[%s5140_s12 + $0x18] sm:$0xff]  }
 0x72d   :  { %v3740_v16 = vpop.eup %3739  ;;  %v3598_v62 = vld [vmem:[%s5140_s12 + $0x98] sm:$0xff]  }
 0x72e   :  { %v1952_v27 = vmul.f32 %v3740_v16, %v4716_v57  ;;  %v1941_v25 = vadd.f32 1e-05, %v1933_v51  ;;  %v1942_v24 = vadd.f32 1e-05, %v1934_v59  ;;  %v4849_v57 = vld [vmem:[%s5142_s9] ss:$0 sm:$0xff] }
 0x72f   :  { %v1927_v39 = vpop.xlane.xlu1 %1926  ;;  %v3599_v59 = vld [vmem:[%s5140_s12 + $0x50] sm:$0xff]  }
 0x730   :  { %v1935_v34 = vmul.f32 0.0078125, %v1927_v39  ;;  %3749 = vrsqrt.f32 %v1941_v25  ;;  %v1966_v26 = vmul.f32 %v4842_v8, %v1952_v27  ;;  %v3601_v25 = vld [vmem:[%s5140_s12 + $0x10] sm:$0xff]  }
 0x731   :  { %v3742_v42 = vpop.eup %3741  ;;  %v3602_v39 = vld [vmem:[%s5140_s12 + $0x90] sm:$0xff]  }
 0x732   :  { %v1953_v33 = vmul.f32 %v3742_v42, %v4720_v38  ;;  %v1943_v41 = vadd.f32 1e-05, %v1935_v34  ;;  %v4853_v47 = vadd.f32 %v4849_v57, %v1966_v26  ;;  %v3604_v34 = vld [vmem:[%s5140_s12 + $0xc8] sm:$0xff]   ;;  %v3609_v26 = vld [vmem:[%s5140_s12] sm:$0xff]  }
 0x733   :  { %v3605_v42 = vld [vmem:[%s5140_s12 + $0x8] sm:$0xff]  }
 0x734   :  { %3751 = vrsqrt.f32 %v1943_v41  ;;  %v1967_v45 = vmul.f32 %v4842_v8, %v1953_v33  ;;  %v3606_v33 = vld [vmem:[%s5140_s12 + $0x88] sm:$0xff]   ;;  %v3608_v41 = vld [vmem:[%s5140_s12 + $0xc0] sm:$0xff]  }
 0x735   :  { %v3744_v31 = vpop.eup %3743  ;;  %3753 = vrsqrt.f32 %v1942_v24  ;;  %v3607_v24 = vld [vmem:[%s5140_s12 + $0x40] sm:$0xff]  }
 0x736   :  { %v3746_v55 = vpop.eup %3745  ;;  %v4856_v38 = vadd.f32 %v4849_v57, %v1967_v45  ;;  %v1954_v46 = vmul.f32 %v3744_v31, %v4726_v28  ;;  %v3583_v28 = vld [vmem:[%s5140_s12 + $0x70] sm:$0xff]   ;;  %v2040_v45 = vsub.s32 3, %v3996_v52  ;;  %v2036_v31 = vsub.s32 2, %v3996_v52 }
 0x737   :  { %v1955_v53 = vmul.f32 %v3746_v55, %v4722_v30  ;;  %v3584_v30 = vld [vmem:[%s5140_s12 + $0xf0] sm:$0xff]   ;;  %v2024_v55 = vld [vmem:[%s5143_s11] sm:$0xf] }
 0x738   :  { %v1988_v11 = vpack.c.bf16 %v4856_v38, %v4853_v47  ;;  %v1968_v35 = vmul.f32 %v4842_v8, %v1954_v46 }
 0x739   :  { %v1969_v0 = vmul.f32 %v4842_v8, %v1955_v53  ;;  %v3748_v3 = vpop.eup %3747 }
 0x73a   :  { %2239 = vmatmul.mubr.bf16.vlgmr.msra.gmra.mxu1 %v1988_v11  ;;  %2312 = vmatmul.mubr.bf16.vlgmr.msra.gmra.mxu0 %v1988_v11  ;;  %v4879_v5 = vadd.f32 %v4849_v57, %v1968_v35  ;;  %v1956_v23 = vmul.f32 %v3748_v3, %v4732_v2  ;;  %v3591_v2 = vld [vmem:[%s5140_s12 + $0x60] sm:$0xff]   ;;  %v4999_v11 = vrot.slane %v2024_v55, %v238_v61 }
 0x73b   :  { %2248 = vmatprep.mubr.bf16.mxu1 %v3779_v1  ;;  %2321 = vmatprep.mubr.bf16.mxu0 %v3779_v1  ;;  %v4882_v13 = vadd.f32 %v4849_v57, %v1969_v0  ;;  %v5001_v35 = vrot.slane %v2024_v55, %v2040_v45 }
 0x73c   :  { %3155 = vmatpush3.bf16.msra.mxu1 %v3581_v44  ;;  %3195 = vmatpush3.bf16.msra.mxu0 %v3582_v29  ;;  %v1970_v10 = vmul.f32 %v4842_v8, %v1956_v23  ;;  %v5005_v44 = vrot.slane %v2024_v55, %v234_v56  ;;  %v5007_v29 = vrot.slane %v2024_v55, %v2036_v31 }
 0x73d   :  { %3156 = vmatprep.subr.bf16.mxu1 %v3583_v28  ;;  %3196 = vmatprep.subr.bf16.mxu0 %v3584_v30  ;;  %v3750_v18 = vpop.eup %3749  ;;  %v1989_v20 = vpack.c.bf16 %v4882_v13, %v4879_v5 }
 0x73e   :  { %v1957_v50 = vmul.f32 %v3750_v18, %v4738_v9  ;;  %v3592_v9 = vld [vmem:[%s5140_s12 + $0xe0] sm:$0xff]   ;;  %v4933_v19 = vadd.f32 %v4849_v57, %v1970_v10 }
 0x740   :  { %3157 = vmatpush3.bf16.msra.mxu1 %v3585_v7  ;;  %3197 = vmatpush3.bf16.msra.mxu0 %v3586_v36  ;;  %v1971_v37 = vmul.f32 %v4842_v8, %v1957_v50 }
 0x741   :  { %v3752_v12 = vpop.eup %3751  ;;  %3158 = vmatprep.subr.bf16.mxu1 %v3587_v32  ;;  %3198 = vmatprep.subr.bf16.mxu0 %v3588_v22 }
 0x742   :  { %2249 = vmatmul.mubr.bf16.gmra.mxu1 %v1989_v20  ;;  %2322 = vmatmul.mubr.bf16.gmra.mxu0 %v1989_v20  ;;  %v3754_v40 = vpop.eup %3753  ;;  %v4917_v17 = vadd.f32 %v4849_v57, %v1971_v37  ;;  %v1959_v21 = vmul.f32 %v3752_v12, %v4756_v54  ;;  %v3596_v54 = vld [vmem:[%s5140_s12 + $0xd8] sm:$0xff]  }
 0x743   :  { %2258 = vmatprep.mubr.bf16.mxu1 %v3779_v1  ;;  %2331 = vmatprep.mubr.bf16.mxu0 %v3779_v1  ;;  %v1958_v63 = vmul.f32 %v3754_v40, %v4736_v6 }
 0x744   :  { %3159 = vmatpush3.bf16.msra.mxu1 %v3589_v48  ;;  %3199 = vmatpush3.bf16.msra.mxu0 %v3590_v43  ;;  %v1990_v14 = vpack.c.bf16 %v4917_v17, %v4933_v19  ;;  %v1973_v49 = vmul.f32 %v4842_v8, %v1959_v21 }
 0x745   :  { %3160 = vmatprep.subr.bf16.mxu1 %v3591_v2  ;;  %3200 = vmatprep.subr.bf16.mxu0 %v3592_v9  ;;  %v1972_v6 = vmul.f32 %v4842_v8, %v1958_v63  ;;  %v3603_v8 = vld [vmem:[%s5140_s12 + $0x48] sm:$0xff]  }
 0x746   :  { %v4949_v51 = vadd.f32 %v4849_v57, %v1973_v49 }
 0x747   :  { %v4952_v16 = vadd.f32 %v4849_v57, %v1972_v6  ;;  %v3610_v57 = vld [vmem:[%s5140_s12 + $0x80] sm:$0xff]  }
 0x748   :  { %3161 = vmatpush3.bf16.msra.mxu1 %v3593_v60  ;;  %3201 = vmatpush3.bf16.msra.mxu0 %v3594_v58 }
 0x749   :  { %3162 = vmatprep.subr.bf16.mxu1 %v3595_v4  ;;  %3202 = vmatprep.subr.bf16.mxu0 %v3596_v54  ;;  %v1991_v27 = vpack.c.bf16 %v4949_v51, %v4952_v16 }
 0x74a   :  { %2259 = vmatmul.mubr.bf16.gmra.mxu1 %v1990_v14  ;;  %2332 = vmatmul.mubr.bf16.gmra.mxu0 %v1990_v14 }
 0x74b   :  { %2268 = vmatprep.mubr.bf16.mxu1 %v3779_v1  ;;  %2341 = vmatprep.mubr.bf16.mxu0 %v3779_v1  ;;  %v3600_v1 = vld [vmem:[%s5140_s12 + $0xd0] sm:$0xff]  }
 0x74c   :  { %3163 = vmatpush3.bf16.msra.mxu1 %v3597_v15  ;;  %3203 = vmatpush3.bf16.msra.mxu0 %v3598_v62 }
 0x74d   :  { %3164 = vmatprep.subr.bf16.mxu1 %v3599_v59  ;;  %3204 = vmatprep.subr.bf16.mxu0 %v3600_v1 }
 0x750   :  { %3165 = vmatpush3.bf16.msra.mxu1 %v3601_v25  ;;  %3205 = vmatpush3.bf16.msra.mxu0 %v3602_v39 }
 0x751   :  { %3166 = vmatprep.subr.bf16.mxu1 %v3603_v8  ;;  %3206 = vmatprep.subr.bf16.mxu0 %v3604_v34 }
 0x752   :  { %2269 = vmatmul.mubr.bf16.gmra.mxu1 %v1991_v27  ;;  %2342 = vmatmul.mubr.bf16.gmra.mxu0 %v1991_v27 }
 0x754   :  { %3167 = vmatpush3.bf16.msra.mxu1 %v3605_v42  ;;  %3207 = vmatpush3.bf16.msra.mxu0 %v3606_v33 }
 0x755   :  { %3168 = vmatprep.subr.bf16.mxu1 %v3607_v24  ;;  %3208 = vmatprep.subr.bf16.mxu0 %v3608_v41 }
 0x758   :  { %3169 = vmatpush3.bf16.msra.mxu1 %v3609_v26  ;;  %3209 = vmatpush3.bf16.msra.mxu0 %v3610_v57 }
 0x7fa   :  { %v2240_v46 = vpop.f32.mrf.mxu1  ;;  %v2313_v53 = vpop.f32.mrf.mxu0 }
 0x7fb   :  { %v2241_v22 = vadd.f32 %v2240_v46, %v5005_v44  ;;  %v2314_v52 = vadd.f32 %v2313_v53, %v5007_v29 }
 0x7fc   :  { %v2242_v0 = vpop.f32.mrf.mxu1  ;;  %v2315_v28 = vpop.f32.mrf.mxu0 }
 0x7fd   :  { %v2243_v7 = vadd.f32 %v2242_v0, %v4999_v11  ;;  %v2316_v36 = vadd.f32 %v2315_v28, %v5001_v35  ;;  %v2352_v40 = vmax.f32 %v2241_v22, 0.0  ;;  %v2354_v21 = vmax.f32 %v2314_v52, 0.0 }
 0x7fe   :  { %v2244_v30 = vpop.f32.mrf.mxu1  ;;  %v2317_v3 = vpop.f32.mrf.mxu0 }
 0x7ff   :  { %v2245_v32 = vadd.f32 %v2244_v30, %v5005_v44  ;;  %v2318_v61 = vadd.f32 %v2317_v3, %v5007_v29  ;;  %v2353_v37 = vmax.f32 %v2243_v7, 0.0  ;;  %v2355_v2 = vmax.f32 %v2316_v36, 0.0 }
 0x800   :  { %v2246_v56 = vpop.f32.mrf.mxu1  ;;  %v2319_v18 = vpop.f32.mrf.mxu0 }
 0x801   :  { %v2247_v23 = vadd.f32 %v2246_v56, %v4999_v11  ;;  %v2320_v50 = vadd.f32 %v2319_v18, %v5001_v35  ;;  %v2356_v20 = vmax.f32 %v2245_v32, 0.0  ;;  %v2358_v48 = vmax.f32 %v2318_v61, 0.0 }
 0x802   :  { %v2250_v43 = vpop.f32.mrf.mxu1  ;;  %v2323_v12 = vpop.f32.mrf.mxu0 }
 0x803   :  { %v2357_v9 = vmax.f32 %v2247_v23, 0.0  ;;  %v2359_v10 = vmax.f32 %v2320_v50, 0.0  ;;  %v2384_v63 = vpack.c.bf16 %v2356_v20, %v2352_v40  ;;  %v2386_v14 = vpack.c.bf16 %v2358_v48, %v2354_v21 }
 0x804   :  { %v2252_v60 = vpop.f32.mrf.mxu1  ;;  %v2325_v58 = vpop.f32.mrf.mxu0  ;;  %v2251_v1 = vadd.f32 %v2250_v43, %v5005_v44  ;;  %v2324_v25 = vadd.f32 %v2323_v12, %v5007_v29 }
 0x805   :  { %v2385_v4 = vpack.c.bf16 %v2357_v9, %v2353_v37  ;;  %v2387_v54 = vpack.c.bf16 %v2359_v10, %v2355_v2  ;;  %v2253_v49 = vadd.f32 %v2252_v60, %v4999_v11  ;;  %v2326_v6 = vadd.f32 %v2325_v58, %v5001_v35 }
 0x806   :  { %v2254_v15 = vpop.f32.mrf.mxu1  ;;  %v2327_v62 = vpop.f32.mrf.mxu0  ;;  %v2360_v46 = vmax.f32 %v2251_v1, 0.0  ;;  %v2362_v53 = vmax.f32 %v2324_v25, 0.0 }
 0x807   :  { %v2255_v27 = vadd.f32 %v2254_v15, %v5005_v44  ;;  %v2328_v59 = vadd.f32 %v2327_v62, %v5007_v29  ;;  %2695 = vmatprep.mubr.bf16.mxu1 %v2385_v4  ;;  %2760 = vmatprep.mubr.bf16.mxu0 %v2387_v54  ;;  %v2361_v57 = vmax.f32 %v2253_v49, 0.0  ;;  %v2363_v45 = vmax.f32 %v2326_v6, 0.0 }
 0x808   :  { %v2256_v39 = vpop.f32.mrf.mxu1  ;;  %v2329_v8 = vpop.f32.mrf.mxu0  ;;  %2696 = vmatmul.mubr.bf16.vlgmr.msra.gmra.mxu1 %v2384_v63  ;;  %2761 = vmatmul.mubr.bf16.vlgmr.msra.gmra.mxu0 %v2386_v14 }
 0x809   :  { %v2257_v34 = vadd.f32 %v2256_v39, %v4999_v11  ;;  %v2330_v42 = vadd.f32 %v2329_v8, %v5001_v35  ;;  %v2364_v33 = vmax.f32 %v2255_v27, 0.0  ;;  %v2366_v24 = vmax.f32 %v2328_v59, 0.0 }
 0x80a   :  { %v2260_v41 = vpop.f32.mrf.mxu1  ;;  %v2333_v26 = vpop.f32.mrf.mxu0 }
 0x80b   :  { %v2365_v31 = vmax.f32 %v2257_v34, 0.0  ;;  %v2367_v55 = vmax.f32 %v2330_v42, 0.0  ;;  %v2388_v7 = vpack.c.bf16 %v2364_v33, %v2360_v46  ;;  %v2390_v36 = vpack.c.bf16 %v2366_v24, %v2362_v53 }
 0x80c   :  { %v2262_v0 = vpop.f32.mrf.mxu1  ;;  %v2335_v28 = vpop.f32.mrf.mxu0  ;;  %v2261_v23 = vadd.f32 %v2260_v41, %v5005_v44  ;;  %v2334_v50 = vadd.f32 %v2333_v26, %v5007_v29 }
 0x80d   :  { %v2389_v30 = vpack.c.bf16 %v2365_v31, %v2361_v57  ;;  %v2391_v3 = vpack.c.bf16 %v2367_v55, %v2363_v45  ;;  %v2263_v32 = vadd.f32 %v2262_v0, %v4999_v11  ;;  %v2336_v52 = vadd.f32 %v2335_v28, %v5001_v35 }
 0x80e   :  { %v2264_v61 = vpop.f32.mrf.mxu1  ;;  %v2337_v22 = vpop.f32.mrf.mxu0  ;;  %v2368_v4 = vmax.f32 %v2261_v23, 0.0  ;;  %v2370_v54 = vmax.f32 %v2334_v50, 0.0 }
 0x80f   :  { %v2265_v56 = vadd.f32 %v2264_v61, %v5005_v44  ;;  %v2338_v18 = vadd.f32 %v2337_v22, %v5007_v29  ;;  %2703 = vmatprep.mubr.bf16.mxu1 %v2389_v30  ;;  %2768 = vmatprep.mubr.bf16.mxu0 %v2391_v3  ;;  %v2369_v40 = vmax.f32 %v2263_v32, 0.0  ;;  %v2371_v21 = vmax.f32 %v2336_v52, 0.0 }
 0x810   :  { %v2266_v20 = vpop.f32.mrf.mxu1  ;;  %v2339_v48 = vpop.f32.mrf.mxu0  ;;  %2704 = vmatmul.mubr.bf16.gmra.mxu1 %v2388_v7  ;;  %2769 = vmatmul.mubr.bf16.gmra.mxu0 %v2390_v36 }
 0x811   :  { %v2267_v43 = vadd.f32 %v2266_v20, %v4999_v11  ;;  %v2340_v12 = vadd.f32 %v2339_v48, %v5001_v35  ;;  %v2372_v37 = vmax.f32 %v2265_v56, 0.0  ;;  %v2374_v2 = vmax.f32 %v2338_v18, 0.0 }
 0x812   :  { %v2270_v9 = vpop.f32.mrf.mxu1  ;;  %v2343_v10 = vpop.f32.mrf.mxu0 }
 0x813   :  { %v2373_v60 = vmax.f32 %v2267_v43, 0.0  ;;  %v2375_v58 = vmax.f32 %v2340_v12, 0.0  ;;  %v2392_v62 = vpack.c.bf16 %v2372_v37, %v2368_v4  ;;  %v2394_v6 = vpack.c.bf16 %v2374_v2, %v2370_v54 }
 0x814   :  { %v2272_v63 = vpop.f32.mrf.mxu1  ;;  %v2345_v14 = vpop.f32.mrf.mxu0  ;;  %v2271_v34 = vadd.f32 %v2270_v9, %v5005_v44  ;;  %v2344_v42 = vadd.f32 %v2343_v10, %v5007_v29 }
 0x815   :  { %v2393_v49 = vpack.c.bf16 %v2373_v60, %v2369_v40  ;;  %v2395_v15 = vpack.c.bf16 %v2375_v58, %v2371_v21  ;;  %v2273_v27 = vadd.f32 %v2272_v63, %v4999_v11  ;;  %v2346_v25 = vadd.f32 %v2345_v14, %v5001_v35 }
 0x816   :  { %v2274_v59 = vpop.f32.mrf.mxu1  ;;  %v2347_v1 = vpop.f32.mrf.mxu0  ;;  %v2376_v0 = vmax.f32 %v2271_v34, 0.0  ;;  %v2378_v28 = vmax.f32 %v2344_v42, 0.0 }
 0x817   :  { %v2275_v39 = vadd.f32 %v2274_v59, %v5005_v44  ;;  %v2348_v8 = vadd.f32 %v2347_v1, %v5007_v29  ;;  %2711 = vmatprep.mubr.bf16.mxu1 %v2393_v49  ;;  %2776 = vmatprep.mubr.bf16.mxu0 %v2395_v15  ;;  %v2377_v31 = vmax.f32 %v2273_v27, 0.0  ;;  %v2379_v55 = vmax.f32 %v2346_v25, 0.0 }
 0x818   :  { %v2276_v33 = vpop.f32.mrf.mxu1  ;;  %v2349_v24 = vpop.f32.mrf.mxu0  ;;  %2712 = vmatmul.mubr.bf16.gmra.mxu1 %v2392_v62  ;;  %2777 = vmatmul.mubr.bf16.gmra.mxu0 %v2394_v6 }
 0x819   :  { %v2277_v41 = vadd.f32 %v2276_v33, %v4999_v11  ;;  %v2350_v26 = vadd.f32 %v2349_v24, %v5001_v35  ;;  %v2380_v57 = vmax.f32 %v2275_v39, 0.0  ;;  %v2382_v45 = vmax.f32 %v2348_v8, 0.0  ;;  %v5044_v35 = vld [vmem:[%s5144_s13] ss:$0 sm:$0xff] }
 0x81b   :  { %v2381_v46 = vmax.f32 %v2277_v41, 0.0  ;;  %v2383_v53 = vmax.f32 %v2350_v26, 0.0  ;;  %v2396_v3 = vpack.c.bf16 %v2380_v57, %v2376_v0  ;;  %v2398_v29 = vpack.c.bf16 %v2382_v45, %v2378_v28 }
 0x81d   :  { %v2397_v30 = vpack.c.bf16 %v2381_v46, %v2377_v31  ;;  %v2399_v44 = vpack.c.bf16 %v2383_v53, %v2379_v55 }
 0x81f   :  { %2719 = vmatprep.mubr.bf16.mxu1 %v2397_v30  ;;  %2784 = vmatprep.mubr.bf16.mxu0 %v2399_v44 }
 0x820   :  { %2720 = vmatmul.mubr.bf16.gmra.mxu1 %v2396_v3  ;;  %2785 = vmatmul.mubr.bf16.gmra.mxu0 %v2398_v29 }
 0x8c8   :  { %v3170_v7 = vpop.f32.mrf.mxu1  ;;  %v3210_v11 = vpop.f32.mrf.mxu0 }
 0x8ca   :  { %v3171_v36 = vpop.f32.mrf.mxu1  ;;  %v3211_v32 = vpop.f32.mrf.mxu0 }
 0x8cb   :  { %v3172_v61 = vadd.f32 %v3171_v36, %v3170_v7  ;;  %v3212_v18 = vadd.f32 %v3211_v32, %v3210_v11 }
 0x8cc   :  { %v3173_v22 = vpop.f32.mrf.mxu1  ;;  %v3213_v52 = vpop.f32.mrf.mxu0 }
 0x8cd   :  { %v2698_v56 = vadd.f32 %v3172_v61, %v5044_v35 }
 0x8ce   :  { %v3174_v23 = vpop.f32.mrf.mxu1  ;;  %v3214_v50 = vpop.f32.mrf.mxu0 }
 0x8cf   :  { %v2763_v20 = vadd.f32 %v3212_v18, %v2698_v56  ;;  %v3175_v48 = vadd.f32 %v3174_v23, %v3173_v22  ;;  %v3215_v2 = vadd.f32 %v3214_v50, %v3213_v52 }
 0x8d0   :  { %v3176_v43 = vpop.f32.mrf.mxu1  ;;  %v3216_v12 = vpop.f32.mrf.mxu0 }
 0x8d1   :  { %v2701_v37 = vadd.f32 %v3175_v48, %v5044_v35  ;;  %v5049_v9 = vadd.f32 %v2763_v20, %v4853_v47 }
 0x8d2   :  { %v3177_v10 = vpop.f32.mrf.mxu1  ;;  %v3217_v40 = vpop.f32.mrf.mxu0 }
 0x8d3   :  { %v2766_v21 = vadd.f32 %v3215_v2, %v2701_v37  ;;  %v3178_v60 = vadd.f32 %v3177_v10, %v3176_v43  ;;  %2803 = vadd.xlane.f32.xlu0 %v5049_v9  ;;  %v3218_v63 = vadd.f32 %v3217_v40, %v3216_v12 }
 0x8d4   :  { %v3179_v58 = vpop.f32.mrf.mxu1  ;;  %v3219_v4 = vpop.f32.mrf.mxu0 }
 0x8d5   :  { %v2706_v54 = vadd.f32 %v3178_v60, %v5044_v35  ;;  %v2794_v14 = vadd.f32 %v2766_v21, %v4856_v38 }
 0x8d6   :  { %v3180_v49 = vpop.f32.mrf.mxu1  ;;  %v3220_v15 = vpop.f32.mrf.mxu0 }
 0x8d7   :  { %v2771_v62 = vadd.f32 %v3218_v63, %v2706_v54  ;;  %v3181_v6 = vadd.f32 %v3180_v49, %v3179_v58  ;;  %2805 = vadd.xlane.f32.xlu1 %v2794_v14  ;;  %v3221_v1 = vadd.f32 %v3220_v15, %v3219_v4 }
 0x8d8   :  { %v3182_v47 = vpop.f32.mrf.mxu1  ;;  %v3222_v27 = vpop.f32.mrf.mxu0 }
 0x8d9   :  { %v2709_v59 = vadd.f32 %v3181_v6, %v5044_v35  ;;  %v2795_v25 = vadd.f32 %v2771_v62, %v4879_v5 }
 0x8da   :  { %v3183_v39 = vpop.f32.mrf.mxu1  ;;  %v3223_v8 = vpop.f32.mrf.mxu0 }
 0x8db   :  { %v2774_v34 = vadd.f32 %v3221_v1, %v2709_v59  ;;  %v3184_v42 = vadd.f32 %v3183_v39, %v3182_v47  ;;  %2807 = vadd.xlane.f32.xlu0 %v2795_v25  ;;  %v3224_v41 = vadd.f32 %v3223_v8, %v3222_v27 }
 0x8dc   :  { %v3185_v33 = vpop.f32.mrf.mxu1  ;;  %v3225_v24 = vpop.f32.mrf.mxu0 }
 0x8dd   :  { %v2714_v38 = vadd.f32 %v3184_v42, %v5044_v35  ;;  %v2796_v26 = vadd.f32 %v2774_v34, %v4882_v13 }
 0x8de   :  { %v3186_v57 = vpop.f32.mrf.mxu1  ;;  %v3226_v45 = vpop.f32.mrf.mxu0 }
 0x8df   :  { %v2779_v31 = vadd.f32 %v3224_v41, %v2714_v38  ;;  %v3187_v55 = vadd.f32 %v3186_v57, %v3185_v33  ;;  %2809 = vadd.xlane.f32.xlu1 %v2796_v26  ;;  %v3227_v0 = vadd.f32 %v3226_v45, %v3225_v24 }
 0x8e0   :  { %v3188_v46 = vpop.f32.mrf.mxu1  ;;  %v3228_v53 = vpop.f32.mrf.mxu0 }
 0x8e1   :  { %v2717_v5 = vadd.f32 %v3187_v55, %v5044_v35  ;;  %v2797_v28 = vadd.f32 %v2779_v31, %v4933_v19 }
 0x8e2   :  { %v3189_v30 = vpop.f32.mrf.mxu1  ;;  %v3229_v44 = vpop.f32.mrf.mxu0 }
 0x8e3   :  { %v2782_v3 = vadd.f32 %v3227_v0, %v2717_v5  ;;  %v3190_v29 = vadd.f32 %v3189_v30, %v3188_v46  ;;  %2811 = vadd.xlane.f32.xlu0 %v2797_v28  ;;  %v3230_v36 = vadd.f32 %v3229_v44, %v3228_v53  ;;  %v3064_v44 = vld [vmem:[%s5145_s14] ss:$0 sm:$0xff] }
 0x8e4   :  { %v3191_v7 = vpop.f32.mrf.mxu1  ;;  %v3231_v11 = vpop.f32.mrf.mxu0 }
 0x8e5   :  { %v2722_v13 = vadd.f32 %v3190_v29, %v5044_v35  ;;  %v2798_v32 = vadd.f32 %v2782_v3, %v4917_v17 }
 0x8e6   :  { %v3192_v61 = vpop.f32.mrf.mxu1  ;;  %v3232_v22 = vpop.f32.mrf.mxu0 }
 0x8e7   :  { %v2787_v52 = vadd.f32 %v3230_v36, %v2722_v13  ;;  %v3193_v56 = vadd.f32 %v3192_v61, %v3191_v7  ;;  %2813 = vadd.xlane.f32.xlu1 %v2798_v32  ;;  %v3233_v19 = vadd.f32 %v3232_v22, %v3231_v11  ;;  %v3065_v7 = vld [vmem:[%s5146_s15] ss:$0 sm:$0xff] }
 0x8e9   :  { %v2725_v18 = vadd.f32 %v3193_v56, %v5044_v35  ;;  %v2799_v23 = vadd.f32 %v2787_v52, %v4952_v16 }
 0x8eb   :  { %v2790_v50 = vadd.f32 %v3233_v19, %v2725_v18  ;;  %2815 = vadd.xlane.f32.xlu0 %v2799_v23 }
 0x8ed   :  { %v2800_v20 = vadd.f32 %v2790_v50, %v4949_v51 }
 0x8ef   :  { %2817 = vadd.xlane.f32.xlu1 %v2800_v20 }
 0x95c   :  { %v2804_v48 = vpop.xlane.xlu0 %2803 }
 0x95d   :  { %v2819_v43 = vmul.f32 0.0078125, %v2804_v48 }
 0x95f   :  { %v2827_v12 = vsub.f32 %v5049_v9, %v2819_v43 }
 0x960   :  { %v2806_v17 = vpop.xlane.xlu1 %2805 }
 0x961   :  { %v2820_v37 = vmul.f32 0.0078125, %v2806_v17  ;;  %v2835_v2 = vmul.f32 %v2827_v12, %v2827_v12 }
 0x963   :  { %v5066_v10 = vsub.f32 %v2794_v14, %v2820_v37  ;;  %2843 = vadd.xlane.f32.xlu0 %v2835_v2 }
 0x964   :  { %v2808_v40 = vpop.xlane.xlu0 %2807 }
 0x965   :  { %v2821_v35 = vmul.f32 0.0078125, %v2808_v40  ;;  %v2836_v16 = vmul.f32 %v5066_v10, %v5066_v10 }
 0x967   :  { %v5070_v21 = vsub.f32 %v2795_v25, %v2821_v35  ;;  %2845 = vadd.xlane.f32.xlu1 %v2836_v16 }
 0x968   :  { %v2810_v51 = vpop.xlane.xlu1 %2809 }
 0x969   :  { %v2822_v60 = vmul.f32 0.0078125, %v2810_v51  ;;  %v2837_v58 = vmul.f32 %v5070_v21, %v5070_v21 }
 0x96b   :  { %v5074_v9 = vsub.f32 %v2796_v26, %v2822_v60  ;;  %2847 = vadd.xlane.f32.xlu0 %v2837_v58 }
 0x96c   :  { %v2812_v4 = vpop.xlane.xlu0 %2811 }
 0x96d   :  { %v2823_v54 = vmul.f32 0.0078125, %v2812_v4  ;;  %v2838_v63 = vmul.f32 %v5074_v9, %v5074_v9 }
 0x96f   :  { %v5078_v14 = vsub.f32 %v2797_v28, %v2823_v54  ;;  %2849 = vadd.xlane.f32.xlu1 %v2838_v63 }
 0x970   :  { %v2814_v49 = vpop.xlane.xlu1 %2813 }
 0x971   :  { %v2824_v15 = vmul.f32 0.0078125, %v2814_v49  ;;  %v2839_v62 = vmul.f32 %v5078_v14, %v5078_v14 }
 0x973   :  { %v5082_v6 = vsub.f32 %v2798_v32, %v2824_v15  ;;  %2851 = vadd.xlane.f32.xlu0 %v2839_v62 }
 0x974   :  { %v2816_v47 = vpop.xlane.xlu0 %2815 }
 0x975   :  { %v2825_v27 = vmul.f32 0.0078125, %v2816_v47  ;;  %v2840_v59 = vmul.f32 %v5082_v6, %v5082_v6 }
 0x977   :  { %v5086_v1 = vsub.f32 %v2799_v23, %v2825_v27  ;;  %2853 = vadd.xlane.f32.xlu1 %v2840_v59 }
 0x978   :  { %v2818_v25 = vpop.xlane.xlu1 %2817 }
 0x979   :  { %v2826_v39 = vmul.f32 0.0078125, %v2818_v25  ;;  %v2841_v8 = vmul.f32 %v5086_v1, %v5086_v1 }
 0x97b   :  { %v5090_v34 = vsub.f32 %v2800_v20, %v2826_v39  ;;  %2855 = vadd.xlane.f32.xlu0 %v2841_v8 }
 0x97d   :  { %v2842_v42 = vmul.f32 %v5090_v34, %v5090_v34 }
 0x97f   :  { %2857 = vadd.xlane.f32.xlu1 %v2842_v42 }
 0x9ec   :  { %v2844_v33 = vpop.xlane.xlu0 %2843 }
 0x9ed   :  { %v2859_v24 = vmul.f32 0.0078125, %v2844_v33 }
 0x9ef   :  { %v2867_v38 = vadd.f32 1e-05, %v2859_v24 }
 0x9f0   :  { %v2846_v41 = vpop.xlane.xlu1 %2845 }
 0x9f1   :  { %3755 = vrsqrt.f32 %v2867_v38  ;;  %v2860_v26 = vmul.f32 0.0078125, %v2846_v41 }
 0x9f3   :  { %v2868_v57 = vadd.f32 1e-05, %v2860_v26 }
 0x9f4   :  { %v2848_v45 = vpop.xlane.xlu0 %2847 }
 0x9f5   :  { %3757 = vrsqrt.f32 %v2868_v57  ;;  %v2861_v31 = vmul.f32 0.0078125, %v2848_v45 }
 0x9f7   :  { %v2869_v55 = vadd.f32 1e-05, %v2861_v31 }
 0x9f8   :  { %v2850_v46 = vpop.xlane.xlu1 %2849 }
 0x9f9   :  { %3759 = vrsqrt.f32 %v2869_v55  ;;  %v2862_v53 = vmul.f32 0.0078125, %v2850_v46 }
 0x9fb   :  { %v2870_v5 = vadd.f32 1e-05, %v2862_v53 }
 0x9fc   :  { %v2852_v0 = vpop.xlane.xlu0 %2851 }
 0x9fd   :  { %3761 = vrsqrt.f32 %v2870_v5  ;;  %v2863_v28 = vmul.f32 0.0078125, %v2852_v0 }
 0x9fe   :  { %v3756_v30 = vpop.eup %3755 }
 0x9ff   :  { %v2883_v3 = vmul.f32 %v3756_v30, %v2827_v12  ;;  %v2871_v29 = vadd.f32 1e-05, %v2863_v28 }
 0xa00   :  { %v2854_v11 = vpop.xlane.xlu1 %2853 }
 0xa01   :  { %v2897_v13 = vmul.f32 %v3064_v44, %v2883_v3  ;;  %3763 = vrsqrt.f32 %v2871_v29  ;;  %v2864_v36 = vmul.f32 0.0078125, %v2854_v11 }
 0xa02   :  { %v3758_v32 = vpop.eup %3757 }
 0xa03   :  { %v2911_v61 = vadd.f32 %v3065_v7, %v2897_v13  ;;  %v2884_v22 = vmul.f32 %v3758_v32, %v5066_v10  ;;  %v2872_v52 = vadd.f32 1e-05, %v2864_v36 }
 0xa04   :  { %v2856_v56 = vpop.xlane.xlu0 %2855 }
 0xa05   :  { %2919 = vst [vmem:[%s5147_s16] sm:$0xff] %v2911_v61  ;;  %v2898_v18 = vmul.f32 %v3064_v44, %v2884_v22  ;;  %3765 = vrsqrt.f32 %v2872_v52  ;;  %v2865_v19 = vmul.f32 0.0078125, %v2856_v56 }
 0xa06   :  { %v3760_v23 = vpop.eup %3759 }
 0xa07   :  { %v2912_v50 = vadd.f32 %v3065_v7, %v2898_v18  ;;  %v2885_v20 = vmul.f32 %v3760_v23, %v5070_v21  ;;  %v2873_v48 = vadd.f32 1e-05, %v2865_v19 }
 0xa08   :  { %v2858_v43 = vpop.xlane.xlu1 %2857 }
 0xa09   :  { %2920 = vst [vmem:[%s5147_s16 + $0x8] sm:$0xff] %v2912_v50  ;;  %v2899_v12 = vmul.f32 %v3064_v44, %v2885_v20  ;;  %3767 = vrsqrt.f32 %v2873_v48  ;;  %v2866_v17 = vmul.f32 0.0078125, %v2858_v43 }
 0xa0a   :  { %v3762_v37 = vpop.eup %3761 }
 0xa0b   :  { %v2913_v2 = vadd.f32 %v3065_v7, %v2899_v12  ;;  %v2886_v10 = vmul.f32 %v3762_v37, %v5074_v9  ;;  %v2874_v40 = vadd.f32 1e-05, %v2866_v17 }
 0xa0d   :  { %2921 = vst [vmem:[%s5147_s16 + $0x10] sm:$0xff] %v2913_v2  ;;  %v2900_v35 = vmul.f32 %v3064_v44, %v2886_v10  ;;  %3769 = vrsqrt.f32 %v2874_v40 }
 0xa0e   :  { %v3764_v16 = vpop.eup %3763 }
 0xa0f   :  { %v2914_v21 = vadd.f32 %v3065_v7, %v2900_v35  ;;  %v2887_v51 = vmul.f32 %v3764_v16, %v5078_v14 }
 0xa11   :  { %2922 = vst [vmem:[%s5147_s16 + $0x18] sm:$0xff] %v2914_v21  ;;  %v2901_v60 = vmul.f32 %v3064_v44, %v2887_v51 }
 0xa12   :  { %v3766_v58 = vpop.eup %3765 }
 0xa13   :  { %v2915_v4 = vadd.f32 %v3065_v7, %v2901_v60  ;;  %v2888_v9 = vmul.f32 %v3766_v58, %v5082_v6 }
 0xa15   :  { %2923 = vst [vmem:[%s5147_s16 + $0x20] sm:$0xff] %v2915_v4  ;;  %v2902_v54 = vmul.f32 %v3064_v44, %v2888_v9 }
 0xa16   :  { %v3768_v63 = vpop.eup %3767 }
 0xa17   :  { %v2916_v49 = vadd.f32 %v3065_v7, %v2902_v54  ;;  %v2889_v15 = vmul.f32 %v3768_v63, %v5086_v1 }
 0xa19   :  { %2924 = vst [vmem:[%s5147_s16 + $0x28] sm:$0xff] %v2916_v49  ;;  %v2903_v14 = vmul.f32 %v3064_v44, %v2889_v15 }
 0xa1a   :  { %v3770_v62 = vpop.eup %3769 }
 0xa1b   :  { %v2917_v47 = vadd.f32 %v3065_v7, %v2903_v14  ;;  %v2890_v27 = vmul.f32 %v3770_v62, %v5090_v34 }
 0xa1d   :  { %2925 = vst [vmem:[%s5147_s16 + $0x30] sm:$0xff] %v2917_v47  ;;  %v2904_v6 = vmul.f32 %v3064_v44, %v2890_v27 }
 0xa1f   :  { %v2918_v59 = vadd.f32 %v3065_v7, %v2904_v6 }
 0xa21   :  { %2926 = vst [vmem:[%s5147_s16 + $0x38] sm:$0xff] %v2918_v59 }

</bundles_post_ra>
